<compile_context>
chip_gen: v7x
topology: tpu7x:2x2x1
jax: 0.10.0
libtpu: 0.0.40
codegen_flags: <defaults>
</compile_context>

<pallas_src>
import numpy as np

import jax
import jax.numpy as jnp
from jax.experimental import pallas as pl
from jax.experimental.pallas import tpu as pltpu


TB_DEFAULT = 32  # batch tile (sweep 32-64); keep a multiple of 16 (bf16 sublane pack)


# ----------------------------------------------------------------------------
# Fused kernel: conv1+relu+pool + conv2+relu+pool + fc1+relu + fc2
# Processes one batch tile of `tb` images per grid step.
# ----------------------------------------------------------------------------
def _badnet_kernel(x_ref, w1_ref, b1_ref, w2_ref, b2_ref, v_ref, b3_ref,
                   w4_ref, b4_ref, o_ref):
    tb = x_ref.shape[1]
    f32 = jnp.float32
    bf16 = jnp.bfloat16

    # ---- conv1 + ReLU: single K=160 banded matmul over (kh, padded width) --
    # rows = (oh, b), lanes out = (parity, ow//2, c) -> (24*tb, 512)
    xb = x_ref[...].reshape(28 * tb, 32)                       # bf16, no cast
    lhs1 = jnp.concatenate(
        [xb[kh * tb:(kh + 24) * tb] for kh in range(5)], axis=-1)  # (24*tb,160)
    a1 = jnp.dot(lhs1, w1_ref[...], preferred_element_type=f32)
    a1 = jnp.maximum(a1 + b1_ref[...], 0.0)                    # (24*tb, 512)

    # ---- maxpool1 2x2: rows via major-axis max, cols via lane-half max -----
    a1 = a1.reshape(12, 2, tb, 512)
    h1 = jnp.maximum(a1[:, 0], a1[:, 1])                       # (12, tb, 512)
    p1 = jnp.maximum(h1[:, :, :256], h1[:, :, 256:]).astype(bf16)  # (12,tb,256)

    # ---- conv2 + ReLU: single K=1280 matmul (vreg-aligned 256-lane chunks) -
    p1f = p1.reshape(12 * tb, 256)
    lhs2 = jnp.concatenate(
        [p1f[kh * tb:(kh + 8) * tb] for kh in range(5)], axis=-1)  # (8*tb,1280)
    a2 = jnp.dot(lhs2, w2_ref[...], preferred_element_type=f32)
    a2 = jnp.maximum(a2 + b2_ref[...], 0.0)                    # (8*tb, 256)

    # ---- maxpool2 2x2 -------------------------------------------------------
    a2 = a2.reshape(4, 2, tb, 256)
    h2 = jnp.maximum(a2[:, 0], a2[:, 1])                       # (4, tb, 256)
    p2 = jnp.maximum(h2[:, :, :128], h2[:, :, 128:]).astype(bf16)  # (4,tb,128)

    # ---- fc1 + ReLU: single (tb,512) x (512,128) matmul (N padded to 128) --
    lhs3 = jnp.concatenate([p2[h] for h in range(4)], axis=-1)  # (tb, 512)
    a3 = jnp.dot(lhs3, v_ref[...], preferred_element_type=f32)
    a3 = jnp.maximum(a3 + b3_ref[...], 0.0)                    # (tb, 128)

    # ---- fc2 -> lane-dense logits slab (cols 10..127 are zero) -------------
    o_ref[...] = jnp.dot(a3.astype(bf16), w4_ref[...],
                         preferred_element_type=f32) + b4_ref[...]


def _full_spec(arr):
    n = arr.ndim
    return pl.BlockSpec(arr.shape, lambda *i: (0,) * n)


def badnet_forward(prep, x, *, tb=TB_DEFAULT):
    """x: (B, 1, 28, 28) float32 -> logits (B, 10) float32."""
    B = x.shape[0]
    n_tiles = pl.cdiv(B, tb)
    b_pad = n_tiles * tb

    # Host-side pre-pack into per-tile contiguous bf16 (n_tiles, 28, tb, 32).
    # TODO(synk): in a real pipeline do this once per dataset / in the producer,
    # not per forward call.
    xs = x.reshape(B, 28, 28)
    xs = jnp.pad(xs, ((0, b_pad - B), (0, 0), (0, 4)))           # (b_pad,28,32)
    xs = xs.reshape(n_tiles, tb, 28, 32).transpose(0, 2, 1, 3)   # (nt,28,tb,32)
    xs = xs.astype(jnp.bfloat16)

    weights = (prep["W1"], prep["B1"], prep["W2"], prep["B2"],
               prep["V"], prep["B3"], prep["W4"], prep["B4"])

    # ~9.34 MFLOP / image (banded-padded network); weights ~1 MiB bf16.
    cost = pl.CostEstimate(flops=9_340_000 * b_pad, transcendentals=0,
                           bytes_accessed=2_304 * b_pad + 1_050_000)

    cp_kwargs = dict(dimension_semantics=("parallel",))
    if tb >= 128:  # v5e's 16 MiB scoped-VMEM default needs a bump at big tiles
        cp_kwargs["vmem_limit_bytes"] = 48 * 1024 * 1024

    out = pl.pallas_call(
        _badnet_kernel,
        out_shape=jax.ShapeDtypeStruct((b_pad, 128), jnp.float32),
        grid=(n_tiles,),
        in_specs=[pl.BlockSpec((None, 28, tb, 32), lambda i: (i, 0, 0, 0))]
                 + [_full_spec(w) for w in weights],
        out_specs=pl.BlockSpec((tb, 128), lambda i: (i, 0)),
        compiler_params=pltpu.CompilerParams(**cp_kwargs),
        cost_estimate=cost,
    )(xs, *weights)
    return out[:B, :10]


# ----------------------------------------------------------------------------
# One-time weight preparation (PyTorch layout -> fused/banded kernel layout)
# ----------------------------------------------------------------------------
def prepare_params(p):
    w1 = np.asarray(p["conv1_w"], np.float32)    # (16, 1, 5, 5)
    b1 = np.asarray(p["conv1_b"], np.float32)    # (16,)
    w2 = np.asarray(p["conv2_w"], np.float32)    # (32, 16, 5, 5)
    b2 = np.asarray(p["conv2_b"], np.float32)    # (32,)
    fw1 = np.asarray(p["fc1_w"], np.float32)     # (64, 512)
    fb1 = np.asarray(p["fc1_b"], np.float32)     # (64,)
    fw2 = np.asarray(p["fc2_w"], np.float32)     # (10, 64)
    fb2 = np.asarray(p["fc2_b"], np.float32)     # (10,)

    # conv1 banded weights, flattened to K = kh*32 + iw (iw = padded width):
    # out col = par*256 + (ow//2)*16 + c  (ow = 2j + par).
    # NOTE: lanes with j >= 12 must stay zero in both W1 and B1 (see header).
    W1 = np.zeros((5, 32, 512), np.float32)
    B1 = np.zeros((1, 512), np.float32)
    for ow in range(24):
        j, par = divmod(ow, 2)
        base = par * 256 + j * 16
        B1[0, base:base + 16] = b1
        for kh in range(5):
            for kw in range(5):
                W1[kh, ow + kw, base:base + 16] = w1[:, 0, kh, kw]
    W1 = W1.reshape(5 * 32, 512)                 # (160, 512)

    # conv2 banded weights, flattened to K = kh*256 + j*16 + c (j = pooled ow),
    # out col = q*128 + m*32 + d  (ow2 = 2m + q).  K rows with j >= 12 are 0.
    W2 = np.zeros((5, 256, 256), np.float32)
    B2 = np.zeros((1, 256), np.float32)
    for ow2 in range(8):
        m, q = divmod(ow2, 2)
        obase = q * 128 + m * 32
        B2[0, obase:obase + 32] = b2
        for kh in range(5):
            for kw in range(5):
                j = ow2 + kw
                W2[kh, j * 16:(j + 1) * 16, obase:obase + 32] = w2[:, :, kh, kw].T
    W2 = W2.reshape(5 * 256, 256)                # (1280, 256)

    # fc1: K = h2*128 + m*32 + d ; N padded 64 -> 128 lanes (zeros).
    V = np.zeros((4, 128, 64), np.float32)
    fw1_r = fw1.reshape(64, 32, 4, 4)            # (u, d, h2, w2)
    for h2 in range(4):
        V[h2] = fw1_r[:, :, h2, :].transpose(2, 1, 0).reshape(128, 64)
    V = np.pad(V.reshape(512, 64), ((0, 0), (0, 64)))        # (512, 128)
    B3 = np.pad(fb1.reshape(1, 64), ((0, 0), (0, 64)))       # (1, 128)

    # fc2: padded to (128, 128) so the output slab is lane-dense.
    W4 = np.pad(fw2.T, ((0, 64), (0, 118)))                  # (128, 128)
    B4 = np.pad(fb2.reshape(1, 10), ((0, 0), (0, 118)))      # (1, 128)

    bf = jnp.bfloat16
    return {
        "W1": jnp.asarray(W1, bf), "B1": jnp.asarray(B1),
        "W2": jnp.asarray(W2, bf), "B2": jnp.asarray(B2),
        "V": jnp.asarray(V, bf),   "B3": jnp.asarray(B3),
        "W4": jnp.asarray(W4, bf), "B4": jnp.asarray(B4),
    }


# ----------------------------------------------------------------------------
# PyTorch-layout params + pure-JAX reference (correctness check only)
# ----------------------------------------------------------------------------
def init_params(key):
    ks = jax.random.split(key, 8)
    scale = 0.05
    return {
        "conv1_w": scale * jax.random.normal(ks[0], (16, 1, 5, 5), jnp.float32),
        "conv1_b": scale * jax.random.normal(ks[1], (16,), jnp.float32),
        "conv2_w": scale * jax.random.normal(ks[2], (32, 16, 5, 5), jnp.float32),
        "conv2_b": scale * jax.random.normal(ks[3], (32,), jnp.float32),
        "fc1_w": scale * jax.random.normal(ks[4], (64, 32 * 4 * 4), jnp.float32),
        "fc1_b": scale * jax.random.normal(ks[5], (64,), jnp.float32),
        "fc2_w": scale * jax.random.normal(ks[6], (10, 64), jnp.float32),
        "fc2_b": scale * jax.random.normal(ks[7], (10,), jnp.float32),
    }


def badnet_reference(params, x):
    dn = jax.lax.conv_dimension_numbers(x.shape, params["conv1_w"].shape,
                                        ("NCHW", "OIHW", "NCHW"))

    def conv(x, w, b):
        y = jax.lax.conv_general_dilated(x, w, (1, 1), "VALID",
                                         dimension_numbers=dn)
        return jax.nn.relu(y + b[None, :, None, None])

    def pool(x):
        return jax.lax.reduce_window(x, -jnp.inf, jax.lax.max,
                                     (1, 1, 2, 2), (1, 1, 2, 2), "VALID")

    x = pool(conv(x, params["conv1_w"], params["conv1_b"]))
    x = pool(conv(x, params["conv2_w"], params["conv2_b"]))
    x = x.reshape(x.shape[0], -1)
    x = jax.nn.relu(x @ params["fc1_w"].T + params["fc1_b"])
    return x @ params["fc2_w"].T + params["fc2_b"]


if __name__ == "__main__":
    key = jax.random.PRNGKey(0)
    pkey, xkey = jax.random.split(key)
    params = init_params(pkey)
    prep = prepare_params(params)
    # MNIST-shaped input: the classifier's 32*4*4 fan-in fixes spatial to 28x28.
    x = jax.random.normal(xkey, (2, 1, 28, 28), jnp.float32)

    fwd = jax.jit(badnet_forward)
    logits = jax.block_until_ready(fwd(prep, x))

    ref = jax.block_until_ready(badnet_reference(params, x))
    assert logits.shape == (2, 10)
    # bf16 MXU operands (f32 accumulation) -> relaxed tolerance vs f32 reference.
    assert jnp.allclose(logits, ref, rtol=3e-2, atol=3e-2), (
        float(jnp.max(jnp.abs(logits - ref))))
    print("KERNEL_OK")
</pallas_src>

<mosaic_0001>
module attributes {stable_mosaic.version = 11 : i64} {
  func.func @_badnet_kernel(%arg0: i32, %arg1: memref<1x28x32x32xbf16, #tpu.memory_space<vmem>>, %arg2: memref<160x512xbf16, #tpu.memory_space<vmem>>, %arg3: memref<1x512xf32, #tpu.memory_space<vmem>>, %arg4: memref<1280x256xbf16, #tpu.memory_space<vmem>>, %arg5: memref<1x256xf32, #tpu.memory_space<vmem>>, %arg6: memref<512x128xbf16, #tpu.memory_space<vmem>>, %arg7: memref<1x128xf32, #tpu.memory_space<vmem>>, %arg8: memref<128x128xbf16, #tpu.memory_space<vmem>>, %arg9: memref<1x128xf32, #tpu.memory_space<vmem>>, %arg10: memref<32x128xf32, #tpu.memory_space<vmem>>) attributes {dimension_semantics = [#tpu.dimension_semantics<parallel>], iteration_bounds = array<i64: 1>, scalar_prefetch = 0 : i64, scratch_operands = 0 : i64, tpu.core_type = #tpu.core_type<tc>, window_params = [{transform_indices = @transform_0, window_bounds = array<i64: 1, 28, 32, 32>}, {pipeline_mode = #tpu.pipeline_mode<synchronous>, transform_indices = @transform_1, window_bounds = array<i64: 160, 512>}, {pipeline_mode = #tpu.pipeline_mode<synchronous>, transform_indices = @transform_2, window_bounds = array<i64: 1, 512>}, {pipeline_mode = #tpu.pipeline_mode<synchronous>, transform_indices = @transform_3, window_bounds = array<i64: 1280, 256>}, {pipeline_mode = #tpu.pipeline_mode<synchronous>, transform_indices = @transform_4, window_bounds = array<i64: 1, 256>}, {pipeline_mode = #tpu.pipeline_mode<synchronous>, transform_indices = @transform_5, window_bounds = array<i64: 512, 128>}, {pipeline_mode = #tpu.pipeline_mode<synchronous>, transform_indices = @transform_6, window_bounds = array<i64: 1, 128>}, {pipeline_mode = #tpu.pipeline_mode<synchronous>, transform_indices = @transform_7, window_bounds = array<i64: 128, 128>}, {pipeline_mode = #tpu.pipeline_mode<synchronous>, transform_indices = @transform_8, window_bounds = array<i64: 1, 128>}, {transform_indices = @transform_9, window_bounds = array<i64: 32, 128>}]} {
    %c0 = arith.constant 0 : index
    %c0_0 = arith.constant 0 : index
    %c0_1 = arith.constant 0 : index
    %c0_2 = arith.constant 0 : index
    %0 = vector.load %arg1[%c0, %c0_0, %c0_1, %c0_2] : memref<1x28x32x32xbf16, #tpu.memory_space<vmem>>, vector<1x28x32x32xbf16>
    %1 = vector.shape_cast %0 : vector<1x28x32x32xbf16> to vector<28x32x32xbf16>
    %2 = vector.shape_cast %1 : vector<28x32x32xbf16> to vector<896x32xbf16>
    %3 = vector.extract_strided_slice %2 {offsets = [0, 0], sizes = [768, 32], strides = [1, 1]} : vector<896x32xbf16> to vector<768x32xbf16>
    %4 = vector.extract_strided_slice %2 {offsets = [32, 0], sizes = [768, 32], strides = [1, 1]} : vector<896x32xbf16> to vector<768x32xbf16>
    %5 = vector.extract_strided_slice %2 {offsets = [64, 0], sizes = [768, 32], strides = [1, 1]} : vector<896x32xbf16> to vector<768x32xbf16>
    %6 = vector.extract_strided_slice %2 {offsets = [96, 0], sizes = [768, 32], strides = [1, 1]} : vector<896x32xbf16> to vector<768x32xbf16>
    %7 = vector.extract_strided_slice %2 {offsets = [128, 0], sizes = [768, 32], strides = [1, 1]} : vector<896x32xbf16> to vector<768x32xbf16>
    %8 = tpu.concatenate %3, %4, %5, %6, %7 in 1 : vector<768x32xbf16>, vector<768x32xbf16>, vector<768x32xbf16>, vector<768x32xbf16>, vector<768x32xbf16> -> vector<768x160xbf16>
    %c0_3 = arith.constant 0 : index
    %c0_4 = arith.constant 0 : index
    %9 = vector.load %arg2[%c0_3, %c0_4] : memref<160x512xbf16, #tpu.memory_space<vmem>>, vector<160x512xbf16>
    %cst = arith.constant dense<0.000000e+00> : vector<768x512xf32>
    %10 = tpu.matmul %8, %9, %cst {dimension_numbers = #tpu.dot_dimension_numbers<[1], [0], [0], [1], [0, 0, 1, 1], [], []>} : vector<768x160xbf16>, vector<160x512xbf16>, vector<768x512xf32> -> vector<768x512xf32>
    %c0_5 = arith.constant 0 : index
    %c0_6 = arith.constant 0 : index
    %11 = vector.load %arg3[%c0_5, %c0_6] : memref<1x512xf32, #tpu.memory_space<vmem>>, vector<1x512xf32>
    %12 = vector.broadcast %11 : vector<1x512xf32> to vector<768x512xf32>
    %13 = arith.addf %10, %12 : vector<768x512xf32>
    %cst_7 = arith.constant 0.000000e+00 : f32
    %14 = vector.broadcast %cst_7 : f32 to vector<768x512xf32>
    %15 = arith.maximumf %13, %14 : vector<768x512xf32>
    %16 = vector.shape_cast %15 : vector<768x512xf32> to vector<12x2x32x512xf32>
    %17 = vector.extract_strided_slice %16 {offsets = [0, 0, 0, 0], sizes = [12, 1, 32, 512], strides = [1, 1, 1, 1]} : vector<12x2x32x512xf32> to vector<12x1x32x512xf32>
    %18 = vector.shape_cast %17 : vector<12x1x32x512xf32> to vector<12x32x512xf32>
    %19 = vector.extract_strided_slice %16 {offsets = [0, 1, 0, 0], sizes = [12, 1, 32, 512], strides = [1, 1, 1, 1]} : vector<12x2x32x512xf32> to vector<12x1x32x512xf32>
    %20 = vector.shape_cast %19 : vector<12x1x32x512xf32> to vector<12x32x512xf32>
    %21 = arith.maximumf %18, %20 : vector<12x32x512xf32>
    %22 = vector.extract_strided_slice %21 {offsets = [0, 0, 0], sizes = [12, 32, 256], strides = [1, 1, 1]} : vector<12x32x512xf32> to vector<12x32x256xf32>
    %23 = vector.extract_strided_slice %21 {offsets = [0, 0, 256], sizes = [12, 32, 256], strides = [1, 1, 1]} : vector<12x32x512xf32> to vector<12x32x256xf32>
    %24 = arith.maximumf %22, %23 : vector<12x32x256xf32>
    %25 = arith.truncf %24 : vector<12x32x256xf32> to vector<12x32x256xbf16>
    %26 = vector.shape_cast %25 : vector<12x32x256xbf16> to vector<384x256xbf16>
    %27 = vector.extract_strided_slice %26 {offsets = [0, 0], sizes = [256, 256], strides = [1, 1]} : vector<384x256xbf16> to vector<256x256xbf16>
    %28 = vector.extract_strided_slice %26 {offsets = [32, 0], sizes = [256, 256], strides = [1, 1]} : vector<384x256xbf16> to vector<256x256xbf16>
    %29 = vector.extract_strided_slice %26 {offsets = [64, 0], sizes = [256, 256], strides = [1, 1]} : vector<384x256xbf16> to vector<256x256xbf16>
    %30 = vector.extract_strided_slice %26 {offsets = [96, 0], sizes = [256, 256], strides = [1, 1]} : vector<384x256xbf16> to vector<256x256xbf16>
    %31 = vector.extract_strided_slice %26 {offsets = [128, 0], sizes = [256, 256], strides = [1, 1]} : vector<384x256xbf16> to vector<256x256xbf16>
    %32 = tpu.concatenate %27, %28, %29, %30, %31 in 1 : vector<256x256xbf16>, vector<256x256xbf16>, vector<256x256xbf16>, vector<256x256xbf16>, vector<256x256xbf16> -> vector<256x1280xbf16>
    %c0_8 = arith.constant 0 : index
    %c0_9 = arith.constant 0 : index
    %33 = vector.load %arg4[%c0_8, %c0_9] : memref<1280x256xbf16, #tpu.memory_space<vmem>>, vector<1280x256xbf16>
    %cst_10 = arith.constant dense<0.000000e+00> : vector<256x256xf32>
    %34 = tpu.matmul %32, %33, %cst_10 {dimension_numbers = #tpu.dot_dimension_numbers<[1], [0], [0], [1], [0, 0, 1, 1], [], []>} : vector<256x1280xbf16>, vector<1280x256xbf16>, vector<256x256xf32> -> vector<256x256xf32>
    %c0_11 = arith.constant 0 : index
    %c0_12 = arith.constant 0 : index
    %35 = vector.load %arg5[%c0_11, %c0_12] : memref<1x256xf32, #tpu.memory_space<vmem>>, vector<1x256xf32>
    %36 = vector.broadcast %35 : vector<1x256xf32> to vector<256x256xf32>
    %37 = arith.addf %34, %36 : vector<256x256xf32>
    %cst_13 = arith.constant 0.000000e+00 : f32
    %38 = vector.broadcast %cst_13 : f32 to vector<256x256xf32>
    %39 = arith.maximumf %37, %38 : vector<256x256xf32>
    %40 = vector.shape_cast %39 : vector<256x256xf32> to vector<4x2x32x256xf32>
    %41 = vector.extract_strided_slice %40 {offsets = [0, 0, 0, 0], sizes = [4, 1, 32, 256], strides = [1, 1, 1, 1]} : vector<4x2x32x256xf32> to vector<4x1x32x256xf32>
    %42 = vector.shape_cast %41 : vector<4x1x32x256xf32> to vector<4x32x256xf32>
    %43 = vector.extract_strided_slice %40 {offsets = [0, 1, 0, 0], sizes = [4, 1, 32, 256], strides = [1, 1, 1, 1]} : vector<4x2x32x256xf32> to vector<4x1x32x256xf32>
    %44 = vector.shape_cast %43 : vector<4x1x32x256xf32> to vector<4x32x256xf32>
    %45 = arith.maximumf %42, %44 : vector<4x32x256xf32>
    %46 = vector.extract_strided_slice %45 {offsets = [0, 0, 0], sizes = [4, 32, 128], strides = [1, 1, 1]} : vector<4x32x256xf32> to vector<4x32x128xf32>
    %47 = vector.extract_strided_slice %45 {offsets = [0, 0, 128], sizes = [4, 32, 128], strides = [1, 1, 1]} : vector<4x32x256xf32> to vector<4x32x128xf32>
    %48 = arith.maximumf %46, %47 : vector<4x32x128xf32>
    %49 = arith.truncf %48 : vector<4x32x128xf32> to vector<4x32x128xbf16>
    %50 = vector.extract_strided_slice %49 {offsets = [0, 0, 0], sizes = [1, 32, 128], strides = [1, 1, 1]} : vector<4x32x128xbf16> to vector<1x32x128xbf16>
    %51 = vector.shape_cast %50 : vector<1x32x128xbf16> to vector<32x128xbf16>
    %52 = vector.extract_strided_slice %49 {offsets = [1, 0, 0], sizes = [1, 32, 128], strides = [1, 1, 1]} : vector<4x32x128xbf16> to vector<1x32x128xbf16>
    %53 = vector.shape_cast %52 : vector<1x32x128xbf16> to vector<32x128xbf16>
    %54 = vector.extract_strided_slice %49 {offsets = [2, 0, 0], sizes = [1, 32, 128], strides = [1, 1, 1]} : vector<4x32x128xbf16> to vector<1x32x128xbf16>
    %55 = vector.shape_cast %54 : vector<1x32x128xbf16> to vector<32x128xbf16>
    %56 = vector.extract_strided_slice %49 {offsets = [3, 0, 0], sizes = [1, 32, 128], strides = [1, 1, 1]} : vector<4x32x128xbf16> to vector<1x32x128xbf16>
    %57 = vector.shape_cast %56 : vector<1x32x128xbf16> to vector<32x128xbf16>
    %58 = tpu.concatenate %51, %53, %55, %57 in 1 : vector<32x128xbf16>, vector<32x128xbf16>, vector<32x128xbf16>, vector<32x128xbf16> -> vector<32x512xbf16>
    %c0_14 = arith.constant 0 : index
    %c0_15 = arith.constant 0 : index
    %59 = vector.load %arg6[%c0_14, %c0_15] : memref<512x128xbf16, #tpu.memory_space<vmem>>, vector<512x128xbf16>
    %cst_16 = arith.constant dense<0.000000e+00> : vector<32x128xf32>
    %60 = tpu.matmul %58, %59, %cst_16 {dimension_numbers = #tpu.dot_dimension_numbers<[1], [0], [0], [1], [0, 0, 1, 1], [], []>} : vector<32x512xbf16>, vector<512x128xbf16>, vector<32x128xf32> -> vector<32x128xf32>
    %c0_17 = arith.constant 0 : index
    %c0_18 = arith.constant 0 : index
    %61 = vector.load %arg7[%c0_17, %c0_18] : memref<1x128xf32, #tpu.memory_space<vmem>>, vector<1x128xf32>
    %62 = vector.broadcast %61 : vector<1x128xf32> to vector<32x128xf32>
    %63 = arith.addf %60, %62 : vector<32x128xf32>
    %cst_19 = arith.constant 0.000000e+00 : f32
    %64 = vector.broadcast %cst_19 : f32 to vector<32x128xf32>
    %65 = arith.maximumf %63, %64 : vector<32x128xf32>
    %66 = arith.truncf %65 : vector<32x128xf32> to vector<32x128xbf16>
    %c0_20 = arith.constant 0 : index
    %c0_21 = arith.constant 0 : index
    %67 = vector.load %arg8[%c0_20, %c0_21] : memref<128x128xbf16, #tpu.memory_space<vmem>>, vector<128x128xbf16>
    %cst_22 = arith.constant dense<0.000000e+00> : vector<32x128xf32>
    %68 = tpu.matmul %66, %67, %cst_22 {dimension_numbers = #tpu.dot_dimension_numbers<[1], [0], [0], [1], [0, 0, 1, 1], [], []>} : vector<32x128xbf16>, vector<128x128xbf16>, vector<32x128xf32> -> vector<32x128xf32>
    %c0_23 = arith.constant 0 : index
    %c0_24 = arith.constant 0 : index
    %69 = vector.load %arg9[%c0_23, %c0_24] : memref<1x128xf32, #tpu.memory_space<vmem>>, vector<1x128xf32>
    %70 = vector.broadcast %69 : vector<1x128xf32> to vector<32x128xf32>
    %71 = arith.addf %68, %70 : vector<32x128xf32>
    %c0_25 = arith.constant 0 : index
    %c0_26 = arith.constant 0 : index
    %72 = vector.load %arg10[%c0_25, %c0_26] : memref<32x128xf32, #tpu.memory_space<vmem>>, vector<32x128xf32>
    tpu.vector_store %arg10[%c0_25, %c0_26], %71 {strides = array<i32>} : memref<32x128xf32, #tpu.memory_space<vmem>>, vector<32x128xf32>,
    return
  }
  func.func @transform_0(%arg0: i32) -> (i32, i32, i32, i32) {
    %c0_i32 = arith.constant 0 : i32
    %c0_i32_0 = arith.constant 0 : i32
    %c0_i32_1 = arith.constant 0 : i32
    %c0_i32_2 = arith.constant 0 : i32
    return %arg0, %c0_i32, %c0_i32_0, %c0_i32_1 : i32, i32, i32, i32
  }
  func.func @transform_1(%arg0: i32) -> (i32, i32) {
    %c0_i32 = arith.constant 0 : i32
    %c0_i32_0 = arith.constant 0 : i32
    %c0_i32_1 = arith.constant 0 : i32
    return %c0_i32, %c0_i32_0 : i32, i32
  }
  func.func @transform_2(%arg0: i32) -> (i32, i32) {
    %c0_i32 = arith.constant 0 : i32
    %c0_i32_0 = arith.constant 0 : i32
    %c0_i32_1 = arith.constant 0 : i32
    return %c0_i32, %c0_i32_0 : i32, i32
  }
  func.func @transform_3(%arg0: i32) -> (i32, i32) {
    %c0_i32 = arith.constant 0 : i32
    %c0_i32_0 = arith.constant 0 : i32
    %c0_i32_1 = arith.constant 0 : i32
    return %c0_i32, %c0_i32_0 : i32, i32
  }
  func.func @transform_4(%arg0: i32) -> (i32, i32) {
    %c0_i32 = arith.constant 0 : i32
    %c0_i32_0 = arith.constant 0 : i32
    %c0_i32_1 = arith.constant 0 : i32
    return %c0_i32, %c0_i32_0 : i32, i32
  }
  func.func @transform_5(%arg0: i32) -> (i32, i32) {
    %c0_i32 = arith.constant 0 : i32
    %c0_i32_0 = arith.constant 0 : i32
    %c0_i32_1 = arith.constant 0 : i32
    return %c0_i32, %c0_i32_0 : i32, i32
  }
  func.func @transform_6(%arg0: i32) -> (i32, i32) {
    %c0_i32 = arith.constant 0 : i32
    %c0_i32_0 = arith.constant 0 : i32
    %c0_i32_1 = arith.constant 0 : i32
    return %c0_i32, %c0_i32_0 : i32, i32
  }
  func.func @transform_7(%arg0: i32) -> (i32, i32) {
    %c0_i32 = arith.constant 0 : i32
    %c0_i32_0 = arith.constant 0 : i32
    %c0_i32_1 = arith.constant 0 : i32
    return %c0_i32, %c0_i32_0 : i32, i32
  }
  func.func @transform_8(%arg0: i32) -> (i32, i32) {
    %c0_i32 = arith.constant 0 : i32
    %c0_i32_0 = arith.constant 0 : i32
    %c0_i32_1 = arith.constant 0 : i32
    return %c0_i32, %c0_i32_0 : i32, i32
  }
  func.func @transform_9(%arg0: i32) -> (i32, i32) {
    %c0_i32 = arith.constant 0 : i32
    %c0_i32_0 = arith.constant 0 : i32
    return %arg0, %c0_i32 : i32, i32
  }
}

</mosaic_0001>

<bundles_post_ra>
// kernel: badnet_forward.1
= control target key start
LH: loop header
LB: loop body
LE: loop exit
PB: predicated region body
PF: predicated region fallthrough
CT: control target
= control target key end

     0   :  { %14 = vsyncpa [#allocation3], 0  ;;  %s10119_s0 = inlined_call_operand.vmem [shape: bf16[1,28,32,32], index: 0, kind: input, shape index: {}]   ;;  %s10120_s1 = inlined_call_operand.vmem [shape: bf16[160,512], index: 1, kind: input, shape index: {}]   ;;  %s10121_s2 = inlined_call_operand.hbm [shape: f32[1,512], index: 2, kind: input, shape index: {}]   ;;  %s10122_s3 = inlined_call_operand.hbm [shape: bf16[1280,256], index: 3, kind: input, shape index: {}]   ;;  %s10123_s4 = inlined_call_operand.vmem [shape: f32[1,256], index: 4, kind: input, shape index: {}]   ;;  %s10124_s5 = inlined_call_operand.vmem [shape: bf16[512,128], index: 5, kind: input, shape index: {}]   ;;  %s10125_s6 = inlined_call_operand.hbm [shape: f32[1,128], index: 6, kind: input, shape index: {}]   ;;  %s10126_s7 = inlined_call_operand.hbm [shape: bf16[128,128], index: 7, kind: input, shape index: {}]   ;;  %s10127_s8 = inlined_call_operand.hbm [shape: f32[1,128], index: 8, kind: input, shape index: {}]   ;;  %s10128_s9 = inlined_call_operand.vmem [shape: f32[32,128], index: 9, kind: output, shape index: {}]  }
   0x1   :  { %15 = vsyncpa [#allocation5], 0 }
   0x2   :  { %16 = vsyncpa [#allocation8], 0  ;;  %s7240_s30 = smov [#allocation4]   ;;  %s7124_s13 = scalar_lea.hbm %s10122_s3, 20480 }
   0x3   :  { %s36_s10 = sshll.u32 %s7240_s30, 4  ;;  %p7125_p0 = scmp.ne.s32.totalorder %s10122_s3, %s7124_s13  ;;  %s37_s10 = int_to_ptr.vmem [resolvable:$true] %s36_s10 }
   0x4   :  { %p7128_p1 = scmp.lt.u32.totalorder %s7124_s13, %s10122_s3 }
   0x6   :  { %p7130_p2 = pnand %p7128_p1, %p7125_p0 }
   0x8   :  { %7133 = shalt.err (!%p7130_p2)
}
   0x9   :  { %s7134_s18 = scalar_lea.vmem %s37_s10, 20480  ;;  %p7139_p4 = scmp.lt.s32.totalorder %s37_s10, %s37_s10 }
   0xa   :  { %p7135_p3 = scmp.ne.s32.totalorder %s37_s10, %s7134_s18  ;;  %p7140_p5 = scmp.lt.s32.totalorder %s7134_s18, %s7134_s18 }
   0xc   :  { %p7141_p6 = por %p7140_p5, %p7139_p4 }
   0xe   :  { %p7142_p7 = pnand %p7141_p6, %p7135_p3 }
  0x10   :  { %7145 = shalt.err (!%p7142_p7)
}
  0x11   :  { %s7241_s19 = smov 128   ;;  %s7242_s20 = smov 8  }
  0x12   :  { %42 = dma.hbm_to_vmem [thread:$0]  %s10122_s3, 20480, %s37_s10, [#allocation5], %s7241_s19, %s7241_s19, %s7242_s20  }
  0x13   :  { %s7243_s23 = smov [#allocation7]   ;;  %s7146_s27 = scalar_lea.hbm %s10126_s7, 1024 }
  0x14   :  { %s62_s24 = sshll.u32 %s7243_s23, 4  ;;  %p7147_p8 = scmp.ne.s32.totalorder %s10126_s7, %s7146_s27  ;;  %s63_s24 = int_to_ptr.vmem [resolvable:$true] %s62_s24 }
  0x15   :  { %p7150_p9 = scmp.lt.u32.totalorder %s7146_s27, %s10126_s7 }
  0x17   :  { %p7152_p10 = pnand %p7150_p9, %p7147_p8 }
  0x19   :  { %7155 = shalt.err (!%p7152_p10)
}
  0x1a   :  { %s7156_s12 = scalar_lea.vmem %s63_s24, 1024  ;;  %p7161_p12 = scmp.lt.s32.totalorder %s63_s24, %s63_s24 }
  0x1b   :  { %p7157_p11 = scmp.ne.s32.totalorder %s63_s24, %s7156_s12  ;;  %p7162_p13 = scmp.lt.s32.totalorder %s7156_s12, %s7156_s12 }
  0x1d   :  { %p7163_p0 = por %p7162_p13, %p7161_p12 }
  0x1f   :  { %p7164_p1 = pnand %p7163_p0, %p7157_p11 }
  0x21   :  { %7167 = shalt.err (!%p7164_p1)
}
  0x22   :  { %s7244_s3 = smov 64   ;;  %s7245_s10 = smov 4  }
  0x23   :  { %68 = dma.hbm_to_vmem [thread:$0]  %s10126_s7, 1024, %s63_s24, [#allocation8], %s7244_s3, %s7244_s3, %s7245_s10  }
  0x24   :  { %s7246_s15 = smov [#allocation2]   ;;  %s7247_s17 = smov [#allocation6]  }
  0x25   :  { %s27_s16 = sshll.u32 %s7246_s15, 4  ;;  %s53_s18 = sshll.u32 %s7247_s17, 4  ;;  %s28_s16 = int_to_ptr.vmem [resolvable:$true] %s27_s16  ;;  %s54_s18 = int_to_ptr.vmem [resolvable:$true] %s53_s18 }
  0x26   :  { %s7168_s21 = scalar_lea.hbm %s10121_s2, 64 }
  0x27   :  { %p7169_p2 = scmp.ne.s32.totalorder %s10121_s2, %s7168_s21  ;;  %p7172_p3 = scmp.lt.u32.totalorder %s7168_s21, %s10121_s2 }
  0x29   :  { %p7174_p4 = pnand %p7172_p3, %p7169_p2 }
  0x2b   :  { %7177 = shalt.err (!%p7174_p4)
}
  0x2c   :  { %s7178_s7 = scalar_lea.vmem %s28_s16, 64  ;;  %p7183_p6 = scmp.lt.s32.totalorder %s28_s16, %s28_s16 }
  0x2d   :  { %p7179_p5 = scmp.ne.s32.totalorder %s28_s16, %s7178_s7  ;;  %p7184_p7 = scmp.lt.s32.totalorder %s7178_s7, %s7178_s7 }
  0x2f   :  { %p7185_p8 = por %p7184_p7, %p7183_p6 }
  0x31   :  { %p7186_p9 = pnand %p7185_p8, %p7179_p5 }
  0x33   :  { %7189 = shalt.err (!%p7186_p9)
}
  0x34   :  { %30 = dma.hbm_to_vmem [thread:$0]  %s10121_s2, 64, %s28_s16, [#allocation3]  }
  0x35   :  { %s7190_s30 = scalar_lea.hbm %s10125_s6, 16 }
  0x36   :  { %p7191_p10 = scmp.ne.s32.totalorder %s10125_s6, %s7190_s30  ;;  %p7194_p11 = scmp.lt.u32.totalorder %s7190_s30, %s10125_s6 }
  0x38   :  { %p7196_p12 = pnand %p7194_p11, %p7191_p10 }
  0x3a   :  { %7199 = shalt.err (!%p7196_p12)
}
  0x3b   :  { %s7200_s14 = scalar_lea.vmem %s54_s18, 16  ;;  %s7204_s15 = scalar_lea.vmem %s54_s18, 32 }
  0x3c   :  { %p7201_p13 = scmp.ne.s32.totalorder %s54_s18, %s7200_s14  ;;  %p7205_p0 = scmp.lt.s32.totalorder %s54_s18, %s54_s18 }
  0x3d   :  { %p7206_p1 = scmp.lt.s32.totalorder %s7204_s15, %s7200_s14 }
  0x3f   :  { %p7207_p2 = por %p7206_p1, %p7205_p0 }
  0x41   :  { %p7208_p3 = pnand %p7207_p2, %p7201_p13 }
  0x43   :  { %7211 = shalt.err (!%p7208_p3)
}
  0x44   :  { %56 = dma.hbm_to_vmem [thread:$0]  %s10125_s6, 16, %s54_s18, [#allocation5]  }
  0x45   :  { %s7248_s17 = smov [#allocation9]   ;;  %s7212_s22 = scalar_lea.hbm %s10127_s8, 16 }
  0x46   :  { %s75_s19 = sshll.u32 %s7248_s17, 4  ;;  %p7213_p4 = scmp.ne.s32.totalorder %s10127_s8, %s7212_s22  ;;  %s76_s19 = int_to_ptr.vmem [resolvable:$true] %s75_s19 }
  0x47   :  { %p7216_p5 = scmp.lt.u32.totalorder %s7212_s22, %s10127_s8 }
  0x49   :  { %p7218_p6 = pnand %p7216_p5, %p7213_p4 }
  0x4b   :  { %7221 = shalt.err (!%p7218_p6)
}
  0x4c   :  { %s7222_s24 = scalar_lea.vmem %s76_s19, 16  ;;  %s7226_s6 = scalar_lea.vmem %s76_s19, 32 }
  0x4d   :  { %p7223_p7 = scmp.ne.s32.totalorder %s76_s19, %s7222_s24  ;;  %p7227_p8 = scmp.lt.s32.totalorder %s76_s19, %s76_s19 }
  0x4e   :  { %p7228_p9 = scmp.lt.s32.totalorder %s7226_s6, %s7222_s24 }
  0x50   :  { %p7229_p10 = por %p7228_p9, %p7227_p8 }
  0x52   :  { %p7230_p11 = pnand %p7229_p10, %p7223_p7 }
  0x54   :  { %7233 = shalt.err (!%p7230_p11)
}
  0x55   :  { %78 = dma.hbm_to_vmem [thread:$0]  %s10127_s8, 16, %s76_s19, [#allocation8]  }
  0x56   :  { %7234 = dma.done.wait [#allocation3], 64  }
  0x57   :  { %7235 = vsyncadd [#allocation3], 4294967232 }
  0x58   :  { %7236 = dma.done.wait [#allocation5], 20496  }
  0x59   :  { %7237 = vsyncadd [#allocation5], 4294946800 }
  0x5a   :  { %7238 = dma.done.wait [#allocation8], 1040  }
  0x5b   :  { %7239 = vsyncadd [#allocation8], 4294966256  ;;  %v7366_v0 = vld [vmem:[%s10119_s0 + $0x78] sm:$0xff]   ;;  %s7249_s12 = smov 32   ;;  %v6662_v2 = vld [vmem:[%s10119_s0 + $0x88] sm:$0xff]   ;;  %s7250_s13 = smov 96  }
  0x5c   :  { %v6661_v1 = vld [vmem:[%s10119_s0 + $0x98] sm:$0xff]   ;;  %483 = vrot.lane.b32.xlu0 %v7366_v0, %s7249_s12  ;;  %v6663_v3 = vld [vmem:[%s10119_s0 + $0x80] sm:$0xff]   ;;  %v6664_v4 = vld [vmem:[%s10119_s0 + $0x90] sm:$0xff]   ;;  %vm775_vm0 = vcmask 261120   ;;  %vm920_vm1 = vcmask 523264   ;;  %vm1017_vm2 = vcmask 785408  }
  0x5d   :  { %695 = vrot.lane.b32.xlu1 %v6661_v1, %s7250_s13  ;;  %v6666_v5 = vld [vmem:[%s10119_s0 + $0xa8] sm:$0xff]   ;;  %v6665_v6 = vld [vmem:[%s10119_s0 + $0xa0] sm:$0xff]   ;;  %v7407_v9 = vld [vmem:[%s10119_s0 + $0xb0] sm:$0xff]  }
  0x5e   :  { %5938 = vmatprep.mubr.msk.bf16.mxu1 %vm775_vm0, %v6666_v5  ;;  %v6677_v7 = vld [vmem:[%s10120_s1 + $0x4] ss:$16 sps:$4 sm:$0xff]   ;;  %v6679_v8 = vld [vmem:[%s10120_s1] ss:$16 sps:$4 sm:$0xff]   ;;  %v7431_v15 = vld [vmem:[%s10119_s0 + $0xb8] sm:$0xff]  }
  0x5f   :  { %6309 = vmatprep.subr.bf16.mxu1 %v6677_v7  ;;  %v6681_v10 = vld [vmem:[%s10120_s1 + $0x24] ss:$16 sps:$4 sm:$0xff]   ;;  %v6683_v11 = vld [vmem:[%s10120_s1 + $0x20] ss:$16 sps:$4 sm:$0xff]   ;;  %1528 = vmatprep.subr.bf16.mxu0 %v6677_v7  ;;  %v7468_v23 = vld [vmem:[%s10119_s0 + $0xc8] sm:$0xff]  }
  0x60   :  { %589 = vrot.lane.b32.xlu0 %v6662_v2, %s7244_s3  ;;  %6319 = vmatpush1.bf16.msra.mxu1 %v6679_v8  ;;  %v6684_v12 = vld [vmem:[%s10120_s1 + $0x44] ss:$16 sps:$4 sm:$0xff]   ;;  %v6687_v13 = vld [vmem:[%s10120_s1 + $0x40] ss:$16 sps:$4 sm:$0xff]   ;;  %v7508_v31 = vld [vmem:[%s10119_s0 + $0xd8] sm:$0xff]  }
  0x61   :  { %485 = vrot.lane.b32.xlu1 %v6663_v3, %s7249_s12  ;;  %1529 = vmatpush1.bf16.msra.mxu0 %v6679_v8  ;;  %v6688_v14 = vld [vmem:[%s10120_s1 + $0x64] ss:$16 sps:$4 sm:$0xff]   ;;  %v6690_v16 = vld [vmem:[%s10120_s1 + $0x60] ss:$16 sps:$4 sm:$0xff]   ;;  %v6718_v34 = vld [vmem:[%s10120_s1 + $0xc] ss:$16 sps:$4 sm:$0xff]  }
  0x62   :  { %6310 = vmatprep.subr.bf16.mxu1 %v6681_v10  ;;  %1530 = vmatprep.subr.bf16.mxu0 %v6681_v10  ;;  %v6692_v17 = vld [vmem:[%s10120_s1 + $0x84] ss:$16 sps:$4 sm:$0xff]   ;;  %v6694_v19 = vld [vmem:[%s10120_s1 + $0x80] ss:$16 sps:$4 sm:$0xff]   ;;  %v7534_v35 = vld [vmem:[%s10119_s0 + $0xe8] sm:$0xff]  }
  0x63   :  { %v7446_v18 = vld [vmem:[%s10119_s0 + $0xc0] sm:$0xff]   ;;  %v7485_v26 = vld [vmem:[%s10119_s0 + $0xd0] sm:$0xff]   ;;  %v7556_v37 = vld [vmem:[%s10119_s0 + $0xf8] sm:$0xff]  }
  0x64   :  { %591 = vrot.lane.b32.xlu0 %v6664_v4, %s7244_s3  ;;  %6320 = vmatpush1.bf16.msra.mxu1 %v6683_v11  ;;  %v6695_v20 = vld [vmem:[%s10120_s1 + $0xa4] ss:$16 sps:$4 sm:$0xff]   ;;  %v6698_v21 = vld [vmem:[%s10120_s1 + $0xa0] ss:$16 sps:$4 sm:$0xff]   ;;  %v7578_v39 = vld [vmem:[%s10119_s0 + $0x108] sm:$0xff]  }
  0x65   :  { %697 = vrot.lane.b32.xlu1 %v6665_v6, %s7250_s13  ;;  %6311 = vmatprep.subr.bf16.mxu1 %v6684_v12  ;;  %v6699_v22 = vld [vmem:[%s10120_s1 + $0xc4] ss:$16 sps:$4 sm:$0xff]   ;;  %v6701_v24 = vld [vmem:[%s10120_s1 + $0xc0] ss:$16 sps:$4 sm:$0xff]   ;;  %v7600_v41 = vld [vmem:[%s10119_s0 + $0x118] sm:$0xff]  }
  0x66   :  { %1531 = vmatpush1.bf16.msra.mxu0 %v6683_v11  ;;  %v6703_v25 = vld [vmem:[%s10120_s1 + $0xe4] ss:$16 sps:$4 sm:$0xff]   ;;  %v6705_v27 = vld [vmem:[%s10120_s1 + $0xe0] ss:$16 sps:$4 sm:$0xff]   ;;  %v7629_v44 = vld [vmem:[%s10119_s0 + $0x128] sm:$0xff]  }
  0x67   :  { %1532 = vmatprep.subr.bf16.mxu0 %v6684_v12  ;;  %v6706_v28 = vld [vmem:[%s10120_s1 + $0x104] ss:$16 sps:$4 sm:$0xff]   ;;  %v6709_v29 = vld [vmem:[%s10120_s1 + $0x100] ss:$16 sps:$4 sm:$0xff]   ;;  %v7645_v46 = vld [vmem:[%s10119_s0 + $0x68] sm:$0xff]  }
  0x68   :  { %487 = vrot.lane.b32.xlu0 %v6662_v2, %s7249_s12  ;;  %6321 = vmatpush1.bf16.msra.mxu1 %v6687_v13  ;;  %v6711_v30 = vld [vmem:[%s10120_s1 + $0x124] ss:$16 sps:$4 sm:$0xff]   ;;  %v6713_v32 = vld [vmem:[%s10120_s1 + $0x120] ss:$16 sps:$4 sm:$0xff]   ;;  %v6716_v50 = vld [vmem:[%s10120_s1 + $0x8] ss:$16 sps:$4 sm:$0xff]  }
  0x69   :  { %593 = vrot.lane.b32.xlu1 %v6661_v1, %s7244_s3  ;;  %6312 = vmatprep.subr.bf16.mxu1 %v6688_v14  ;;  %v7518_v33 = vld [vmem:[%s10119_s0 + $0xe0] sm:$0xff]   ;;  %v7543_v36 = vld [vmem:[%s10119_s0 + $0xf0] sm:$0xff]   ;;  %v6726_v51 = vld [vmem:[%s10120_s1 + $0x2c] ss:$16 sps:$4 sm:$0xff]  }
  0x6a   :  { %1533 = vmatpush1.bf16.msra.mxu0 %v6687_v13  ;;  %v7567_v38 = vld [vmem:[%s10119_s0 + $0x100] sm:$0xff]   ;;  %v7587_v40 = vld [vmem:[%s10119_s0 + $0x110] sm:$0xff]   ;;  %v7669_v54 = vld [vmem:[%s10119_s0 + $0x138] sm:$0xff]  }
  0x6b   :  { %1534 = vmatprep.subr.bf16.mxu0 %v6688_v14  ;;  %v7609_v42 = vld [vmem:[%s10119_s0 + $0x120] sm:$0xff]   ;;  %v7638_v45 = vld [vmem:[%s10119_s0 + $0x130] sm:$0xff]   ;;  %v6724_v58 = vld [vmem:[%s10120_s1 + $0x28] ss:$16 sps:$4 sm:$0xff]  }
  0x6c   :  { %699 = vrot.lane.b32.xlu0 %v6666_v5, %s7250_s13  ;;  %6322 = vmatpush1.bf16.msra.mxu1 %v6690_v16  ;;  %v7614_v43 = vld [vmem:[%s10119_s0 + $0x40] sm:$0xff]   ;;  %v7654_v49 = vld [vmem:[%s10119_s0 + $0x70] sm:$0xff]   ;;  %v6733_v63 = vld [vmem:[%s10120_s1 + $0x4c] ss:$16 sps:$4 sm:$0xff]  }
  0x6d   :  { %489 = vrot.lane.b32.xlu1 %v6664_v4, %s7249_s12  ;;  %6313 = vmatprep.subr.bf16.mxu1 %v6692_v17  ;;  %v7690_v62 = vld [vmem:[%s10119_s0 + $0x140] sm:$0xff]   ;;  %v6741_v3 = vld [vmem:[%s10120_s1 + $0x6c] ss:$16 sps:$4 sm:$0xff]   ;;  %v6739_v7 = vld [vmem:[%s10120_s1 + $0x68] ss:$16 sps:$4 sm:$0xff]  }
  0x6e   :  { %1535 = vmatpush1.bf16.msra.mxu0 %v6690_v16  ;;  %5925 = vmatprep.mubr.msk.bf16.mxu0 %vm775_vm0, %v7614_v43  ;;  %v6752_v11 = vld [vmem:[%s10120_s1 + $0x8c] ss:$16 sps:$4 sm:$0xff]  }
  0x6f   :  { %1536 = vmatprep.subr.bf16.mxu0 %v6692_v17  ;;  %v7729_v12 = vld [vmem:[%s10119_s0 + $0x148] sm:$0xff]   ;;  %v7743_v17 = vld [vmem:[%s10119_s0 + $0x150] sm:$0xff]  }
  0x70   :  { %595 = vrot.lane.b32.xlu0 %v6665_v6, %s7244_s3  ;;  %6323 = vmatpush1.bf16.msra.mxu1 %v6694_v19  ;;  %v6758_v14 = vld [vmem:[%s10120_s1 + $0xac] ss:$16 sps:$4 sm:$0xff]  }
  0x71   :  { %701 = vrot.lane.b32.xlu1 %v7407_v9, %s7250_s13  ;;  %6314 = vmatprep.subr.bf16.mxu1 %v6695_v20 }
  0x72   :  { %1537 = vmatpush1.bf16.msra.mxu0 %v6694_v19 }
  0x73   :  { %1538 = vmatprep.subr.bf16.mxu0 %v6695_v20  ;;  %v6756_v20 = vld [vmem:[%s10120_s1 + $0xa8] ss:$16 sps:$4 sm:$0xff]  }
  0x74   :  { %491 = vrot.lane.b32.xlu0 %v6661_v1, %s7249_s12  ;;  %6324 = vmatpush1.bf16.msra.mxu1 %v6698_v21  ;;  %v6731_v1 = vld [vmem:[%s10120_s1 + $0x48] ss:$16 sps:$4 sm:$0xff]  }
  0x75   :  { %597 = vrot.lane.b32.xlu1 %v6666_v5, %s7244_s3  ;;  %6315 = vmatprep.subr.bf16.mxu1 %v6699_v22 }
  0x76   :  { %1539 = vmatpush1.bf16.msra.mxu0 %v6698_v21  ;;  %v7759_v21 = vld [vmem:[%s10119_s0 + $0x80] sm:$0xff]  }
  0x77   :  { %1540 = vmatprep.subr.bf16.mxu0 %v6699_v22 }
  0x78   :  { %703 = vrot.lane.b32.xlu0 %v7431_v15, %s7250_s13  ;;  %6325 = vmatpush1.bf16.msra.mxu1 %v6701_v24 }
  0x79   :  { %493 = vrot.lane.b32.xlu1 %v6665_v6, %s7249_s12  ;;  %6316 = vmatprep.subr.bf16.mxu1 %v6703_v25 }
  0x7a   :  { %1541 = vmatpush1.bf16.msra.mxu0 %v6701_v24 }
  0x7b   :  { %1542 = vmatprep.subr.bf16.mxu0 %v6703_v25 }
  0x7c   :  { %599 = vrot.lane.b32.xlu0 %v7407_v9, %s7244_s3  ;;  %6326 = vmatpush1.bf16.msra.mxu1 %v6705_v27 }
  0x7d   :  { %705 = vrot.lane.b32.xlu1 %v7446_v18, %s7250_s13  ;;  %6317 = vmatprep.subr.bf16.mxu1 %v6706_v28 }
  0x7e   :  { %1543 = vmatpush1.bf16.msra.mxu0 %v6705_v27 }
  0x7f   :  { %1544 = vmatprep.subr.bf16.mxu0 %v6706_v28 }
  0x80   :  { %495 = vrot.lane.b32.xlu0 %v6666_v5, %s7249_s12  ;;  %6327 = vmatpush1.bf16.msra.mxu1 %v6709_v29 }
  0x81   :  { %601 = vrot.lane.b32.xlu1 %v7431_v15, %s7244_s3  ;;  %6318 = vmatprep.subr.bf16.mxu1 %v6711_v30 }
  0x82   :  { %1545 = vmatpush1.bf16.msra.mxu0 %v6709_v29  ;;  %v7773_v29 = vld [vmem:[%s10119_s0 + $0x158] sm:$0xff]  }
  0x83   :  { %1546 = vmatprep.subr.bf16.mxu0 %v6711_v30 }
  0x84   :  { %707 = vrot.lane.b32.xlu0 %v7468_v23, %s7250_s13  ;;  %6328 = vmatpush1.bf16.msra.mxu1 %v6713_v32 }
  0x85   :  { %497 = vrot.lane.b32.xlu1 %v7407_v9, %s7249_s12  ;;  %2041 = vmatprep.subr.bf16.mxu1 %v6718_v34 }
  0x86   :  { %1547 = vmatpush1.bf16.msra.mxu0 %v6713_v32  ;;  %v7786_v32 = vld [vmem:[%s10119_s0 + $0x88] sm:$0xff]  }
  0x88   :  { %603 = vrot.lane.b32.xlu0 %v7446_v18, %s7244_s3 }
  0x89   :  { %709 = vrot.lane.b32.xlu1 %v7485_v26, %s7250_s13 }
  0x8c   :  { %499 = vrot.lane.b32.xlu0 %v7431_v15, %s7249_s12 }
  0x8d   :  { %605 = vrot.lane.b32.xlu1 %v7468_v23, %s7244_s3 }
  0x90   :  { %711 = vrot.lane.b32.xlu0 %v7508_v31, %s7250_s13 }
  0x91   :  { %501 = vrot.lane.b32.xlu1 %v7446_v18, %s7249_s12 }
  0x94   :  { %607 = vrot.lane.b32.xlu0 %v7485_v26, %s7244_s3 }
  0x95   :  { %713 = vrot.lane.b32.xlu1 %v7518_v33, %s7250_s13 }
  0x98   :  { %503 = vrot.lane.b32.xlu0 %v7468_v23, %s7249_s12 }
  0x99   :  { %609 = vrot.lane.b32.xlu1 %v7508_v31, %s7244_s3 }
  0x9c   :  { %715 = vrot.lane.b32.xlu0 %v7534_v35, %s7250_s13 }
  0x9d   :  { %505 = vrot.lane.b32.xlu1 %v7485_v26, %s7249_s12 }
  0xa0   :  { %611 = vrot.lane.b32.xlu0 %v7518_v33, %s7244_s3 }
  0xa1   :  { %717 = vrot.lane.b32.xlu1 %v7543_v36, %s7250_s13 }
  0xa4   :  { %507 = vrot.lane.b32.xlu0 %v7508_v31, %s7249_s12 }
  0xa5   :  { %613 = vrot.lane.b32.xlu1 %v7534_v35, %s7244_s3 }
  0xa8   :  { %719 = vrot.lane.b32.xlu0 %v7556_v37, %s7250_s13 }
  0xa9   :  { %509 = vrot.lane.b32.xlu1 %v7518_v33, %s7249_s12 }
  0xac   :  { %615 = vrot.lane.b32.xlu0 %v7543_v36, %s7244_s3 }
  0xad   :  { %721 = vrot.lane.b32.xlu1 %v7567_v38, %s7250_s13 }
  0xb0   :  { %511 = vrot.lane.b32.xlu0 %v7534_v35, %s7249_s12 }
  0xb1   :  { %617 = vrot.lane.b32.xlu1 %v7556_v37, %s7244_s3 }
  0xb4   :  { %723 = vrot.lane.b32.xlu0 %v7578_v39, %s7250_s13 }
  0xb5   :  { %513 = vrot.lane.b32.xlu1 %v7543_v36, %s7249_s12 }
  0xb8   :  { %619 = vrot.lane.b32.xlu0 %v7567_v38, %s7244_s3 }
  0xb9   :  { %725 = vrot.lane.b32.xlu1 %v7587_v40, %s7250_s13 }
  0xbc   :  { %515 = vrot.lane.b32.xlu0 %v7556_v37, %s7249_s12 }
  0xbd   :  { %621 = vrot.lane.b32.xlu1 %v7578_v39, %s7244_s3 }
  0xc0   :  { %727 = vrot.lane.b32.xlu0 %v7600_v41, %s7250_s13 }
  0xc1   :  { %517 = vrot.lane.b32.xlu1 %v7567_v38, %s7249_s12 }
  0xc4   :  { %623 = vrot.lane.b32.xlu0 %v7587_v40, %s7244_s3 }
  0xc5   :  { %729 = vrot.lane.b32.xlu1 %v7609_v42, %s7250_s13 }
  0xc8   :  { %519 = vrot.lane.b32.xlu0 %v7578_v39, %s7249_s12 }
  0xc9   :  { %625 = vrot.lane.b32.xlu1 %v7600_v41, %s7244_s3 }
  0xcc   :  { %731 = vrot.lane.b32.xlu0 %v7629_v44, %s7250_s13 }
  0xcd   :  { %521 = vrot.lane.b32.xlu1 %v7587_v40, %s7249_s12 }
  0xce   :  { %v484_v47 = vpop.permute.xlu0 %483 }
  0xcf   :  { %v696_v48 = vpop.permute.xlu1 %695  ;;  %v817_v52 = vsel %vm775_vm0, %v7645_v46, %v484_v47 }
  0xd0   :  { %627 = vrot.lane.b32.xlu0 %v7609_v42, %s7244_s3 }
  0xd1   :  { %733 = vrot.lane.b32.xlu1 %v7638_v45, %s7250_s13 }
  0xd2   :  { %v590_v53 = vpop.permute.xlu0 %589 }
  0xd3   :  { %v948_v55 = vsel %vm920_vm1, %v817_v52, %v590_v53  ;;  %v486_v56 = vpop.permute.xlu1 %485 }
  0xd4   :  { %523 = vrot.lane.b32.xlu0 %v7600_v41, %s7249_s12  ;;  %v7675_v57 = vsel %vm1017_vm2, %v948_v55, %v696_v48  ;;  %v820_v59 = vsel %vm775_vm0, %v7654_v49, %v486_v56  ;;  %v7813_v55 = vld [vmem:[%s10119_s0 + $0x90] sm:$0xff]  }
  0xd5   :  { %629 = vrot.lane.b32.xlu1 %v7629_v44, %s7244_s3  ;;  %1691 = vmatmul.mubr.bf16.vlgmr.msra.gmra.mrb[0].mxu1 %v7675_v57 }
  0xd6   :  { %2042 = vmatpush1.bf16.msra.mxu1 %v6716_v50  ;;  %v592_v60 = vpop.permute.xlu0 %591  ;;  %5939 = vmatprep.mubr.msk.bf16.mxu1 %vm775_vm0, %v7407_v9  ;;  %v7795_v50 = vld [vmem:[%s10119_s0 + $0x160] sm:$0xff]  }
  0xd7   :  { %v698_v61 = vpop.permute.xlu1 %697  ;;  %2043 = vmatprep.subr.bf16.mxu1 %v6726_v51  ;;  %v950_v2 = vsel %vm920_vm1, %v820_v59, %v592_v60  ;;  %v7824_v60 = vld [vmem:[%s10119_s0 + $0x168] sm:$0xff]  }
  0xd8   :  { %735 = vrot.lane.b32.xlu0 %v7669_v54, %s7250_s13  ;;  %v7709_v6 = vsel %vm1017_vm2, %v950_v2, %v698_v61  ;;  %v6760_v2 = vld [vmem:[%s10120_s1 + $0xc8] ss:$16 sps:$4 sm:$0xff]  }
  0xd9   :  { %525 = vrot.lane.b32.xlu1 %v7609_v42, %s7249_s12 }
  0xda   :  { %v488_v4 = vpop.permute.xlu0 %487  ;;  %2044 = vmatpush1.bf16.msra.mxu1 %v6724_v58 }
  0xdb   :  { %v594_v5 = vpop.permute.xlu1 %593  ;;  %2045 = vmatprep.subr.bf16.mxu1 %v6733_v63  ;;  %v823_v8 = vsel %vm775_vm0, %v7366_v0, %v488_v4  ;;  %v6750_v0 = vld [vmem:[%s10120_s1 + $0x88] ss:$16 sps:$4 sm:$0xff]   ;;  %v7846_v4 = vld [vmem:[%s10119_s0 + $0x170] sm:$0xff]  }
  0xdc   :  { %631 = vrot.lane.b32.xlu0 %v7638_v45, %s7244_s3  ;;  %v952_v13 = vsel %vm920_vm1, %v823_v8, %v594_v5  ;;  %v7059_v5 = vld [vmem:[%s10119_s0 + $0x98] sm:$0xff]  }
  0xdd   :  { %737 = vrot.lane.b32.xlu1 %v7690_v62, %s7250_s13  ;;  %1701 = vmatmul.mubr.bf16.gmra.mrb[4].mxu1 %v7709_v6 }
  0xde   :  { %v700_v9 = vpop.permute.xlu0 %699  ;;  %5940 = vmatprep.mubr.msk.bf16.mxu1 %vm775_vm0, %v7431_v15  ;;  %2046 = vmatpush1.bf16.msra.mxu1 %v6731_v1 }
  0xdf   :  { %v490_v10 = vpop.permute.xlu1 %489  ;;  %2047 = vmatprep.subr.bf16.mxu1 %v6741_v3  ;;  %v7748_v19 = vsel %vm1017_vm2, %v952_v13, %v700_v9  ;;  %v6762_v3 = vld [vmem:[%s10120_s1 + $0xcc] ss:$16 sps:$4 sm:$0xff]  }
  0xe0   :  { %527 = vrot.lane.b32.xlu0 %v7629_v44, %s7249_s12  ;;  %v826_v22 = vsel %vm775_vm0, %v7759_v21, %v490_v10 }
  0xe1   :  { %633 = vrot.lane.b32.xlu1 %v7669_v54, %s7244_s3 }
  0xe2   :  { %v596_v15 = vpop.permute.xlu0 %595  ;;  %2048 = vmatpush1.bf16.msra.mxu1 %v6739_v7 }
  0xe3   :  { %v702_v16 = vpop.permute.xlu1 %701  ;;  %2049 = vmatprep.subr.bf16.mxu1 %v6752_v11  ;;  %v954_v27 = vsel %vm920_vm1, %v826_v22, %v596_v15 }
  0xe4   :  { %739 = vrot.lane.b32.xlu0 %v7729_v12, %s7250_s13 }
  0xe5   :  { %529 = vrot.lane.b32.xlu1 %v7638_v45, %s7249_s12  ;;  %1711 = vmatmul.mubr.bf16.gmra.mrb[8].mxu1 %v7748_v19 }
  0xe6   :  { %v492_v24 = vpop.permute.xlu0 %491  ;;  %5941 = vmatprep.mubr.msk.bf16.mxu1 %vm775_vm0, %v7446_v18  ;;  %2050 = vmatpush1.bf16.msra.mxu1 %v6750_v0  ;;  %v7778_v18 = vsel %vm1017_vm2, %v954_v27, %v702_v16 }
  0xe7   :  { %v598_v25 = vpop.permute.xlu1 %597  ;;  %2051 = vmatprep.subr.bf16.mxu1 %v6758_v14  ;;  %v829_v34 = vsel %vm775_vm0, %v7786_v32, %v492_v24  ;;  %v7060_v14 = vld [vmem:[%s10119_s0 + $0xa0] sm:$0xff]  }
  0xe8   :  { %635 = vrot.lane.b32.xlu0 %v7690_v62, %s7244_s3  ;;  %v956_v51 = vsel %vm920_vm1, %v829_v34, %v598_v25  ;;  %v7886_v24 = vld [vmem:[%s10119_s0 + $0x180] sm:$0xff]  }
  0xe9   :  { %741 = vrot.lane.b32.xlu1 %v7743_v17, %s7250_s13 }
  0xea   :  { %v704_v28 = vpop.permute.xlu0 %703  ;;  %2052 = vmatpush1.bf16.msra.mxu1 %v6756_v20 }
  0xeb   :  { %v494_v30 = vpop.permute.xlu1 %493  ;;  %2053 = vmatprep.subr.bf16.mxu1 %v6762_v3 }
  0xec   :  { %531 = vrot.lane.b32.xlu0 %v7669_v54, %s7249_s12  ;;  %v832_v56 = vsel %vm775_vm0, %v7813_v55, %v494_v30 }
  0xed   :  { %637 = vrot.lane.b32.xlu1 %v7729_v12, %s7244_s3  ;;  %1721 = vmatmul.mubr.bf16.gmra.mrb[12].mxu1 %v7778_v18 }
  0xee   :  { %v600_v47 = vpop.permute.xlu0 %599  ;;  %5942 = vmatprep.mubr.msk.bf16.mxu1 %vm775_vm0, %v7468_v23  ;;  %v7805_v23 = vsel %vm1017_vm2, %v956_v51, %v704_v28  ;;  %2054 = vmatpush1.bf16.msra.mxu1 %v6760_v2  ;;  %v7061_v28 = vld [vmem:[%s10119_s0 + $0xa8] sm:$0xff]  }
  0xef   :  { %v706_v48 = vpop.permute.xlu1 %705  ;;  %v958_v61 = vsel %vm920_vm1, %v832_v56, %v600_v47  ;;  %v7923_v56 = vld [vmem:[%s10119_s0 + $0x190] sm:$0xff]   ;;  %v6765_v2 = vld [vmem:[%s10120_s1 + $0xec] ss:$16 sps:$4 sm:$0xff]  }
  0xf0   :  { %743 = vrot.lane.b32.xlu0 %v7773_v29, %s7250_s13  ;;  %2055 = vmatprep.subr.bf16.mxu1 %v6765_v2 }
  0xf1   :  { %533 = vrot.lane.b32.xlu1 %v7690_v62, %s7249_s12 }
  0xf2   :  { %v496_v52 = vpop.permute.xlu0 %495 }
  0xf3   :  { %v602_v53 = vpop.permute.xlu1 %601  ;;  %v835_v7 = vsel %vm775_vm0, %v7059_v5, %v496_v52 }
  0xf4   :  { %639 = vrot.lane.b32.xlu0 %v7743_v17, %s7244_s3  ;;  %v960_v10 = vsel %vm920_vm1, %v835_v7, %v602_v53 }
  0xf5   :  { %745 = vrot.lane.b32.xlu1 %v7795_v50, %s7250_s13  ;;  %1731 = vmatmul.mubr.bf16.gmra.mrb[16].mxu1 %v7805_v23 }
  0xf6   :  { %v708_v58 = vpop.permute.xlu0 %707  ;;  %5943 = vmatprep.mubr.msk.bf16.mxu1 %vm775_vm0, %v7485_v26  ;;  %v7832_v26 = vsel %vm1017_vm2, %v958_v61, %v706_v48  ;;  %v7907_v48 = vld [vmem:[%s10119_s0 + $0x188] sm:$0xff]  }
  0xf7   :  { %v498_v59 = vpop.permute.xlu1 %497  ;;  %10163 = vst [vmem:[#allocation13_spill] sm:$0xff] %v7832_v26  ;;  %v7862_v13 = vsel %vm1017_vm2, %v960_v10, %v708_v58  ;;  %v7062_v58 = vld [vmem:[%s10119_s0 + $0xb0] sm:$0xff]  }
  0xf8   :  { %535 = vrot.lane.b32.xlu0 %v7729_v12, %s7249_s12  ;;  %10164 = vst [vmem:[#allocation14_spill] sm:$0xff] %v7862_v13  ;;  %v838_v15 = vsel %vm775_vm0, %v7060_v14, %v498_v59 }
  0xf9   :  { %641 = vrot.lane.b32.xlu1 %v7773_v29, %s7244_s3 }
  0xfa   :  { %v604_v63 = vpop.permute.xlu0 %603 }
  0xfb   :  { %v710_v1 = vpop.permute.xlu1 %709  ;;  %v962_v22 = vsel %vm920_vm1, %v838_v15, %v604_v63  ;;  %v7969_v15 = vld [vmem:[%s10119_s0 + $0x1a0] sm:$0xff]  }
  0xfc   :  { %747 = vrot.lane.b32.xlu0 %v7824_v60, %s7250_s13 }
  0xfd   :  { %537 = vrot.lane.b32.xlu1 %v7743_v17, %s7249_s12  ;;  %1741 = vmatmul.mubr.bf16.gmra.mrb[20].mxu1 %v7832_v26 }
  0xfe   :  { %v500_v8 = vpop.permute.xlu0 %499  ;;  %5944 = vmatprep.mubr.msk.bf16.mxu1 %vm775_vm0, %v7508_v31  ;;  %v7867_v31 = vld [vmem:[%s10119_s0 + $0x178] sm:$0xff]  }
  0xff   :  { %v606_v9 = vpop.permute.xlu1 %605  ;;  %v841_v30 = vsel %vm775_vm0, %v7061_v28, %v500_v8  ;;  %v7950_v8 = vld [vmem:[%s10119_s0 + $0x198] sm:$0xff]  }
 0x100   :  { %643 = vrot.lane.b32.xlu0 %v7795_v50, %s7244_s3  ;;  %v964_v51 = vsel %vm920_vm1, %v841_v30, %v606_v9  ;;  %v7063_v9 = vld [vmem:[%s10119_s0 + $0xb8] sm:$0xff]   ;;  %v7996_v30 = vld [vmem:[%s10119_s0 + $0x1a8] sm:$0xff]  }
 0x101   :  { %749 = vrot.lane.b32.xlu1 %v7846_v4, %s7250_s13 }
 0x102   :  { %v712_v11 = vpop.permute.xlu0 %711 }
 0x103   :  { %v502_v0 = vpop.permute.xlu1 %501 }
 0x104   :  { %539 = vrot.lane.b32.xlu0 %v7773_v29, %s7249_s12  ;;  %v844_v59 = vsel %vm775_vm0, %v7062_v58, %v502_v0 }
 0x105   :  { %645 = vrot.lane.b32.xlu1 %v7824_v60, %s7244_s3  ;;  %1751 = vmatmul.mubr.bf16.gmra.mrb[24].mxu1 %v7862_v13 }
 0x106   :  { %v608_v16 = vpop.permute.xlu0 %607  ;;  %5945 = vmatprep.mubr.msk.bf16.mxu1 %vm775_vm0, %v7518_v33  ;;  %v7891_v33 = vsel %vm1017_vm2, %v962_v22, %v710_v1  ;;  %v6763_v1 = vld [vmem:[%s10120_s1 + $0xe8] ss:$16 sps:$4 sm:$0xff]   ;;  %v7064_v22 = vld [vmem:[%s10119_s0 + $0xc0] sm:$0xff]  }
 0x107   :  { %v714_v20 = vpop.permute.xlu1 %713  ;;  %10165 = vst [vmem:[#allocation15_spill] sm:$0xff] %v7891_v33  ;;  %v966_v3 = vsel %vm920_vm1, %v844_v59, %v608_v16  ;;  %2056 = vmatpush1.bf16.msra.mxu1 %v6763_v1  ;;  %v8026_v59 = vld [vmem:[%s10119_s0 + $0x30] sm:$0xff]  }
 0x108   :  { %751 = vrot.lane.b32.xlu0 %v7867_v31, %s7250_s13  ;;  %v7945_v7 = vsel %vm1017_vm2, %v966_v3, %v714_v20 }
 0x109   :  { %541 = vrot.lane.b32.xlu1 %v7795_v50, %s7249_s12  ;;  %10167 = vst [vmem:[#allocation17_spill] sm:$0xff] %v7945_v7 }
 0x10a   :  { %v504_v25 = vpop.permute.xlu0 %503 }
 0x10b   :  { %v610_v27 = vpop.permute.xlu1 %609  ;;  %v847_v10 = vsel %vm775_vm0, %v7063_v9, %v504_v25  ;;  %v8043_v9 = vld [vmem:[%s10119_s0 + $0x18] sm:$0xff]  }
 0x10c   :  { %647 = vrot.lane.b32.xlu0 %v7846_v4, %s7244_s3  ;;  %v968_v14 = vsel %vm920_vm1, %v847_v10, %v610_v27 }
 0x10d   :  { %753 = vrot.lane.b32.xlu1 %v7886_v24, %s7250_s13  ;;  %1761 = vmatmul.mubr.bf16.gmra.mrb[28].mxu1 %v7891_v33 }
 0x10e   :  { %v716_v34 = vpop.permute.xlu0 %715  ;;  %5946 = vmatprep.mubr.msk.bf16.mxu1 %vm775_vm0, %v7534_v35  ;;  %v7915_v35 = vsel %vm1017_vm2, %v964_v51, %v712_v11 }
 0x10f   :  { %v506_v47 = vpop.permute.xlu1 %505  ;;  %10166 = vst [vmem:[#allocation16_spill] sm:$0xff] %v7915_v35 }
 0x110   :  { %543 = vrot.lane.b32.xlu0 %v7824_v60, %s7249_s12  ;;  %v850_v25 = vsel %vm775_vm0, %v7064_v22, %v506_v47  ;;  %v8004_v47 = vld [vmem:[%s10119_s0 + $0x10] sm:$0xff]  }
 0x111   :  { %649 = vrot.lane.b32.xlu1 %v7867_v31, %s7244_s3 }
 0x112   :  { %v612_v52 = vpop.permute.xlu0 %611 }
 0x113   :  { %v718_v53 = vpop.permute.xlu1 %717 }
 0x114   :  { %755 = vrot.lane.b32.xlu0 %v7907_v48, %s7250_s13 }
 0x115   :  { %545 = vrot.lane.b32.xlu1 %v7846_v4, %s7249_s12  ;;  %1771 = vmatmul.mubr.bf16.gmra.mrb[32].mxu1 %v7915_v35 }
 0x116   :  { %v508_v61 = vpop.permute.xlu0 %507  ;;  %5947 = vmatprep.mubr.msk.bf16.mxu1 %vm775_vm0, %v7543_v36 }
 0x117   :  { %v614_v63 = vpop.permute.xlu1 %613 }
 0x118   :  { %651 = vrot.lane.b32.xlu0 %v7886_v24, %s7244_s3 }
 0x119   :  { %757 = vrot.lane.b32.xlu1 %v7923_v56, %s7250_s13 }
 0x11a   :  { %v720_v5 = vpop.permute.xlu0 %719 }
 0x11b   :  { %v510_v36 = vpop.permute.xlu1 %509 }
 0x11c   :  { %547 = vrot.lane.b32.xlu0 %v7867_v31, %s7249_s12 }
 0x11d   :  { %653 = vrot.lane.b32.xlu1 %v7907_v48, %s7244_s3  ;;  %1781 = vmatmul.mubr.bf16.gmra.mrb[36].mxu1 %v7945_v7 }
 0x11e   :  { %v616_v11 = vpop.permute.xlu0 %615  ;;  %5948 = vmatprep.mubr.msk.bf16.mxu1 %vm775_vm0, %v7556_v37  ;;  %v7976_v37 = vsel %vm1017_vm2, %v968_v14, %v716_v34  ;;  %v970_v34 = vsel %vm920_vm1, %v850_v25, %v612_v52  ;;  %v8018_v52 = vld [vmem:[%s10119_s0 + $0x20] sm:$0xff]   ;;  %v7066_v25 = vld [vmem:[%s10119_s0 + $0xd0] sm:$0xff]  }
 0x11f   :  { %v722_v0 = vpop.permute.xlu1 %721  ;;  %10168 = vst [vmem:[#allocation18_spill] sm:$0xff] %v7976_v37  ;;  %v8013_v58 = vsel %vm1017_vm2, %v970_v34, %v718_v53  ;;  %v7065_v53 = vld [vmem:[%s10119_s0 + $0xc8] sm:$0xff]  }
 0x120   :  { %759 = vrot.lane.b32.xlu0 %v7950_v8, %s7250_s13  ;;  %10169 = vst [vmem:[#allocation19_spill] sm:$0xff] %v8013_v58  ;;  %v853_v1 = vsel %vm775_vm0, %v7065_v53, %v508_v61  ;;  %v8051_v61 = vld [vmem:[%s10119_s0 + $0x28] sm:$0xff]  }
 0x121   :  { %549 = vrot.lane.b32.xlu1 %v7886_v24, %s7249_s12  ;;  %v972_v10 = vsel %vm920_vm1, %v853_v1, %v614_v63  ;;  %v8065_v63 = vld [vmem:[%s10119_s0 + $0x38] sm:$0xff]  }
 0x122   :  { %v512_v16 = vpop.permute.xlu0 %511  ;;  %v8058_v22 = vsel %vm1017_vm2, %v972_v10, %v720_v5  ;;  %v856_v5 = vsel %vm775_vm0, %v7066_v25, %v510_v36  ;;  %v6768_v53 = vld [vmem:[%s10120_s1 + $0x108] ss:$16 sps:$4 sm:$0xff]   ;;  %v6770_v1 = vld [vmem:[%s10120_s1 + $0x10c] ss:$16 sps:$4 sm:$0xff]  }
 0x123   :  { %v7971_v20 = vpop.permute.xlu1 %617  ;;  %10170 = vst [vmem:[#allocation20_spill] sm:$0xff] %v8058_v22  ;;  %2057 = vmatprep.subr.bf16.mxu1 %v6770_v1  ;;  %v974_v36 = vsel %vm920_vm1, %v856_v5, %v616_v11  ;;  %v7067_v11 = vld [vmem:[%s10119_s0 + $0xd8] sm:$0xff]   ;;  %v8118_v1 = vld [vmem:[%s10119_s0 + $0x48] sm:$0xff]  }
 0x124   :  { %655 = vrot.lane.b32.xlu0 %v7923_v56, %s7244_s3  ;;  %2058 = vmatpush1.bf16.msra.mxu1 %v6768_v53  ;;  %v859_v5 = vsel %vm775_vm0, %v7067_v11, %v512_v16 }
 0x125   :  { %761 = vrot.lane.b32.xlu1 %v7969_v15, %s7250_s13  ;;  %1791 = vmatmul.mubr.bf16.gmra.mrb[40].mxu1 %v7976_v37 }
 0x126   :  { %v7985_v27 = vpop.permute.xlu0 %723  ;;  %5949 = vmatprep.mubr.msk.bf16.mxu1 %vm775_vm0, %v7567_v38 }
 0x127   :  { %v7989_v28 = vpop.permute.xlu1 %513 }
 0x128   :  { %551 = vrot.lane.b32.xlu0 %v7907_v48, %s7249_s12 }
 0x129   :  { %657 = vrot.lane.b32.xlu1 %v7950_v8, %s7244_s3 }
 0x12a   :  { %v8006_v38 = vpop.permute.xlu0 %619 }
 0x12b   :  { %v8008_v51 = vpop.permute.xlu1 %725 }
 0x12c   :  { %763 = vrot.lane.b32.xlu0 %v7996_v30, %s7250_s13 }
 0x12d   :  { %1801 = vmatmul.mubr.bf16.gmra.mrb[44].mxu1 %v8013_v58  ;;  %457 = vrot.lane.b32.xlu1 %v8004_v47, %s7249_s12 }
 0x12e   :  { %v8032_v2 = vpop.permute.xlu0 %515  ;;  %5950 = vmatprep.mubr.msk.bf16.mxu1 %vm775_vm0, %v7578_v39 }
 0x12f   :  { %v8036_v3 = vpop.permute.xlu1 %621 }
 0x130   :  { %563 = vrot.lane.b32.xlu0 %v8018_v52, %s7244_s3 }
 0x131   :  { %669 = vrot.lane.b32.xlu1 %v8026_v59, %s7250_s13 }
 0x132   :  { %v8053_v39 = vpop.permute.xlu0 %727 }
 0x133   :  { %v8055_v14 = vpop.permute.xlu1 %517 }
 0x134   :  { %459 = vrot.lane.b32.xlu0 %v8043_v9, %s7249_s12 }
 0x135   :  { %1811 = vmatmul.mubr.bf16.gmra.mrb[48].mxu1 %v8058_v22  ;;  %565 = vrot.lane.b32.xlu1 %v8051_v61, %s7244_s3  ;;  %v8096_v22 = vsel %vm1017_vm2, %v974_v36, %v722_v0  ;;  %v976_v36 = vsel %vm920_vm1, %v859_v5, %v7971_v20  ;;  %v8140_v20 = vld [vmem:[%s10119_s0 + $0x50] sm:$0xff]   ;;  %v7068_v5 = vld [vmem:[%s10119_s0 + $0xe0] sm:$0xff]  }
 0x136   :  { %v8074_v34 = vpop.permute.xlu0 %623  ;;  %5951 = vmatprep.mubr.msk.bf16.mxu1 %vm775_vm0, %v7587_v40  ;;  %10171 = vst [vmem:[#allocation21_spill] sm:$0xff] %v8096_v22 }
 0x137   :  { %v8084_v10 = vpop.permute.xlu1 %729 }
 0x138   :  { %671 = vrot.lane.b32.xlu0 %v8065_v63, %s7250_s13 }
 0x139   :  { %461 = vrot.lane.b32.xlu1 %v8018_v52, %s7249_s12 }
 0x13a   :  { %v8091_v40 = vpop.permute.xlu0 %519 }
 0x13b   :  { %v8093_v25 = vpop.permute.xlu1 %625 }
 0x13c   :  { %567 = vrot.lane.b32.xlu0 %v8026_v59, %s7244_s3 }
 0x13d   :  { %1821 = vmatmul.mubr.bf16.gmra.mrb[52].mxu1 %v8096_v22  ;;  %673 = vrot.lane.b32.xlu1 %v7614_v43, %s7250_s13 }
 0x13e   :  { %v8107_v53 = vpop.permute.xlu0 %731  ;;  %5952 = vmatprep.mubr.msk.bf16.mxu1 %vm775_vm0, %v7600_v41  ;;  %v8130_v41 = vsel %vm1017_vm2, %v976_v36, %v7985_v27  ;;  %v862_v27 = vsel %vm775_vm0, %v7068_v5, %v7989_v28 }
 0x13f   :  { %v8111_v0 = vpop.permute.xlu1 %521  ;;  %10172 = vst [vmem:[#allocation22_spill] sm:$0xff] %v8130_v41  ;;  %v978_v22 = vsel %vm920_vm1, %v862_v27, %v8006_v38  ;;  %v7069_v38 = vld [vmem:[%s10119_s0 + $0xe8] sm:$0xff]  }
 0x140   :  { %463 = vrot.lane.b32.xlu0 %v8051_v61, %s7249_s12  ;;  %v8165_v28 = vsel %vm1017_vm2, %v978_v22, %v8008_v51  ;;  %v865_v51 = vsel %vm775_vm0, %v7069_v38, %v8032_v2  ;;  %v8197_v2 = vld [vmem:[%s10119_s0 + $0x60] sm:$0xff]  }
 0x141   :  { %569 = vrot.lane.b32.xlu1 %v8065_v63, %s7244_s3  ;;  %10173 = vst [vmem:[#allocation23_spill] sm:$0xff] %v8165_v28  ;;  %v980_v27 = vsel %vm920_vm1, %v865_v51, %v8036_v3  ;;  %v6773_v3 = vld [vmem:[%s10120_s1 + $0x12c] ss:$16 sps:$4 sm:$0xff]  }
 0x142   :  { %v8124_v16 = vpop.permute.xlu0 %627  ;;  %2059 = vmatprep.subr.bf16.mxu1 %v6773_v3 }
 0x143   :  { %v8126_v11 = vpop.permute.xlu1 %733 }
 0x144   :  { %675 = vrot.lane.b32.xlu0 %v8118_v1, %s7250_s13 }
 0x145   :  { %1831 = vmatmul.mubr.bf16.gmra.mrb[56].mxu1 %v8130_v41  ;;  %465 = vrot.lane.b32.xlu1 %v8026_v59, %s7249_s12 }
 0x146   :  { %v8147_v36 = vpop.permute.xlu0 %523  ;;  %5953 = vmatprep.mubr.msk.bf16.mxu1 %vm775_vm0, %v7609_v42  ;;  %v8172_v42 = vld [vmem:[%s10119_s0 + $0x58] sm:$0xff]  }
 0x147   :  { %v8151_v41 = vpop.permute.xlu1 %629 }
 0x148   :  { %571 = vrot.lane.b32.xlu0 %v7614_v43, %s7244_s3 }
 0x149   :  { %677 = vrot.lane.b32.xlu1 %v8140_v20, %s7250_s13 }
 0x14a   :  { %v8159_v58 = vpop.permute.xlu0 %735 }
 0x14b   :  { %v8161_v37 = vpop.permute.xlu1 %525 }
 0x14c   :  { %467 = vrot.lane.b32.xlu0 %v8065_v63, %s7249_s12 }
 0x14d   :  { %1841 = vmatmul.mubr.bf16.gmra.mrb[60].mxu1 %v8165_v28  ;;  %573 = vrot.lane.b32.xlu1 %v8118_v1, %s7244_s3 }
 0x14e   :  { %v8182_v22 = vpop.permute.xlu0 %631  ;;  %5954 = vmatprep.mubr.msk.bf16.mxu1 %vm775_vm0, %v7629_v44  ;;  %v8205_v44 = vsel %vm1017_vm2, %v980_v27, %v8053_v39  ;;  %v7070_v39 = vld [vmem:[%s10119_s0 + $0xf0] sm:$0xff]  }
 0x14f   :  { %v8186_v5 = vpop.permute.xlu1 %737  ;;  %10174 = vst [vmem:[#allocation24_spill] sm:$0xff] %v8205_v44  ;;  %v868_v51 = vsel %vm775_vm0, %v7070_v39, %v8055_v14 }
 0x150   :  { %679 = vrot.lane.b32.xlu0 %v8172_v42, %s7250_s13  ;;  %v982_v7 = vsel %vm920_vm1, %v868_v51, %v8074_v34  ;;  %v7071_v34 = vld [vmem:[%s10119_s0 + $0xf8] sm:$0xff]  }
 0x151   :  { %469 = vrot.lane.b32.xlu1 %v7614_v43, %s7249_s12  ;;  %v6771_v43 = vld [vmem:[%s10120_s1 + $0x128] ss:$16 sps:$4 sm:$0xff]  }
 0x152   :  { %v8199_v38 = vpop.permute.xlu0 %527  ;;  %2060 = vmatpush1.bf16.msra.mxu1 %v6771_v43  ;;  %v871_v43 = vsel %vm775_vm0, %v7071_v34, %v8091_v40 }
 0x153   :  { %v8201_v28 = vpop.permute.xlu1 %633 }
 0x154   :  { %575 = vrot.lane.b32.xlu0 %v8140_v20, %s7244_s3 }
 0x155   :  { %1851 = vmatmul.mubr.bf16.gmra.mrb[64].mxu1 %v8205_v44  ;;  %681 = vrot.lane.b32.xlu1 %v8197_v2, %s7250_s13 }
 0x156   :  { %v8223_v27 = vpop.permute.xlu0 %739  ;;  %5955 = vmatprep.mubr.msk.bf16.mxu1 %vm775_vm0, %v7638_v45  ;;  %v8241_v45 = vsel %vm1017_vm2, %v982_v7, %v8084_v10  ;;  %v984_v10 = vsel %vm920_vm1, %v871_v43, %v8093_v25  ;;  %v7072_v25 = vld [vmem:[%s10119_s0 + $0x100] sm:$0xff]  }
 0x157   :  { %v8227_v44 = vpop.permute.xlu1 %529  ;;  %10175 = vst [vmem:[#allocation25_spill] sm:$0xff] %v8241_v45  ;;  %v8271_v40 = vsel %vm1017_vm2, %v984_v10, %v8107_v53  ;;  %v874_v34 = vsel %vm775_vm0, %v7072_v25, %v8111_v0  ;;  %v8292_v10 = vld [vmem:[%s10119_s0 + $0x78] sm:$0xff]  }
 0x158   :  { %471 = vrot.lane.b32.xlu0 %v8118_v1, %s7249_s12  ;;  %10176 = vst [vmem:[#allocation26_spill] sm:$0xff] %v8271_v40 }
 0x159   :  { %577 = vrot.lane.b32.xlu1 %v8172_v42, %s7244_s3 }
 0x15a   :  { %v8235_v35 = vpop.permute.xlu0 %635 }
 0x15b   :  { %v8237_v14 = vpop.permute.xlu1 %741 }
 0x15c   :  { %683 = vrot.lane.b32.xlu0 %v7645_v46, %s7250_s13 }
 0x15d   :  { %1861 = vmatmul.mubr.bf16.gmra.mrb[68].mxu1 %v8241_v45  ;;  %473 = vrot.lane.b32.xlu1 %v8140_v20, %s7249_s12 }
 0x15e   :  { %v8253_v3 = vpop.permute.xlu0 %531  ;;  %5956 = vmatprep.mubr.msk.bf16.mxu1 %vm775_vm0, %v7669_v54 }
 0x15f   :  { %v8257_v7 = vpop.permute.xlu1 %637 }
 0x160   :  { %579 = vrot.lane.b32.xlu0 %v8197_v2, %s7244_s3 }
 0x161   :  { %685 = vrot.lane.b32.xlu1 %v7654_v49, %s7250_s13 }
 0x162   :  { %v8265_v39 = vpop.permute.xlu0 %743 }
 0x163   :  { %v8267_v51 = vpop.permute.xlu1 %533 }
 0x164   :  { %475 = vrot.lane.b32.xlu0 %v8172_v42, %s7249_s12 }
 0x165   :  { %1871 = vmatmul.mubr.bf16.gmra.mrb[72].mxu1 %v8271_v40  ;;  %581 = vrot.lane.b32.xlu1 %v7645_v46, %s7244_s3  ;;  %v986_v40 = vsel %vm920_vm1, %v874_v34, %v8124_v16  ;;  %v7074_v16 = vld [vmem:[%s10119_s0 + $0x108] sm:$0xff]  }
 0x166   :  { %v8283_v43 = vpop.permute.xlu0 %639  ;;  %5957 = vmatprep.mubr.msk.bf16.mxu1 %vm775_vm0, %v7690_v62  ;;  %v8306_v45 = vsel %vm1017_vm2, %v986_v40, %v8126_v11  ;;  %v877_v34 = vsel %vm775_vm0, %v7074_v16, %v8147_v36 }
 0x167   :  { %v8287_v53 = vpop.permute.xlu1 %745  ;;  %10177 = vst [vmem:[#allocation27_spill] sm:$0xff] %v8306_v45  ;;  %v988_v40 = vsel %vm920_vm1, %v877_v34, %v8151_v41 }
 0x168   :  { %687 = vrot.lane.b32.xlu0 %v8292_v10, %s7250_s13  ;;  %v8336_v36 = vsel %vm1017_vm2, %v988_v40, %v8159_v58 }
 0x169   :  { %477 = vrot.lane.b32.xlu1 %v8197_v2, %s7249_s12  ;;  %10178 = vst [vmem:[#allocation28_spill] sm:$0xff] %v8336_v36 }
 0x16a   :  { %v8300_v0 = vpop.permute.xlu0 %535 }
 0x16b   :  { %v8302_v25 = vpop.permute.xlu1 %641 }
 0x16c   :  { %583 = vrot.lane.b32.xlu0 %v7654_v49, %s7244_s3 }
 0x16d   :  { %1881 = vmatmul.mubr.bf16.gmra.mrb[76].mxu1 %v8306_v45  ;;  %689 = vrot.lane.b32.xlu1 %v7759_v21, %s7250_s13 }
 0x16e   :  { %v8318_v33 = vpop.permute.xlu0 %747  ;;  %5958 = vmatprep.mubr.msk.bf16.mxu1 %vm775_vm0, %v7729_v12 }
 0x16f   :  { %v8322_v11 = vpop.permute.xlu1 %537 }
 0x170   :  { %479 = vrot.lane.b32.xlu0 %v7645_v46, %s7249_s12  ;;  %v7075_v46 = vld [vmem:[%s10119_s0 + $0x110] sm:$0xff]  }
 0x171   :  { %585 = vrot.lane.b32.xlu1 %v8292_v10, %s7244_s3  ;;  %v880_v41 = vsel %vm775_vm0, %v7075_v46, %v8161_v37 }
 0x172   :  { %v8330_v45 = vpop.permute.xlu0 %643 }
 0x173   :  { %v8332_v13 = vpop.permute.xlu1 %749 }
 0x174   :  { %691 = vrot.lane.b32.xlu0 %v7786_v32, %s7250_s13 }
 0x175   :  { %1891 = vmatmul.mubr.bf16.gmra.mrb[80].mxu1 %v8336_v36  ;;  %481 = vrot.lane.b32.xlu1 %v7654_v49, %s7249_s12  ;;  %v990_v49 = vsel %vm920_vm1, %v880_v41, %v8182_v22 }
 0x176   :  { %v8348_v16 = vpop.permute.xlu0 %539  ;;  %5959 = vmatprep.mubr.msk.bf16.mxu1 %vm775_vm0, %v7743_v17  ;;  %v8366_v37 = vsel %vm1017_vm2, %v990_v49, %v8186_v5 }
 0x177   :  { %v8352_v58 = vpop.permute.xlu1 %645  ;;  %10179 = vst [vmem:[#allocation29_spill] sm:$0xff] %v8366_v37 }
 0x178   :  { %587 = vrot.lane.b32.xlu0 %v7759_v21, %s7244_s3  ;;  %v7076_v21 = vld [vmem:[%s10119_s0 + $0x118] sm:$0xff]  }
 0x179   :  { %693 = vrot.lane.b32.xlu1 %v7813_v55, %s7250_s13  ;;  %v883_v22 = vsel %vm775_vm0, %v7076_v21, %v8199_v38  ;;  %v7077_v38 = vld [vmem:[%s10119_s0 + $0x120] sm:$0xff]  }
 0x17a   :  { %v8360_v32 = vpop.permute.xlu0 %751  ;;  %v992_v5 = vsel %vm920_vm1, %v883_v22, %v8201_v28  ;;  %v886_v21 = vsel %vm775_vm0, %v7077_v38, %v8227_v44 }
 0x17b   :  { %v8362_v34 = vpop.permute.xlu1 %541  ;;  %v8388_v49 = vsel %vm1017_vm2, %v992_v5, %v8223_v27  ;;  %v994_v27 = vsel %vm920_vm1, %v886_v21, %v8235_v35 }
 0x17c   :  { %10180 = vst [vmem:[#allocation30_spill] sm:$0xff] %v8388_v49  ;;  %v8407_v26 = vsel %vm1017_vm2, %v994_v27, %v8237_v14 }
 0x17d   :  { %1901 = vmatmul.mubr.bf16.gmra.mrb[84].mxu1 %v8366_v37 }
 0x17e   :  { %v8374_v40 = vpop.permute.xlu0 %647  ;;  %5960 = vmatprep.mubr.msk.bf16.mxu1 %vm775_vm0, %v7773_v29 }
 0x17f   :  { %v8378_v55 = vpop.permute.xlu1 %753 }
 0x182   :  { %v8382_v46 = vpop.permute.xlu0 %543 }
 0x183   :  { %v8384_v41 = vpop.permute.xlu1 %649 }
 0x185   :  { %1911 = vmatmul.mubr.bf16.gmra.mrb[88].mxu1 %v8388_v49 }
 0x186   :  { %v8396_v37 = vpop.permute.xlu0 %755  ;;  %5961 = vmatprep.mubr.msk.bf16.mxu1 %vm775_vm0, %v7795_v50 }
 0x187   :  { %v546_v28 = vpop.permute.xlu1 %545 }
 0x188   :  { %v910_v22 = vsel %vm775_vm0, %v7795_v50, %v546_v28  ;;  %v7078_v50 = vld [vmem:[%s10119_s0 + $0x128] sm:$0xff]  }
 0x189   :  { %v889_v35 = vsel %vm775_vm0, %v7078_v50, %v8253_v3 }
 0x18a   :  { %v652_v5 = vpop.permute.xlu0 %651 }
 0x18b   :  { %v1010_v49 = vsel %vm920_vm1, %v910_v22, %v652_v5  ;;  %v758_v36 = vpop.permute.xlu1 %757 }
 0x18c   :  { %v8410_v44 = vsel %vm1017_vm2, %v1010_v49, %v758_v36  ;;  %v996_v49 = vsel %vm920_vm1, %v889_v35, %v8257_v7 }
 0x18d   :  { %10181 = vst [vmem:[#allocation31_spill] sm:$0xff] %v8410_v44  ;;  %1921 = vmatmul.mubr.bf16.gmra.mrb[92].mxu1 %v8407_v26  ;;  %v8432_v5 = vsel %vm1017_vm2, %v996_v49, %v8265_v39 }
 0x18e   :  { %v548_v38 = vpop.permute.xlu0 %547  ;;  %5962 = vmatprep.mubr.msk.bf16.mxu1 %vm775_vm0, %v7824_v60 }
 0x18f   :  { %v913_v14 = vsel %vm775_vm0, %v7824_v60, %v548_v38  ;;  %v654_v21 = vpop.permute.xlu1 %653  ;;  %v7079_v60 = vld [vmem:[%s10119_s0 + $0x130] sm:$0xff]  }
 0x190   :  { %v1012_v36 = vsel %vm920_vm1, %v913_v14, %v654_v21  ;;  %v892_v7 = vsel %vm775_vm0, %v7079_v60, %v8267_v51 }
 0x191   :  { %v998_v39 = vsel %vm920_vm1, %v892_v7, %v8283_v43  ;;  %v895_v43 = vsel %vm775_vm0, %v7669_v54, %v8300_v0  ;;  %v6767_v54 = vld [vmem:[%s10119_s0 + $0x8] sm:$0xff]  }
 0x192   :  { %v760_v28 = vpop.permute.xlu0 %759  ;;  %v1000_v7 = vsel %vm920_vm1, %v895_v43, %v8302_v25  ;;  %v898_v25 = vsel %vm775_vm0, %v7690_v62, %v8322_v11 }
 0x193   :  { %v550_v22 = vpop.permute.xlu1 %549  ;;  %v8426_v27 = vsel %vm1017_vm2, %v1012_v36, %v760_v28  ;;  %v8453_v28 = vsel %vm1017_vm2, %v998_v39, %v8287_v53 }
 0x194   :  { %10182 = vst [vmem:[#allocation32_spill] sm:$0xff] %v8426_v27  ;;  %v916_v3 = vsel %vm775_vm0, %v7846_v4, %v550_v22  ;;  %10184 = vst [vmem:[#allocation34_spill] sm:$0xff] %v8453_v28 }
 0x195   :  { %1931 = vmatmul.mubr.bf16.gmra.mrb[96].mxu1 %v8432_v5 }
 0x196   :  { %v656_v50 = vpop.permute.xlu0 %655  ;;  %5963 = vmatprep.mubr.msk.bf16.mxu1 %vm775_vm0, %v7846_v4  ;;  %v6766_v4 = vld [vmem:[%s10119_s0] sm:$0xff]  }
 0x197   :  { %v1014_v35 = vsel %vm920_vm1, %v916_v3, %v656_v50  ;;  %v762_v38 = vpop.permute.xlu1 %761 }
 0x198   :  { %v8444_v14 = vsel %vm1017_vm2, %v1014_v35, %v762_v38 }
 0x199   :  { %10183 = vst [vmem:[#allocation33_spill] sm:$0xff] %v8444_v14 }
 0x19a   :  { %v552_v21 = vpop.permute.xlu0 %551 }
 0x19b   :  { %v919_v36 = vsel %vm775_vm0, %v7867_v31, %v552_v21  ;;  %v658_v49 = vpop.permute.xlu1 %657 }
 0x19c   :  { %v1016_v51 = vsel %vm920_vm1, %v919_v36, %v658_v49  ;;  %v1204_v36 = vlaneseq }
 0x19d   :  { %1941 = vmatmul.mubr.bf16.gmra.mrb[100].mxu1 %v8453_v28 }
 0x19e   :  { %v764_v22 = vpop.permute.xlu0 %763  ;;  %5964 = vmatprep.mubr.msk.bf16.mxu1 %vm775_vm0, %v7867_v31  ;;  %v8479_v31 = vsel %vm1017_vm2, %v1000_v7, %v8318_v33  ;;  %v8494_v11 = vshrl.u32 %v1204_v36, 7 }
 0x19f   :  { %v458_v3 = vpop.permute.xlu1 %457  ;;  %v8465_v60 = vsel %vm1017_vm2, %v1016_v51, %v764_v22  ;;  %10186 = vst [vmem:[#allocation36_spill] sm:$0xff] %v8479_v31 }
 0x1a0   :  { %10185 = vst [vmem:[#allocation35_spill] sm:$0xff] %v8465_v60  ;;  %v778_v53 = vsel %vm775_vm0, %v6766_v4, %v458_v3  ;;  %v1002_v4 = vsel %vm920_vm1, %v898_v25, %v8330_v45  ;;  %10187 = vst [vmem:[#allocation37_spill] sm:$0xff] %v8494_v11  ;;  %v901_v45 = vsel %vm775_vm0, %v7729_v12, %v8348_v16  ;;  %v10147_v25 = vsub.s32 1, %v8494_v11 }
 0x1a1   :  { %v8501_v7 = vsel %vm1017_vm2, %v1002_v4, %v8332_v13  ;;  %v10148_v13 = vsub.s32 0, %v8494_v11  ;;  %v1004_v12 = vsel %vm920_vm1, %v901_v45, %v8352_v58 }
 0x1a2   :  { %v564_v50 = vpop.permute.xlu0 %563  ;;  %10188 = vst [vmem:[#allocation38_spill] sm:$0xff] %v8501_v7  ;;  %v8540_v58 = vsel %vm1017_vm2, %v1004_v12, %v8360_v32 }
 0x1a3   :  { %v922_v35 = vsel %vm920_vm1, %v778_v53, %v564_v50  ;;  %v670_v38 = vpop.permute.xlu1 %669  ;;  %10189 = vst [vmem:[#allocation39_spill] sm:$0xff] %v8540_v58 }
 0x1a4   :  { %v8475_v0 = vsel %vm1017_vm2, %v922_v35, %v670_v38 }
 0x1a5   :  { %1561 = vmatmul.mubr.bf16.vlgmr.msra.gmra.mrb[0].mxu0 %v8475_v0  ;;  %1951 = vmatmul.mubr.bf16.gmra.mrb[104].mxu1 %v8479_v31 }
 0x1a6   :  { %v460_v39 = vpop.permute.xlu0 %459  ;;  %5926 = vmatprep.mubr.msk.bf16.mxu0 %vm775_vm0, %v8118_v1  ;;  %5965 = vmatprep.mubr.msk.bf16.mxu1 %vm775_vm0, %v7886_v24 }
 0x1a7   :  { %v781_v21 = vsel %vm775_vm0, %v6767_v54, %v460_v39  ;;  %v566_v33 = vpop.permute.xlu1 %565  ;;  %v1202_v54 = vld [vmem:[#allocation2] sm:$0xf] }
 0x1a8   :  { %v1692_v49 = vpop.f32.mrb[0].mxu1  ;;  %v924_v51 = vsel %vm920_vm1, %v781_v21, %v566_v33  ;;  %v8530_v33 = vrot.slane %v1202_v54, %v10148_v13 }
 0x1a9   :  { %v1694_v43 = vpop.f32.mrb[1].mxu1 }
 0x1aa   :  { %v1696_v22 = vpop.f32.mrb[2].mxu1  ;;  %v672_v62 = vpop.permute.xlu0 %671  ;;  %v1693_v32 = vadd.f32 %v1692_v49, %v8530_v33 }
 0x1ab   :  { %v1698_v3 = vpop.f32.mrb[3].mxu1  ;;  %v8497_v53 = vsel %vm1017_vm2, %v924_v51, %v672_v62  ;;  %v462_v24 = vpop.permute.xlu1 %461  ;;  %v8536_v62 = vrot.slane %v1202_v54, %v10147_v25 }
 0x1ac   :  { %v784_v50 = vsel %vm775_vm0, %v8004_v47, %v462_v24 }
 0x1ad   :  { %1571 = vmatmul.mubr.bf16.gmra.mrb[4].mxu0 %v8497_v53  ;;  %1961 = vmatmul.mubr.bf16.gmra.mrb[108].mxu1 %v8501_v7 }
 0x1ae   :  { %v568_v35 = vpop.permute.xlu0 %567  ;;  %5927 = vmatprep.mubr.msk.bf16.mxu0 %vm775_vm0, %v8140_v20  ;;  %5966 = vmatprep.mubr.msk.bf16.mxu1 %vm775_vm0, %v7907_v48 }
 0x1af   :  { %v926_v38 = vsel %vm920_vm1, %v784_v50, %v568_v35  ;;  %v674_v47 = vpop.permute.xlu1 %673  ;;  %v904_v50 = vsel %vm775_vm0, %v7743_v17, %v8362_v34  ;;  %v1695_v17 = vadd.f32 %v1694_v43, %v8536_v62 }
 0x1b0   :  { %v8517_v39 = vpop.f32.mrb[4].mxu1  ;;  %v8526_v36 = vsel %vm1017_vm2, %v926_v38, %v674_v47  ;;  %v1697_v38 = vadd.f32 %v1696_v22, %v8530_v33 }
 0x1b1   :  { %v8521_v16 = vpop.f32.mrb[5].mxu1 }
 0x1b2   :  { %v8523_v21 = vpop.f32.mrb[6].mxu1  ;;  %v464_v48 = vpop.permute.xlu0 %463 }
 0x1b3   :  { %v8532_v51 = vpop.f32.mrb[7].mxu1  ;;  %v570_v4 = vpop.permute.xlu1 %569  ;;  %v787_v24 = vsel %vm775_vm0, %v8043_v9, %v464_v48  ;;  %v1006_v9 = vsel %vm920_vm1, %v904_v50, %v8374_v40  ;;  %v1699_v48 = vadd.f32 %v1698_v3, %v8536_v62 }
 0x1b4   :  { %v928_v45 = vsel %vm920_vm1, %v787_v24, %v570_v4  ;;  %v2658_v24 = vmax.f32 %v1693_v32, 0.0  ;;  %v8568_v22 = vsel %vm1017_vm2, %v1006_v9, %v8378_v55  ;;  %v907_v55 = vsel %vm775_vm0, %v7773_v29, %v8382_v46 }
 0x1b5   :  { %1581 = vmatmul.mubr.bf16.gmra.mrb[8].mxu0 %v8526_v36  ;;  %1971 = vmatmul.mubr.bf16.gmra.mrb[112].mxu1 %v8540_v58  ;;  %10190 = vst [vmem:[#allocation40_spill] sm:$0xff] %v8568_v22  ;;  %v2662_v58 = vmax.f32 %v1697_v38, 0.0  ;;  %v1008_v29 = vsel %vm920_vm1, %v907_v55, %v8384_v41  ;;  %v8607_v41 = vld [vmem:[%s10119_s0 + $0x68] sm:$0xff]  }
 0x1b6   :  { %5928 = vmatprep.mubr.msk.bf16.mxu0 %vm775_vm0, %v8172_v42  ;;  %5967 = vmatprep.mubr.msk.bf16.mxu1 %vm775_vm0, %v7923_v56  ;;  %v676_v35 = vpop.permute.xlu0 %675 }
 0x1b7   :  { %v466_v12 = vpop.permute.xlu1 %465  ;;  %v8563_v4 = vsel %vm1017_vm2, %v928_v45, %v676_v35  ;;  %v2663_v35 = vmax.f32 %v1699_v48, 0.0 }
 0x1b8   :  { %v1712_v34 = vpop.f32.mrb[8].mxu1 }
 0x1b9   :  { %v1713_v47 = vadd.f32 %v1712_v34, %v8530_v33  ;;  %v1714_v54 = vpop.f32.mrb[9].mxu1  ;;  %v2659_v34 = vmax.f32 %v1695_v17, 0.0 }
 0x1ba   :  { %v1715_v56 = vadd.f32 %v1714_v54, %v8536_v62  ;;  %v1716_v49 = vpop.f32.mrb[10].mxu1  ;;  %v572_v50 = vpop.permute.xlu0 %571  ;;  %v790_v54 = vsel %vm775_vm0, %v8018_v52, %v466_v12 }
 0x1bb   :  { %v2674_v25 = vmax.f32 %v1713_v47, 0.0  ;;  %v1717_v40 = vadd.f32 %v1716_v49, %v8530_v33  ;;  %v1718_v43 = vpop.f32.mrb[11].mxu1  ;;  %v678_v38 = vpop.permute.xlu1 %677 }
 0x1bc   :  { %v2675_v13 = vmax.f32 %v1715_v56, 0.0  ;;  %v1719_v3 = vadd.f32 %v1718_v43, %v8536_v62 }
 0x1bd   :  { %v8573_v45 = vmax.f32 %v2658_v24, %v2674_v25  ;;  %v2678_v32 = vmax.f32 %v1717_v40, 0.0  ;;  %1591 = vmatmul.mubr.bf16.gmra.mrb[12].mxu0 %v8563_v4  ;;  %1981 = vmatmul.mubr.bf16.gmra.mrb[116].mxu1 %v8568_v22  ;;  %v930_v25 = vsel %vm920_vm1, %v790_v54, %v572_v50 }
 0x1be   :  { %v8580_v9 = vmax.f32 %v2659_v34, %v2675_v13  ;;  %v2679_v17 = vmax.f32 %v1719_v3, 0.0  ;;  %5929 = vmatprep.mubr.msk.bf16.mxu0 %vm775_vm0, %v8197_v2  ;;  %5968 = vmatprep.mubr.msk.bf16.mxu1 %vm775_vm0, %v7950_v8  ;;  %v468_v13 = vpop.permute.xlu0 %467  ;;  %v8594_v56 = vsel %vm1017_vm2, %v930_v25, %v678_v38  ;;  %v8598_v8 = vsel %vm1017_vm2, %v1008_v29, %v8396_v37 }
 0x1bf   :  { %10191 = vst [vmem:[#allocation41_spill] sm:$0xff] %v8573_v45  ;;  %v8586_v52 = vmax.f32 %v2662_v58, %v2678_v32  ;;  %v574_v24 = vpop.permute.xlu1 %573  ;;  %10195 = vst [vmem:[#allocation45_spill] sm:$0xff] %v8598_v8  ;;  %v793_v58 = vsel %vm775_vm0, %v8051_v61, %v468_v13 }
 0x1c0   :  { %10192 = vst [vmem:[#allocation42_spill] sm:$0xff] %v8580_v9  ;;  %v8589_v47 = vmax.f32 %v2663_v35, %v2679_v17  ;;  %v1722_v12 = vpop.f32.mrb[12].mxu1  ;;  %v932_v37 = vsel %vm920_vm1, %v793_v58, %v574_v24 }
 0x1c1   :  { %10193 = vst [vmem:[#allocation43_spill] sm:$0xff] %v8586_v52  ;;  %v1724_v46 = vpop.f32.mrb[13].mxu1  ;;  %v1723_v35 = vadd.f32 %v1722_v12, %v8530_v33  ;;  %v6774_v12 = vld [vmem:[%s10119_s0 + $0x1b0] sm:$0xff]  }
 0x1c2   :  { %10194 = vst [vmem:[#allocation44_spill] sm:$0xff] %v8589_v47  ;;  %v1726_v48 = vpop.f32.mrb[14].mxu1  ;;  %v680_v40 = vpop.permute.xlu0 %679  ;;  %v1725_v25 = vadd.f32 %v1724_v46, %v8536_v62 }
 0x1c3   :  { %v1728_v49 = vpop.f32.mrb[15].mxu1  ;;  %v470_v50 = vpop.permute.xlu1 %469  ;;  %v8615_v3 = vsel %vm1017_vm2, %v932_v37, %v680_v40  ;;  %v1727_v29 = vadd.f32 %v1726_v48, %v8530_v33  ;;  %v2682_v46 = vmax.f32 %v1723_v35, 0.0 }
 0x1c4   :  { %v796_v55 = vsel %vm775_vm0, %v8026_v59, %v470_v50  ;;  %v1729_v37 = vadd.f32 %v1728_v49, %v8536_v62 }
 0x1c5   :  { %1601 = vmatmul.mubr.bf16.gmra.mrb[16].mxu0 %v8594_v56  ;;  %1991 = vmatmul.mubr.bf16.gmra.mrb[120].mxu1 %v8598_v8  ;;  %v2686_v47 = vmax.f32 %v1727_v29, 0.0 }
 0x1c6   :  { %5930 = vmatprep.mubr.msk.bf16.mxu0 %vm775_vm0, %v8607_v41  ;;  %5969 = vmatprep.mubr.msk.bf16.mxu1 %vm775_vm0, %v7969_v15  ;;  %v576_v32 = vpop.permute.xlu0 %575  ;;  %v8624_v15 = vld [vmem:[%s10119_s0 + $0x70] sm:$0xff]   ;;  %v2687_v35 = vmax.f32 %v1729_v37, 0.0 }
 0x1c7   :  { %v934_v17 = vsel %vm920_vm1, %v796_v55, %v576_v32  ;;  %v682_v59 = vpop.permute.xlu1 %681 }
 0x1c8   :  { %v1732_v43 = vpop.f32.mrb[16].mxu1 }
 0x1c9   :  { %v1734_v61 = vpop.f32.mrb[17].mxu1 }
 0x1ca   :  { %v1736_v34 = vpop.f32.mrb[18].mxu1  ;;  %v472_v58 = vpop.permute.xlu0 %471 }
 0x1cb   :  { %v1738_v54 = vpop.f32.mrb[19].mxu1 }
 0x1cd   :  { %1611 = vmatmul.mubr.bf16.gmra.mrb[20].mxu0 %v8615_v3  ;;  %2001 = vmatmul.mubr.bf16.gmra.mrb[124].mxu1 %v8410_v44  ;;  %v2683_v44 = vmax.f32 %v1725_v25, 0.0  ;;  %v1733_v25 = vadd.f32 %v1732_v43, %v8530_v33 }
 0x1ce   :  { %5931 = vmatprep.mubr.msk.bf16.mxu0 %vm775_vm0, %v8624_v15  ;;  %5970 = vmatprep.mubr.msk.bf16.mxu1 %vm775_vm0, %v7996_v30  ;;  %v8638_v30 = vsel %vm1017_vm2, %v934_v17, %v682_v59 }
 0x1d0   :  { %v1742_v38 = vpop.f32.mrb[20].mxu1 }
 0x1d1   :  { %v1743_v13 = vadd.f32 %v1742_v38, %v8530_v33  ;;  %v1744_v24 = vpop.f32.mrb[21].mxu1  ;;  %v578_v38 = vpop.permute.xlu1 %577 }
 0x1d2   :  { %v1745_v40 = vadd.f32 %v1744_v24, %v8536_v62  ;;  %v1746_v50 = vpop.f32.mrb[22].mxu1  ;;  %v799_v24 = vsel %vm775_vm0, %v8065_v63, %v472_v58  ;;  %v684_v58 = vpop.permute.xlu0 %683 }
 0x1d3   :  { %v2698_v32 = vmax.f32 %v1743_v13, 0.0  ;;  %v1747_v48 = vadd.f32 %v1746_v50, %v8530_v33  ;;  %v1748_v55 = vpop.f32.mrb[23].mxu1  ;;  %v936_v29 = vsel %vm920_vm1, %v799_v24, %v578_v38  ;;  %v2690_v38 = vmax.f32 %v1733_v25, 0.0 }
 0x1d4   :  { %v2699_v8 = vmax.f32 %v1745_v40, 0.0  ;;  %v1749_v49 = vadd.f32 %v1748_v55, %v8536_v62  ;;  %v1735_v40 = vadd.f32 %v1734_v61, %v8536_v62  ;;  %v8668_v55 = vsel %vm1017_vm2, %v936_v29, %v684_v58  ;;  %v6775_v61 = vld [vmem:[%s10119_s0 + $0x1b8] sm:$0xff]  }
 0x1d5   :  { %v8647_v17 = vmax.f32 %v2682_v46, %v2698_v32  ;;  %v2702_v59 = vmax.f32 %v1747_v48, 0.0  ;;  %1621 = vmatmul.mubr.bf16.gmra.mrb[24].mxu0 %v8638_v30  ;;  %2011 = vmatmul.mubr.bf16.gmra.mrb[128].mxu1 %v8426_v27  ;;  %v474_v48 = vpop.permute.xlu1 %473 }
 0x1d6   :  { %v8651_v13 = vmax.f32 %v2683_v44, %v2699_v8  ;;  %v2703_v50 = vmax.f32 %v1749_v49, 0.0  ;;  %5932 = vmatprep.mubr.msk.bf16.mxu0 %vm775_vm0, %v8292_v10  ;;  %5971 = vmatprep.mubr.msk.bf16.mxu1 %vm775_vm0, %v6774_v12  ;;  %v1737_v44 = vadd.f32 %v1736_v34, %v8530_v33  ;;  %v1739_v12 = vadd.f32 %v1738_v54, %v8536_v62 }
 0x1d7   :  { %10196 = vst [vmem:[#allocation46_spill] sm:$0xff] %v8647_v17  ;;  %v8657_v63 = vmax.f32 %v2686_v47, %v2702_v59  ;;  %v580_v59 = vpop.permute.xlu0 %579 }
 0x1d8   :  { %10197 = vst [vmem:[#allocation47_spill] sm:$0xff] %v8651_v13  ;;  %v8661_v46 = vmax.f32 %v2687_v35, %v2703_v50  ;;  %v1752_v37 = vpop.f32.mrb[24].mxu1  ;;  %v2691_v35 = vmax.f32 %v1735_v40, 0.0  ;;  %v2694_v58 = vmax.f32 %v1737_v44, 0.0  ;;  %v2695_v25 = vmax.f32 %v1739_v12, 0.0 }
 0x1d9   :  { %10198 = vst [vmem:[#allocation48_spill] sm:$0xff] %v8657_v63  ;;  %v1753_v8 = vadd.f32 %v1752_v37, %v8530_v33  ;;  %v1754_v32 = vpop.f32.mrb[25].mxu1  ;;  %v7082_v37 = vld [vmem:[%s10119_s0 + $0x40] sm:$0xff]  }
 0x1da   :  { %10199 = vst [vmem:[#allocation49_spill] sm:$0xff] %v8661_v46  ;;  %v1755_v43 = vadd.f32 %v1754_v32, %v8536_v62  ;;  %v1756_v47 = vpop.f32.mrb[26].mxu1  ;;  %v802_v29 = vsel %vm775_vm0, %v7082_v37, %v474_v48 }
 0x1db   :  { %v2706_v49 = vmax.f32 %v1753_v8, 0.0  ;;  %v1757_v34 = vadd.f32 %v1756_v47, %v8530_v33  ;;  %v1758_v24 = vpop.f32.mrb[27].mxu1  ;;  %v938_v48 = vsel %vm920_vm1, %v802_v29, %v580_v59  ;;  %v686_v47 = vpop.permute.xlu1 %685 }
 0x1dc   :  { %v2707_v50 = vmax.f32 %v1755_v43, 0.0  ;;  %v1759_v54 = vadd.f32 %v1758_v24, %v8536_v62  ;;  %v8688_v43 = vld [vmem:[%s10119_s0 + $0x80] sm:$0xff]  }
 0x1dd   :  { %v8679_v32 = vmax.f32 %v2690_v38, %v2706_v49  ;;  %v2710_v46 = vmax.f32 %v1757_v34, 0.0  ;;  %1631 = vmatmul.mubr.bf16.gmra.mrb[28].mxu0 %v8668_v55  ;;  %2021 = vmatmul.mubr.bf16.gmra.mrb[132].mxu1 %v8444_v14  ;;  %v476_v34 = vpop.permute.xlu0 %475 }
 0x1de   :  { %v8683_v8 = vmax.f32 %v2691_v35, %v2707_v50  ;;  %v2711_v40 = vmax.f32 %v1759_v54, 0.0  ;;  %5933 = vmatprep.mubr.msk.bf16.mxu0 %vm775_vm0, %v8688_v43  ;;  %5972 = vmatprep.mubr.msk.bf16.mxu1 %vm775_vm0, %v6775_v61  ;;  %v8699_v35 = vsel %vm1017_vm2, %v938_v48, %v686_v47 }
 0x1df   :  { %10200 = vst [vmem:[#allocation50_spill] sm:$0xff] %v8679_v32  ;;  %v8693_v44 = vmax.f32 %v2694_v58, %v2710_v46  ;;  %v582_v54 = vpop.permute.xlu1 %581  ;;  %v8708_v46 = vld [vmem:[%s10119_s0 + $0x88] sm:$0xff]  }
 0x1e0   :  { %10201 = vst [vmem:[#allocation51_spill] sm:$0xff] %v8683_v8  ;;  %v8696_v38 = vmax.f32 %v2695_v25, %v2711_v40  ;;  %v1762_v12 = vpop.f32.mrb[28].mxu1  ;;  %v805_v8 = vsel %vm775_vm0, %v8118_v1, %v476_v34 }
 0x1e1   :  { %10202 = vst [vmem:[#allocation52_spill] sm:$0xff] %v8693_v44  ;;  %v1764_v49 = vpop.f32.mrb[29].mxu1  ;;  %v940_v61 = vsel %vm920_vm1, %v805_v8, %v582_v54  ;;  %v688_v59 = vpop.permute.xlu0 %687  ;;  %v1763_v8 = vadd.f32 %v1762_v12, %v8530_v33 }
 0x1e2   :  { %10203 = vst [vmem:[#allocation53_spill] sm:$0xff] %v8696_v38  ;;  %v1766_v24 = vpop.f32.mrb[30].mxu1  ;;  %v8715_v48 = vsel %vm1017_vm2, %v940_v61, %v688_v59  ;;  %v1765_v59 = vadd.f32 %v1764_v49, %v8536_v62 }
 0x1e3   :  { %v1768_v50 = vpop.f32.mrb[31].mxu1  ;;  %v478_v25 = vpop.permute.xlu1 %477  ;;  %v2714_v12 = vmax.f32 %v1763_v8, 0.0 }
 0x1e4   :  { %v1769_v14 = vadd.f32 %v1768_v50, %v8536_v62  ;;  %v2715_v27 = vmax.f32 %v1765_v59, 0.0 }
 0x1e5   :  { %1641 = vmatmul.mubr.bf16.gmra.mrb[32].mxu0 %v8699_v35  ;;  %2031 = vmatmul.mubr.bf16.gmra.mrb[136].mxu1 %v8465_v60  ;;  %v584_v34 = vpop.permute.xlu0 %583  ;;  %v808_v60 = vsel %vm775_vm0, %v8140_v20, %v478_v25 }
 0x1e6   :  { %5934 = vmatprep.mubr.msk.bf16.mxu0 %vm775_vm0, %v8708_v46  ;;  %5973 = vmatprep.mubr.msk.bf16.mxu1 %vm775_vm0, %v7082_v37  ;;  %v8724_v37 = vld [vmem:[%s10119_s0 + $0x90] sm:$0xff]   ;;  %v942_v54 = vsel %vm920_vm1, %v808_v60, %v584_v34 }
 0x1e7   :  { %v690_v61 = vpop.permute.xlu1 %689 }
 0x1e8   :  { %v1772_v29 = vpop.f32.mrb[32].mxu1 }
 0x1e9   :  { %v1774_v58 = vpop.f32.mrb[33].mxu1  ;;  %v480_v32 = vpop.permute.xlu0 %479 }
 0x1ea   :  { %v1776_v40 = vpop.f32.mrb[34].mxu1  ;;  %v811_v52 = vsel %vm775_vm0, %v8172_v42, %v480_v32  ;;  %v1773_v32 = vadd.f32 %v1772_v29, %v8530_v33 }
 0x1eb   :  { %v1778_v47 = vpop.f32.mrb[35].mxu1  ;;  %v586_v17 = vpop.permute.xlu1 %585 }
 0x1ed   :  { %1651 = vmatmul.mubr.bf16.gmra.mrb[36].mxu0 %v8715_v48  ;;  %2074 = vmatmul.mubr.bf16.vlgmr.msra.gmra.mrb[140].mxu1 %v8475_v0  ;;  %v1767_v0 = vadd.f32 %v1766_v24, %v8530_v33 }
 0x1ee   :  { %5935 = vmatprep.mubr.msk.bf16.mxu0 %vm775_vm0, %v8724_v37  ;;  %5974 = vmatprep.mubr.msk.bf16.mxu1 %vm775_vm0, %v8118_v1  ;;  %v8738_v1 = vsel %vm1017_vm2, %v942_v54, %v690_v61 }
 0x1ef   :  { %v2718_v50 = vmax.f32 %v1767_v0, 0.0  ;;  %v1777_v0 = vadd.f32 %v1776_v40, %v8530_v33 }
 0x1f0   :  { %v1782_v25 = vpop.f32.mrb[36].mxu1 }
 0x1f1   :  { %v1783_v38 = vadd.f32 %v1782_v25, %v8530_v33  ;;  %v1784_v44 = vpop.f32.mrb[37].mxu1 }
 0x1f2   :  { %v1785_v63 = vadd.f32 %v1784_v44, %v8536_v62  ;;  %v1786_v13 = vpop.f32.mrb[38].mxu1 }
 0x1f3   :  { %v2730_v60 = vmax.f32 %v1783_v38, 0.0  ;;  %v1787_v34 = vadd.f32 %v1786_v13, %v8530_v33  ;;  %v1788_v49 = vpop.f32.mrb[39].mxu1  ;;  %v2719_v38 = vmax.f32 %v1769_v14, 0.0  ;;  %v944_v14 = vsel %vm920_vm1, %v811_v52, %v586_v17 }
 0x1f4   :  { %v2731_v24 = vmax.f32 %v1785_v63, 0.0  ;;  %v1789_v25 = vadd.f32 %v1788_v49, %v8536_v62  ;;  %v8753_v63 = vld [vmem:[%s10119_s0 + $0x98] sm:$0xff]   ;;  %v2722_v52 = vmax.f32 %v1773_v32, 0.0 }
 0x1f5   :  { %v8744_v9 = vmax.f32 %v2714_v12, %v2730_v60  ;;  %v2734_v44 = vmax.f32 %v1787_v34, 0.0  ;;  %1661 = vmatmul.mubr.bf16.gmra.mrb[40].mxu0 %v8738_v1  ;;  %2084 = vmatmul.mubr.bf16.gmra.mrb[144].mxu1 %v8497_v53  ;;  %v1775_v53 = vadd.f32 %v1774_v58, %v8536_v62  ;;  %v482_v34 = vpop.permute.xlu1 %481 }
 0x1f6   :  { %v8748_v8 = vmax.f32 %v2715_v27, %v2731_v24  ;;  %v2735_v13 = vmax.f32 %v1789_v25, 0.0  ;;  %5936 = vmatprep.mubr.msk.bf16.mxu0 %vm775_vm0, %v8753_v63  ;;  %5975 = vmatprep.mubr.msk.bf16.mxu1 %vm775_vm0, %v8140_v20  ;;  %v692_v27 = vpop.permute.xlu0 %691  ;;  %v1779_v20 = vadd.f32 %v1778_v47, %v8536_v62  ;;  %v2726_v47 = vmax.f32 %v1777_v0, 0.0 }
 0x1f7   :  { %10204 = vst [vmem:[#allocation54_spill] sm:$0xff] %v8744_v9  ;;  %v8760_v54 = vmax.f32 %v2718_v50, %v2734_v44  ;;  %v8771_v24 = vsel %vm1017_vm2, %v944_v14, %v692_v27  ;;  %v2723_v50 = vmax.f32 %v1775_v53, 0.0  ;;  %v8786_v53 = vld [vmem:[%s10119_s0 + $0xa0] sm:$0xff]  }
 0x1f8   :  { %10205 = vst [vmem:[#allocation55_spill] sm:$0xff] %v8748_v8  ;;  %v8764_v61 = vmax.f32 %v2719_v38, %v2735_v13  ;;  %v1792_v59 = vpop.f32.mrb[40].mxu1  ;;  %v814_v38 = vsel %vm775_vm0, %v8197_v2, %v482_v34  ;;  %v2727_v32 = vmax.f32 %v1779_v20, 0.0 }
 0x1f9   :  { %10206 = vst [vmem:[#allocation56_spill] sm:$0xff] %v8760_v54  ;;  %v1793_v12 = vadd.f32 %v1792_v59, %v8530_v33  ;;  %v1794_v60 = vpop.f32.mrb[41].mxu1 }
 0x1fa   :  { %10207 = vst [vmem:[#allocation57_spill] sm:$0xff] %v8764_v61  ;;  %v1795_v29 = vadd.f32 %v1794_v60, %v8536_v62  ;;  %v1796_v49 = vpop.f32.mrb[42].mxu1  ;;  %v588_v13 = vpop.permute.xlu0 %587  ;;  %v10270_v61 = vld [vmem:[#allocation23_spill] sm:$0xff] }
 0x1fb   :  { %v2738_v17 = vmax.f32 %v1793_v12, 0.0  ;;  %v1797_v58 = vadd.f32 %v1796_v49, %v8530_v33  ;;  %v1798_v25 = vpop.f32.mrb[43].mxu1  ;;  %v946_v12 = vsel %vm920_vm1, %v814_v38, %v588_v13 }
 0x1fc   :  { %v2739_v44 = vmax.f32 %v1795_v29, 0.0  ;;  %v1799_v40 = vadd.f32 %v1798_v25, %v8536_v62 }
 0x1fd   :  { %v8777_v59 = vmax.f32 %v2722_v52, %v2738_v17  ;;  %v2742_v60 = vmax.f32 %v1797_v58, 0.0  ;;  %1671 = vmatmul.mubr.bf16.gmra.mrb[44].mxu0 %v8771_v24  ;;  %2094 = vmatmul.mubr.bf16.gmra.mrb[148].mxu1 %v8526_v36  ;;  %v694_v36 = vpop.permute.xlu1 %693 }
 0x1fe   :  { %v8781_v14 = vmax.f32 %v2723_v50, %v2739_v44  ;;  %v2743_v27 = vmax.f32 %v1799_v40, 0.0  ;;  %5937 = vmatprep.mubr.msk.bf16.mxu0 %vm775_vm0, %v8786_v53  ;;  %5976 = vmatprep.mubr.msk.bf16.mxu1 %vm775_vm0, %v8172_v42  ;;  %v8798_v52 = vsel %vm1017_vm2, %v946_v12, %v694_v36 }
 0x1ff   :  { %10208 = vst [vmem:[#allocation58_spill] sm:$0xff] %v8777_v59  ;;  %v8792_v0 = vmax.f32 %v2726_v47, %v2742_v60 }
 0x200   :  { %10209 = vst [vmem:[#allocation59_spill] sm:$0xff] %v8781_v14  ;;  %v8795_v34 = vmax.f32 %v2727_v32, %v2743_v27  ;;  %v1802_v20 = vpop.f32.mrb[44].mxu1 }
 0x201   :  { %10210 = vst [vmem:[#allocation60_spill] sm:$0xff] %v8792_v0  ;;  %v1804_v29 = vpop.f32.mrb[45].mxu1  ;;  %v1803_v44 = vadd.f32 %v1802_v20, %v8530_v33 }
 0x202   :  { %10211 = vst [vmem:[#allocation61_spill] sm:$0xff] %v8795_v34  ;;  %v1806_v49 = vpop.f32.mrb[46].mxu1  ;;  %v1805_v40 = vadd.f32 %v1804_v29, %v8536_v62 }
 0x203   :  { %v1808_v17 = vpop.f32.mrb[47].mxu1  ;;  %v1807_v13 = vadd.f32 %v1806_v49, %v8530_v33  ;;  %v2746_v27 = vmax.f32 %v1803_v44, 0.0 }
 0x204   :  { %v2747_v36 = vmax.f32 %v1805_v40, 0.0 }
 0x205   :  { %1681 = vmatmul.mubr.bf16.gmra.mrb[48].mxu0 %v8798_v52  ;;  %2104 = vmatmul.mubr.bf16.gmra.mrb[152].mxu1 %v8563_v4  ;;  %v2750_v34 = vmax.f32 %v1807_v13, 0.0 }
 0x206   :  { %5977 = vmatprep.mubr.msk.bf16.mxu1 %vm775_vm0, %v8197_v2  ;;  %v1809_v2 = vadd.f32 %v1808_v17, %v8536_v62 }
 0x208   :  { %v1812_v42 = vpop.f32.mrb[48].mxu1 }
 0x209   :  { %v1814_v58 = vpop.f32.mrb[49].mxu1  ;;  %v1813_v44 = vadd.f32 %v1812_v42, %v8530_v33 }
 0x20a   :  { %v1816_v25 = vpop.f32.mrb[50].mxu1  ;;  %v1815_v40 = vadd.f32 %v1814_v58, %v8536_v62 }
 0x20b   :  { %v1818_v50 = vpop.f32.mrb[51].mxu1 }
 0x20d   :  { %2114 = vmatmul.mubr.bf16.gmra.mrb[156].mxu1 %v8594_v56 }
 0x20e   :  { %5978 = vmatprep.mubr.msk.bf16.mxu1 %vm775_vm0, %v8607_v41 }
 0x210   :  { %v1822_v38 = vpop.f32.mrb[52].mxu1 }
 0x211   :  { %v1823_v4 = vadd.f32 %v1822_v38, %v8530_v33  ;;  %v1824_v47 = vpop.f32.mrb[53].mxu1  ;;  %v2751_v38 = vmax.f32 %v1809_v2, 0.0 }
 0x212   :  { %v1825_v60 = vadd.f32 %v1824_v47, %v8536_v62  ;;  %v1826_v32 = vpop.f32.mrb[54].mxu1 }
 0x213   :  { %v2762_v56 = vmax.f32 %v1823_v4, 0.0  ;;  %v1827_v12 = vadd.f32 %v1826_v32, %v8530_v33  ;;  %v1828_v41 = vpop.f32.mrb[55].mxu1  ;;  %v1817_v32 = vadd.f32 %v1816_v25, %v8530_v33 }
 0x214   :  { %v2763_v20 = vmax.f32 %v1825_v60, 0.0  ;;  %v1829_v29 = vadd.f32 %v1828_v41, %v8536_v62 }
 0x215   :  { %v8815_v0 = vmax.f32 %v2746_v27, %v2762_v56  ;;  %v2766_v49 = vmax.f32 %v1827_v12, 0.0  ;;  %2124 = vmatmul.mubr.bf16.gmra.mrb[160].mxu1 %v8615_v3  ;;  %v1819_v27 = vadd.f32 %v1818_v50, %v8536_v62 }
 0x216   :  { %v8818_v17 = vmax.f32 %v2747_v36, %v2763_v20  ;;  %v2767_v47 = vmax.f32 %v1829_v29, 0.0  ;;  %5979 = vmatprep.mubr.msk.bf16.mxu1 %vm775_vm0, %v8624_v15  ;;  %v2754_v15 = vmax.f32 %v1813_v44, 0.0  ;;  %v2755_v36 = vmax.f32 %v1815_v40, 0.0  ;;  %v6776_v44 = vld [vmem:[#allocation4] ss:$8 sps:$4 sm:$0xff]  }
 0x217   :  { %10212 = vst [vmem:[#allocation62_spill] sm:$0xff] %v8815_v0  ;;  %v8823_v4 = vmax.f32 %v2750_v34, %v2766_v49  ;;  %v2758_v29 = vmax.f32 %v1817_v32, 0.0  ;;  %v2759_v50 = vmax.f32 %v1819_v27, 0.0  ;;  %v6784_v27 = vld [vmem:[#allocation4 + $0x24] ss:$8 sps:$4 sm:$0xff]   ;;  %v10260_v0 = vld [vmem:[#allocation20_spill] sm:$0xff] }
 0x218   :  { %10213 = vst [vmem:[#allocation63_spill] sm:$0xff] %v8818_v17  ;;  %v8826_v60 = vmax.f32 %v2751_v38, %v2767_v47  ;;  %v1832_v13 = vpop.f32.mrb[56].mxu1  ;;  %v6778_v38 = vld [vmem:[#allocation4 + $0x4] ss:$8 sps:$4 sm:$0xff]  }
 0x219   :  { %10214 = vst [vmem:[#allocation64_spill] sm:$0xff] %v8823_v4  ;;  %v1833_v3 = vadd.f32 %v1832_v13, %v8530_v33  ;;  %v1834_v2 = vpop.f32.mrb[57].mxu1  ;;  %4246 = vmatprep.subr.bf16.mxu0 %v6778_v38 }
 0x21a   :  { %10215 = vst [vmem:[#allocation65_spill] sm:$0xff] %v8826_v60  ;;  %v1835_v56 = vadd.f32 %v1834_v2, %v8536_v62  ;;  %v1836_v12 = vpop.f32.mrb[58].mxu1  ;;  %4247 = vmatpush1.bf16.msra.mxu0 %v6776_v44 }
 0x21b   :  { %v2770_v41 = vmax.f32 %v1833_v3, 0.0  ;;  %v1837_v34 = vadd.f32 %v1836_v12, %v8530_v33  ;;  %v1838_v42 = vpop.f32.mrb[59].mxu1 }
 0x21c   :  { %v2771_v58 = vmax.f32 %v1835_v56, 0.0  ;;  %v1839_v20 = vadd.f32 %v1838_v42, %v8536_v62  ;;  %v6781_v56 = vld [vmem:[#allocation4 + $0x14] ss:$8 sps:$4 sm:$0xff]  }
 0x21d   :  { %v8834_v49 = vmax.f32 %v2754_v15, %v2770_v41  ;;  %v2774_v25 = vmax.f32 %v1837_v34, 0.0  ;;  %2134 = vmatmul.mubr.bf16.gmra.mrb[164].mxu1 %v8638_v30  ;;  %v6779_v30 = vld [vmem:[#allocation4 + $0x10] ss:$8 sps:$4 sm:$0xff]   ;;  %4248 = vmatprep.subr.bf16.mxu0 %v6781_v56  ;;  %v6787_v42 = vld [vmem:[#allocation4 + $0x34] ss:$8 sps:$4 sm:$0xff]  }
 0x21e   :  { %v8837_v47 = vmax.f32 %v2755_v36, %v2771_v58  ;;  %v2775_v13 = vmax.f32 %v1839_v20, 0.0  ;;  %5980 = vmatprep.mubr.msk.bf16.mxu1 %vm775_vm0, %v8292_v10  ;;  %4249 = vmatpush1.bf16.msra.mxu0 %v6779_v30  ;;  %v6782_v10 = vld [vmem:[#allocation4 + $0x20] ss:$8 sps:$4 sm:$0xff]   ;;  %v6785_v58 = vld [vmem:[#allocation4 + $0x30] ss:$8 sps:$4 sm:$0xff]  }
 0x21f   :  { %10216 = vst [vmem:[#allocation66_spill] sm:$0xff] %v8834_v49  ;;  %v8841_v3 = vmax.f32 %v2758_v29, %v2774_v25  ;;  %4250 = vmatprep.subr.bf16.mxu0 %v6784_v27  ;;  %v6790_v29 = vld [vmem:[#allocation4 + $0x44] ss:$8 sps:$4 sm:$0xff]   ;;  %v6793_v56 = vld [vmem:[#allocation4 + $0x54] ss:$8 sps:$4 sm:$0xff]  }
 0x220   :  { %10217 = vst [vmem:[#allocation67_spill] sm:$0xff] %v8837_v47  ;;  %v8843_v40 = vmax.f32 %v2759_v50, %v2775_v13  ;;  %v1842_v32 = vpop.f32.mrb[60].mxu1 }
 0x221   :  { %10218 = vst [vmem:[#allocation68_spill] sm:$0xff] %v8841_v3  ;;  %v1844_v2 = vpop.f32.mrb[61].mxu1 }
 0x222   :  { %10219 = vst [vmem:[#allocation69_spill] sm:$0xff] %v8843_v40  ;;  %v1846_v12 = vpop.f32.mrb[62].mxu1  ;;  %4251 = vmatpush1.bf16.msra.mxu0 %v6782_v10  ;;  %v1845_v25 = vadd.f32 %v1844_v2, %v8536_v62 }
 0x223   :  { %v1848_v15 = vpop.f32.mrb[63].mxu1  ;;  %4252 = vmatprep.subr.bf16.mxu0 %v6787_v42  ;;  %v1847_v50 = vadd.f32 %v1846_v12, %v8530_v33 }
 0x224   :  { %v2779_v2 = vmax.f32 %v1845_v25, 0.0 }
 0x225   :  { %2144 = vmatmul.mubr.bf16.gmra.mrb[168].mxu1 %v8668_v55  ;;  %v6788_v55 = vld [vmem:[#allocation4 + $0x40] ss:$8 sps:$4 sm:$0xff]  }
 0x226   :  { %5981 = vmatprep.mubr.msk.bf16.mxu1 %vm775_vm0, %v8688_v43  ;;  %4253 = vmatpush1.bf16.msra.mxu0 %v6785_v58  ;;  %v1843_v43 = vadd.f32 %v1842_v32, %v8530_v33 }
 0x227   :  { %4254 = vmatprep.subr.bf16.mxu0 %v6790_v29 }
 0x228   :  { %v1852_v41 = vpop.f32.mrb[64].mxu1  ;;  %v2778_v10 = vmax.f32 %v1843_v43, 0.0 }
 0x229   :  { %v1854_v34 = vpop.f32.mrb[65].mxu1  ;;  %v1853_v25 = vadd.f32 %v1852_v41, %v8530_v33 }
 0x22a   :  { %v1856_v36 = vpop.f32.mrb[66].mxu1  ;;  %4255 = vmatpush1.bf16.msra.mxu0 %v6788_v55  ;;  %v2782_v55 = vmax.f32 %v1847_v50, 0.0  ;;  %v1855_v50 = vadd.f32 %v1854_v34, %v8536_v62 }
 0x22b   :  { %v1858_v20 = vpop.f32.mrb[67].mxu1  ;;  %4256 = vmatprep.subr.bf16.mxu0 %v6793_v56 }
 0x22d   :  { %2154 = vmatmul.mubr.bf16.gmra.mrb[172].mxu1 %v8699_v35  ;;  %v1849_v35 = vadd.f32 %v1848_v15, %v8536_v62  ;;  %v6796_v15 = vld [vmem:[#allocation4 + $0x64] ss:$8 sps:$4 sm:$0xff]  }
 0x22e   :  { %5982 = vmatprep.mubr.msk.bf16.mxu1 %vm775_vm0, %v8708_v46  ;;  %v6791_v46 = vld [vmem:[#allocation4 + $0x50] ss:$8 sps:$4 sm:$0xff]  }
 0x22f   :  { %4257 = vmatpush1.bf16.msra.mxu0 %v6791_v46 }
 0x230   :  { %v1862_v38 = vpop.f32.mrb[68].mxu1  ;;  %4258 = vmatprep.subr.bf16.mxu0 %v6796_v15 }
 0x231   :  { %v1863_v13 = vadd.f32 %v1862_v38, %v8530_v33  ;;  %v1864_v44 = vpop.f32.mrb[69].mxu1 }
 0x232   :  { %v1865_v30 = vadd.f32 %v1864_v44, %v8536_v62  ;;  %v1866_v27 = vpop.f32.mrb[70].mxu1  ;;  %v2783_v44 = vmax.f32 %v1849_v35, 0.0 }
 0x233   :  { %v2794_v42 = vmax.f32 %v1863_v13, 0.0  ;;  %v1867_v32 = vadd.f32 %v1866_v27, %v8530_v33  ;;  %v1868_v58 = vpop.f32.mrb[71].mxu1  ;;  %v6794_v13 = vld [vmem:[#allocation4 + $0x60] ss:$8 sps:$4 sm:$0xff]  }
 0x234   :  { %v2795_v29 = vmax.f32 %v1865_v30, 0.0  ;;  %v1869_v12 = vadd.f32 %v1868_v58, %v8536_v62  ;;  %4259 = vmatpush1.bf16.msra.mxu0 %v6794_v13 }
 0x235   :  { %v8859_v38 = vmax.f32 %v2778_v10, %v2794_v42  ;;  %v2798_v40 = vmax.f32 %v1867_v32, 0.0  ;;  %2164 = vmatmul.mubr.bf16.gmra.mrb[176].mxu1 %v8715_v48  ;;  %v1857_v48 = vadd.f32 %v1856_v36, %v8530_v33  ;;  %v6799_v10 = vld [vmem:[#allocation4 + $0x74] ss:$8 sps:$4 sm:$0xff]   ;;  %v2786_v32 = vmax.f32 %v1853_v25, 0.0 }
 0x236   :  { %v8862_v3 = vmax.f32 %v2779_v2, %v2795_v29  ;;  %v2799_v43 = vmax.f32 %v1869_v12, 0.0  ;;  %5983 = vmatprep.mubr.msk.bf16.mxu1 %vm775_vm0, %v8724_v37  ;;  %v1859_v37 = vadd.f32 %v1858_v20, %v8536_v62  ;;  %4260 = vmatprep.subr.bf16.mxu0 %v6799_v10  ;;  %v2787_v29 = vmax.f32 %v1855_v50, 0.0  ;;  %v6802_v20 = vld [vmem:[#allocation4 + $0x84] ss:$8 sps:$4 sm:$0xff]   ;;  %v6805_v10 = vld [vmem:[#allocation4 + $0x94] ss:$8 sps:$4 sm:$0xff]  }
 0x237   :  { %10220 = vst [vmem:[#allocation70_spill] sm:$0xff] %v8859_v38  ;;  %v8867_v56 = vmax.f32 %v2782_v55, %v2798_v40  ;;  %v6797_v40 = vld [vmem:[#allocation4 + $0x70] ss:$8 sps:$4 sm:$0xff]   ;;  %v2790_v55 = vmax.f32 %v1857_v48, 0.0 }
 0x238   :  { %10221 = vst [vmem:[#allocation71_spill] sm:$0xff] %v8862_v3  ;;  %v8870_v30 = vmax.f32 %v2783_v44, %v2799_v43  ;;  %v1872_v27 = vpop.f32.mrb[72].mxu1  ;;  %4261 = vmatpush1.bf16.msra.mxu0 %v6797_v40  ;;  %v2791_v43 = vmax.f32 %v1859_v37, 0.0  ;;  %v6808_v37 = vld [vmem:[#allocation4 + $0xa4] ss:$8 sps:$4 sm:$0xff]  }
 0x239   :  { %10222 = vst [vmem:[#allocation72_spill] sm:$0xff] %v8867_v56  ;;  %v1873_v35 = vadd.f32 %v1872_v27, %v8530_v33  ;;  %v1874_v46 = vpop.f32.mrb[73].mxu1  ;;  %v6800_v27 = vld [vmem:[#allocation4 + $0x80] ss:$8 sps:$4 sm:$0xff]   ;;  %4262 = vmatprep.subr.bf16.mxu0 %v6802_v20 }
 0x23a   :  { %10223 = vst [vmem:[#allocation73_spill] sm:$0xff] %v8870_v30  ;;  %v1875_v42 = vadd.f32 %v1874_v46, %v8536_v62  ;;  %v1876_v41 = vpop.f32.mrb[74].mxu1  ;;  %v10248_v56 = vld [vmem:[#allocation16_spill] sm:$0xff] }
 0x23b   :  { %v2802_v58 = vmax.f32 %v1873_v35, 0.0  ;;  %v1877_v34 = vadd.f32 %v1876_v41, %v8530_v33  ;;  %v1878_v2 = vpop.f32.mrb[75].mxu1 }
 0x23c   :  { %v2803_v12 = vmax.f32 %v1875_v42, 0.0  ;;  %v1879_v36 = vadd.f32 %v1878_v2, %v8536_v62  ;;  %4263 = vmatpush1.bf16.msra.mxu0 %v6800_v27  ;;  %v6809_v2 = vld [vmem:[#allocation4 + $0xb0] ss:$8 sps:$4 sm:$0xff]  }
 0x23d   :  { %v8878_v15 = vmax.f32 %v2786_v32, %v2802_v58  ;;  %v2806_v44 = vmax.f32 %v1877_v34, 0.0  ;;  %2174 = vmatmul.mubr.bf16.gmra.mrb[180].mxu1 %v8738_v1  ;;  %v6803_v1 = vld [vmem:[#allocation4 + $0x90] ss:$8 sps:$4 sm:$0xff]   ;;  %4264 = vmatprep.subr.bf16.mxu0 %v6805_v10  ;;  %v6811_v58 = vld [vmem:[#allocation4 + $0xb4] ss:$8 sps:$4 sm:$0xff]  }
 0x23e   :  { %v8881_v13 = vmax.f32 %v2787_v29, %v2803_v12  ;;  %v2807_v25 = vmax.f32 %v1879_v36, 0.0  ;;  %5984 = vmatprep.mubr.msk.bf16.mxu1 %vm775_vm0, %v8753_v63  ;;  %v6806_v63 = vld [vmem:[#allocation4 + $0xa0] ss:$8 sps:$4 sm:$0xff]   ;;  %v6814_v12 = vld [vmem:[#allocation4 + $0xc4] ss:$8 sps:$4 sm:$0xff]  }
 0x23f   :  { %10224 = vst [vmem:[#allocation74_spill] sm:$0xff] %v8878_v15  ;;  %v8885_v50 = vmax.f32 %v2790_v55, %v2806_v44 }
 0x240   :  { %10225 = vst [vmem:[#allocation75_spill] sm:$0xff] %v8881_v13  ;;  %v8887_v35 = vmax.f32 %v2791_v43, %v2807_v25  ;;  %v1882_v48 = vpop.f32.mrb[76].mxu1  ;;  %4265 = vmatpush1.bf16.msra.mxu0 %v6803_v1  ;;  %v6817_v25 = vld [vmem:[#allocation4 + $0xd4] ss:$8 sps:$4 sm:$0xff]  }
 0x241   :  { %10226 = vst [vmem:[#allocation76_spill] sm:$0xff] %v8885_v50  ;;  %v1884_v46 = vpop.f32.mrb[77].mxu1  ;;  %4266 = vmatprep.subr.bf16.mxu0 %v6808_v37  ;;  %v1883_v36 = vadd.f32 %v1882_v48, %v8530_v33  ;;  %v6815_v37 = vld [vmem:[#allocation4 + $0xd0] ss:$8 sps:$4 sm:$0xff]  }
 0x242   :  { %10227 = vst [vmem:[#allocation77_spill] sm:$0xff] %v8887_v35  ;;  %v1886_v42 = vpop.f32.mrb[78].mxu1  ;;  %v1885_v55 = vadd.f32 %v1884_v46, %v8536_v62 }
 0x243   :  { %v1888_v41 = vpop.f32.mrb[79].mxu1  ;;  %v1887_v20 = vadd.f32 %v1886_v42, %v8530_v33 }
 0x244   :  { %4267 = vmatpush1.bf16.msra.mxu0 %v6806_v63  ;;  %v1889_v27 = vadd.f32 %v1888_v41, %v8536_v62  ;;  %v2810_v63 = vmax.f32 %v1883_v36, 0.0  ;;  %v2811_v46 = vmax.f32 %v1885_v55, 0.0  ;;  %v6820_v41 = vld [vmem:[#allocation4 + $0xe4] ss:$8 sps:$4 sm:$0xff]   ;;  %v6818_v55 = vld [vmem:[#allocation4 + $0xe0] ss:$8 sps:$4 sm:$0xff]  }
 0x245   :  { %2184 = vmatmul.mubr.bf16.gmra.mrb[184].mxu1 %v8771_v24  ;;  %4268 = vmatprep.subr.bf16.mxu0 %v6811_v58  ;;  %v7088_v24 = vld [vmem:[%s10119_s0 + $0xa8] sm:$0xff]  }
 0x246   :  { %5985 = vmatprep.mubr.msk.bf16.mxu1 %vm775_vm0, %v8786_v53  ;;  %v6812_v53 = vld [vmem:[#allocation4 + $0xc0] ss:$8 sps:$4 sm:$0xff]  }
 0x248   :  { %v1892_v40 = vpop.f32.mrb[80].mxu1  ;;  %4269 = vmatpush1.bf16.msra.mxu0 %v6809_v2 }
 0x249   :  { %v1894_v32 = vpop.f32.mrb[81].mxu1  ;;  %4270 = vmatprep.subr.bf16.mxu0 %v6814_v12 }
 0x24a   :  { %v1896_v34 = vpop.f32.mrb[82].mxu1 }
 0x24b   :  { %v1898_v29 = vpop.f32.mrb[83].mxu1 }
 0x24c   :  { %4271 = vmatpush1.bf16.msra.mxu0 %v6812_v53 }
 0x24d   :  { %2194 = vmatmul.mubr.bf16.gmra.mrb[188].mxu1 %v8798_v52  ;;  %4272 = vmatprep.subr.bf16.mxu0 %v6817_v25  ;;  %v1893_v25 = vadd.f32 %v1892_v40, %v8530_v33  ;;  %v6823_v40 = vld [vmem:[#allocation4 + $0xf4] ss:$8 sps:$4 sm:$0xff]  }
 0x24e   :  { %5986 = vmatprep.mubr.msk.bf16.mxu1 %vm775_vm0, %v7088_v24  ;;  %v2814_v24 = vmax.f32 %v1887_v20, 0.0 }
 0x250   :  { %v1902_v44 = vpop.f32.mrb[84].mxu1  ;;  %4273 = vmatpush1.bf16.msra.mxu0 %v6815_v37 }
 0x251   :  { %v1903_v43 = vadd.f32 %v1902_v44, %v8530_v33  ;;  %v1904_v52 = vpop.f32.mrb[85].mxu1  ;;  %4274 = vmatprep.subr.bf16.mxu0 %v6820_v41 }
 0x252   :  { %v1905_v10 = vadd.f32 %v1904_v52, %v8536_v62  ;;  %v1906_v1 = vpop.f32.mrb[86].mxu1  ;;  %v2815_v52 = vmax.f32 %v1889_v27, 0.0 }
 0x253   :  { %v2826_v58 = vmax.f32 %v1903_v43, 0.0  ;;  %v1907_v48 = vadd.f32 %v1906_v1, %v8530_v33  ;;  %v1908_v2 = vpop.f32.mrb[87].mxu1  ;;  %v7089_v43 = vld [vmem:[%s10119_s0 + $0xb0] sm:$0xff]   ;;  %v1897_v1 = vadd.f32 %v1896_v34, %v8530_v33 }
 0x254   :  { %v2827_v12 = vmax.f32 %v1905_v10, 0.0  ;;  %v1909_v42 = vadd.f32 %v1908_v2, %v8536_v62  ;;  %v1895_v10 = vadd.f32 %v1894_v32, %v8536_v62  ;;  %4275 = vmatpush1.bf16.msra.mxu0 %v6818_v55 }
 0x255   :  { %v8905_v53 = vmax.f32 %v2810_v63, %v2826_v58  ;;  %v2830_v44 = vmax.f32 %v1907_v48, 0.0  ;;  %2204 = vmatmul.mubr.bf16.gmra.mrb[192].mxu1 %v7675_v57  ;;  %v1899_v58 = vadd.f32 %v1898_v29, %v8536_v62  ;;  %4276 = vmatprep.subr.bf16.mxu0 %v6823_v40  ;;  %v2822_v34 = vmax.f32 %v1897_v1, 0.0 }
 0x256   :  { %v8908_v35 = vmax.f32 %v2811_v46, %v2827_v12  ;;  %v2831_v36 = vmax.f32 %v1909_v42, 0.0  ;;  %5987 = vmatprep.mubr.msk.bf16.mxu1 %vm775_vm0, %v7089_v43  ;;  %v2818_v46 = vmax.f32 %v1893_v25, 0.0 }
 0x257   :  { %10228 = vst [vmem:[#allocation78_spill] sm:$0xff] %v8905_v53  ;;  %v8915_v20 = vmax.f32 %v2814_v24, %v2830_v44  ;;  %v6821_v24 = vld [vmem:[#allocation4 + $0xf0] ss:$8 sps:$4 sm:$0xff]   ;;  %v2819_v44 = vmax.f32 %v1895_v10, 0.0  ;;  %v2823_v29 = vmax.f32 %v1899_v58, 0.0 }
 0x258   :  { %10229 = vst [vmem:[#allocation79_spill] sm:$0xff] %v8908_v35  ;;  %v8918_v57 = vmax.f32 %v2815_v52, %v2831_v36  ;;  %v1912_v27 = vpop.f32.mrb[88].mxu1  ;;  %4277 = vmatpush1.bf16.msra.mxu0 %v6821_v24 }
 0x259   :  { %10230 = vst [vmem:[#allocation80_spill] sm:$0xff] %v8915_v20  ;;  %v1913_v37 = vadd.f32 %v1912_v27, %v8530_v33  ;;  %v1914_v63 = vpop.f32.mrb[89].mxu1  ;;  %v7090_v27 = vld [vmem:[%s10119_s0 + $0xb8] sm:$0xff]  }
 0x25a   :  { %10231 = vst [vmem:[#allocation81_spill] sm:$0xff] %v8918_v57  ;;  %v1915_v48 = vadd.f32 %v1914_v63, %v8536_v62  ;;  %v1916_v2 = vpop.f32.mrb[90].mxu1 }
 0x25b   :  { %v2834_v12 = vmax.f32 %v1913_v37, 0.0  ;;  %v1917_v42 = vadd.f32 %v1916_v2, %v8530_v33  ;;  %v1918_v32 = vpop.f32.mrb[91].mxu1 }
 0x25c   :  { %v2835_v41 = vmax.f32 %v1915_v48, 0.0  ;;  %v1919_v52 = vadd.f32 %v1918_v32, %v8536_v62 }
 0x25d   :  { %v8926_v36 = vmax.f32 %v2818_v46, %v2834_v12  ;;  %v2838_v43 = vmax.f32 %v1917_v42, 0.0  ;;  %2214 = vmatmul.mubr.bf16.gmra.mrb[196].mxu1 %v7709_v6  ;;  %v7091_v6 = vld [vmem:[%s10119_s0 + $0xc0] sm:$0xff]   ;;  %v7092_v42 = vld [vmem:[%s10119_s0 + $0xc8] sm:$0xff]  }
 0x25e   :  { %v8929_v55 = vmax.f32 %v2819_v44, %v2835_v41  ;;  %v2839_v25 = vmax.f32 %v1919_v52, 0.0  ;;  %5988 = vmatprep.mubr.msk.bf16.mxu1 %vm775_vm0, %v7090_v27 }
 0x25f   :  { %10232 = vst [vmem:[#allocation82_spill] sm:$0xff] %v8926_v36  ;;  %v8935_v10 = vmax.f32 %v2822_v34, %v2838_v43 }
 0x260   :  { %10233 = vst [vmem:[#allocation83_spill] sm:$0xff] %v8929_v55  ;;  %v8937_v37 = vmax.f32 %v2823_v29, %v2839_v25  ;;  %v1922_v1 = vpop.f32.mrb[92].mxu1 }
 0x261   :  { %10234 = vst [vmem:[#allocation84_spill] sm:$0xff] %v8935_v10  ;;  %v1924_v63 = vpop.f32.mrb[93].mxu1 }
 0x262   :  { %10235 = vst [vmem:[#allocation85_spill] sm:$0xff] %v8937_v37  ;;  %v1926_v48 = vpop.f32.mrb[94].mxu1  ;;  %v1925_v32 = vadd.f32 %v1924_v63, %v8536_v62 }
 0x263   :  { %v1928_v2 = vpop.f32.mrb[95].mxu1  ;;  %v1927_v44 = vadd.f32 %v1926_v48, %v8530_v33 }
 0x264   :  { %v1929_v34 = vadd.f32 %v1928_v2, %v8536_v62 }
 0x265   :  { %2224 = vmatmul.mubr.bf16.gmra.mrb[200].mxu1 %v7748_v19  ;;  %v1923_v19 = vadd.f32 %v1922_v1, %v8530_v33  ;;  %v2846_v37 = vmax.f32 %v1927_v44, 0.0 }
 0x266   :  { %5989 = vmatprep.mubr.msk.bf16.mxu1 %vm775_vm0, %v7091_v6 }
 0x267   :  { %v2842_v29 = vmax.f32 %v1923_v19, 0.0  ;;  %v7093_v19 = vld [vmem:[%s10119_s0 + $0xd0] sm:$0xff]  }
 0x268   :  { %v1932_v58 = vpop.f32.mrb[96].mxu1 }
 0x269   :  { %v1934_v40 = vpop.f32.mrb[97].mxu1 }
 0x26a   :  { %v1936_v46 = vpop.f32.mrb[98].mxu1  ;;  %v1935_v44 = vadd.f32 %v1934_v40, %v8536_v62 }
 0x26b   :  { %v1938_v12 = vpop.f32.mrb[99].mxu1 }
 0x26d   :  { %2234 = vmatmul.mubr.bf16.gmra.mrb[204].mxu1 %v7778_v18 }
 0x26e   :  { %5990 = vmatprep.mubr.msk.bf16.mxu1 %vm775_vm0, %v7092_v42  ;;  %v2843_v42 = vmax.f32 %v1925_v32, 0.0  ;;  %v1933_v32 = vadd.f32 %v1932_v58, %v8530_v33 }
 0x270   :  { %v1942_v24 = vpop.f32.mrb[100].mxu1 }
 0x271   :  { %v1943_v41 = vadd.f32 %v1942_v24, %v8530_v33  ;;  %v1944_v52 = vpop.f32.mrb[101].mxu1  ;;  %v2847_v24 = vmax.f32 %v1929_v34, 0.0  ;;  %v1937_v34 = vadd.f32 %v1936_v46, %v8530_v33 }
 0x272   :  { %v1945_v18 = vadd.f32 %v1944_v52, %v8536_v62  ;;  %v1946_v43 = vpop.f32.mrb[102].mxu1 }
 0x273   :  { %v2858_v25 = vmax.f32 %v1943_v41, 0.0  ;;  %v1947_v27 = vadd.f32 %v1946_v43, %v8530_v33  ;;  %v1948_v6 = vpop.f32.mrb[103].mxu1 }
 0x274   :  { %v2859_v1 = vmax.f32 %v1945_v18, 0.0  ;;  %v1949_v63 = vadd.f32 %v1948_v6, %v8536_v62  ;;  %v1939_v6 = vadd.f32 %v1938_v12, %v8536_v62 }
 0x275   :  { %v8957_v10 = vmax.f32 %v2842_v29, %v2858_v25  ;;  %v2862_v48 = vmax.f32 %v1947_v27, 0.0  ;;  %2244 = vmatmul.mubr.bf16.gmra.mrb[208].mxu1 %v7805_v23 }
 0x276   :  { %v8960_v2 = vmax.f32 %v2843_v42, %v2859_v1  ;;  %v2863_v52 = vmax.f32 %v1949_v63, 0.0  ;;  %5991 = vmatprep.mubr.msk.bf16.mxu1 %vm775_vm0, %v7093_v19  ;;  %v2855_v12 = vmax.f32 %v1939_v6, 0.0 }
 0x277   :  { %10236 = vst [vmem:[#allocation86_spill] sm:$0xff] %v8957_v10  ;;  %v8967_v41 = vmax.f32 %v2846_v37, %v2862_v48  ;;  %v2850_v37 = vmax.f32 %v1933_v32, 0.0  ;;  %v7094_v32 = vld [vmem:[%s10119_s0 + $0xd8] sm:$0xff]  }
 0x278   :  { %10237 = vst [vmem:[#allocation87_spill] sm:$0xff] %v8960_v2  ;;  %v8970_v18 = vmax.f32 %v2847_v24, %v2863_v52  ;;  %v1952_v43 = vpop.f32.mrb[104].mxu1  ;;  %v1562_v23 = vpop.f32.mrb[0].mxu0  ;;  %v2851_v52 = vmax.f32 %v1935_v44, 0.0  ;;  %v10241_v2 = vld [vmem:[#allocation13_spill] sm:$0xff] }
 0x279   :  { %10238 = vst [vmem:[#allocation88_spill] sm:$0xff] %v8967_v41  ;;  %v1953_v29 = vadd.f32 %v1952_v43, %v8530_v33  ;;  %v1954_v25 = vpop.f32.mrb[105].mxu1  ;;  %v1564_v27 = vpop.f32.mrb[1].mxu0 }
 0x27a   :  { %10239 = vst [vmem:[#allocation89_spill] sm:$0xff] %v8970_v18  ;;  %v1955_v42 = vadd.f32 %v1954_v25, %v8536_v62  ;;  %v1956_v1 = vpop.f32.mrb[106].mxu1  ;;  %v1566_v58 = vpop.f32.mrb[2].mxu0  ;;  %v2854_v18 = vmax.f32 %v1937_v34, 0.0 }
 0x27b   :  { %v2866_v63 = vmax.f32 %v1953_v29, 0.0  ;;  %v1957_v40 = vadd.f32 %v1956_v1, %v8530_v33  ;;  %v1958_v48 = vpop.f32.mrb[107].mxu1  ;;  %v1568_v24 = vpop.f32.mrb[3].mxu0 }
 0x27c   :  { %v2867_v19 = vmax.f32 %v1955_v42, 0.0  ;;  %v1959_v46 = vadd.f32 %v1958_v48, %v8536_v62  ;;  %v10245_v48 = vld [vmem:[#allocation14_spill] sm:$0xff] }
 0x27d   :  { %v8978_v43 = vmax.f32 %v2850_v37, %v2866_v63  ;;  %v2870_v41 = vmax.f32 %v1957_v40, 0.0  ;;  %2254 = vmatmul.mubr.bf16.gmra.mrb[212].mxu1 %v10241_v2 }
 0x27e   :  { %v8981_v25 = vmax.f32 %v2851_v52, %v2867_v19  ;;  %v2871_v10 = vmax.f32 %v1959_v46, 0.0  ;;  %5992 = vmatprep.mubr.msk.bf16.mxu1 %vm775_vm0, %v7094_v32  ;;  %v1563_v52 = vadd.f32 %v1562_v23, %v8530_v33  ;;  %v7095_v19 = vld [vmem:[%s10119_s0 + $0xe0] sm:$0xff]  }
 0x27f   :  { %10240 = vst [vmem:[#allocation90_spill] sm:$0xff] %v8978_v43  ;;  %v8987_v44 = vmax.f32 %v2854_v18, %v2870_v41  ;;  %v1567_v41 = vadd.f32 %v1566_v58, %v8530_v33  ;;  %v1569_v18 = vadd.f32 %v1568_v24, %v8536_v62 }
 0x280   :  { %10242 = vst [vmem:[#allocation13_spill] sm:$0xff] %v8981_v25  ;;  %v8989_v29 = vmax.f32 %v2855_v12, %v2871_v10  ;;  %v1962_v34 = vpop.f32.mrb[108].mxu1  ;;  %v1572_v42 = vpop.f32.mrb[4].mxu0  ;;  %v1565_v10 = vadd.f32 %v1564_v27, %v8536_v62 }
 0x281   :  { %10243 = vst [vmem:[#allocation91_spill] sm:$0xff] %v8987_v44  ;;  %v1964_v1 = vpop.f32.mrb[109].mxu1  ;;  %v1574_v37 = vpop.f32.mrb[5].mxu0  ;;  %v2558_v43 = vmax.f32 %v1567_v41, 0.0  ;;  %v1963_v58 = vadd.f32 %v1962_v34, %v8530_v33  ;;  %v1573_v36 = vadd.f32 %v1572_v42, %v8530_v33 }
 0x282   :  { %10244 = vst [vmem:[#allocation92_spill] sm:$0xff] %v8989_v29  ;;  %v1966_v63 = vpop.f32.mrb[110].mxu1  ;;  %v1576_v2 = vpop.f32.mrb[6].mxu0  ;;  %v2555_v25 = vmax.f32 %v1565_v10, 0.0  ;;  %v1575_v35 = vadd.f32 %v1574_v37, %v8536_v62 }
 0x283   :  { %v1968_v6 = vpop.f32.mrb[111].mxu1  ;;  %v1578_v40 = vpop.f32.mrb[7].mxu0  ;;  %v1577_v34 = vadd.f32 %v1576_v2, %v8530_v33 }
 0x285   :  { %2264 = vmatmul.mubr.bf16.gmra.mrb[216].mxu1 %v10245_v48  ;;  %v2554_v48 = vmax.f32 %v1563_v52, 0.0 }
 0x286   :  { %5993 = vmatprep.mubr.msk.bf16.mxu1 %vm775_vm0, %v7095_v19  ;;  %v2559_v19 = vmax.f32 %v1569_v18, 0.0  ;;  %v10246_v18 = vld [vmem:[#allocation15_spill] sm:$0xff] }
 0x288   :  { %v9000_v46 = vpop.f32.mrb[112].mxu1  ;;  %v1582_v12 = vpop.f32.mrb[8].mxu0 }
 0x289   :  { %v9002_v32 = vpop.f32.mrb[113].mxu1  ;;  %v1583_v23 = vadd.f32 %v1582_v12, %v8530_v33  ;;  %v1584_v29 = vpop.f32.mrb[9].mxu0  ;;  %v1965_v12 = vadd.f32 %v1964_v1, %v8536_v62  ;;  %v1579_v1 = vadd.f32 %v1578_v40, %v8536_v62 }
 0x28a   :  { %v9005_v44 = vpop.f32.mrb[114].mxu1  ;;  %v1585_v27 = vadd.f32 %v1584_v29, %v8536_v62  ;;  %v1586_v55 = vpop.f32.mrb[10].mxu0  ;;  %v1967_v29 = vadd.f32 %v1966_v63, %v8530_v33  ;;  %v2874_v63 = vmax.f32 %v1963_v58, 0.0 }
 0x28b   :  { %v9009_v24 = vpop.f32.mrb[115].mxu1  ;;  %v2570_v57 = vmax.f32 %v1583_v23, 0.0  ;;  %v1587_v52 = vadd.f32 %v1586_v55, %v8530_v33  ;;  %v1588_v20 = vpop.f32.mrb[11].mxu0  ;;  %v1969_v23 = vadd.f32 %v1968_v6, %v8536_v62  ;;  %v7096_v55 = vld [vmem:[%s10119_s0 + $0xe8] sm:$0xff]   ;;  %v2875_v2 = vmax.f32 %v1965_v12, 0.0 }
 0x28c   :  { %v2571_v10 = vmax.f32 %v1585_v27, 0.0  ;;  %v1589_v41 = vadd.f32 %v1588_v20, %v8536_v62  ;;  %v2878_v50 = vmax.f32 %v1967_v29, 0.0 }
 0x28d   :  { %2274 = vmatmul.mubr.bf16.gmra.mrb[220].mxu1 %v10246_v18  ;;  %v9019_v53 = vmax.f32 %v2554_v48, %v2570_v57  ;;  %v2574_v42 = vmax.f32 %v1587_v52, 0.0  ;;  %v2562_v48 = vmax.f32 %v1573_v36, 0.0  ;;  %v2563_v52 = vmax.f32 %v1575_v35, 0.0 }
 0x28e   :  { %5994 = vmatprep.mubr.msk.bf16.mxu1 %vm775_vm0, %v7096_v55  ;;  %v9027_v20 = vmax.f32 %v2555_v25, %v2571_v10  ;;  %v2575_v37 = vmax.f32 %v1589_v41, 0.0  ;;  %v2566_v55 = vmax.f32 %v1577_v34, 0.0  ;;  %v2879_v10 = vmax.f32 %v1969_v23, 0.0 }
 0x28f   :  { %v9029_v27 = vmax.f32 %v2558_v43, %v2574_v42  ;;  %v2567_v41 = vmax.f32 %v1579_v1, 0.0 }
 0x290   :  { %v1982_v57 = vpop.f32.mrb[116].mxu1  ;;  %v9031_v18 = vmax.f32 %v2559_v19, %v2575_v37  ;;  %v1592_v6 = vpop.f32.mrb[12].mxu0 }
 0x291   :  { %v1983_v13 = vadd.f32 %v1982_v57, %v8530_v33  ;;  %v1984_v15 = vpop.f32.mrb[117].mxu1  ;;  %v1593_v40 = vadd.f32 %v1592_v6, %v8530_v33  ;;  %v1594_v25 = vpop.f32.mrb[13].mxu0 }
 0x292   :  { %v1985_v58 = vadd.f32 %v1984_v15, %v8536_v62  ;;  %v1986_v43 = vpop.f32.mrb[118].mxu1  ;;  %v1595_v12 = vadd.f32 %v1594_v25, %v8536_v62  ;;  %v1596_v36 = vpop.f32.mrb[14].mxu0 }
 0x293   :  { %v2890_v35 = vmax.f32 %v1983_v13, 0.0  ;;  %v1987_v19 = vadd.f32 %v1986_v43, %v8530_v33  ;;  %v1988_v42 = vpop.f32.mrb[119].mxu1  ;;  %v2578_v29 = vmax.f32 %v1593_v40, 0.0  ;;  %v1597_v37 = vadd.f32 %v1596_v36, %v8530_v33  ;;  %v1598_v57 = vpop.f32.mrb[15].mxu0 }
 0x294   :  { %v2891_v34 = vmax.f32 %v1985_v58, 0.0  ;;  %v1989_v6 = vadd.f32 %v1988_v42, %v8536_v62  ;;  %v2579_v30 = vmax.f32 %v1595_v12, 0.0  ;;  %v1599_v23 = vadd.f32 %v1598_v57, %v8536_v62  ;;  %v7097_v58 = vld [vmem:[%s10119_s0 + $0xf0] sm:$0xff]  }
 0x295   :  { %v9041_v15 = vmax.f32 %v2874_v63, %v2890_v35  ;;  %v2894_v1 = vmax.f32 %v1987_v19, 0.0  ;;  %2284 = vmatmul.mubr.bf16.gmra.mrb[224].mxu1 %v10248_v56  ;;  %v9044_v25 = vmax.f32 %v2562_v48, %v2578_v29  ;;  %v2582_v13 = vmax.f32 %v1597_v37, 0.0 }
 0x296   :  { %v9046_v43 = vmax.f32 %v2875_v2, %v2891_v34  ;;  %v2895_v40 = vmax.f32 %v1989_v6, 0.0  ;;  %5995 = vmatprep.mubr.msk.bf16.mxu1 %vm775_vm0, %v7097_v58  ;;  %v9052_v12 = vmax.f32 %v2563_v52, %v2579_v30  ;;  %v2583_v36 = vmax.f32 %v1599_v23, 0.0 }
 0x297   :  { %10247 = vst [vmem:[#allocation14_spill] sm:$0xff] %v9041_v15  ;;  %v1973_v63 = vadd.f32 %v9000_v46, %v8530_v33  ;;  %v9056_v35 = vmax.f32 %v2878_v50, %v2894_v1  ;;  %v9058_v56 = vmax.f32 %v2566_v55, %v2582_v13  ;;  %v1975_v2 = vadd.f32 %v9002_v32, %v8536_v62 }
 0x298   :  { %10249 = vst [vmem:[#allocation15_spill] sm:$0xff] %v9046_v43  ;;  %v9062_v48 = vmax.f32 %v2879_v10, %v2895_v40  ;;  %v1992_v19 = vpop.f32.mrb[120].mxu1  ;;  %v9064_v42 = vmax.f32 %v2567_v41, %v2583_v36  ;;  %v1602_v29 = vpop.f32.mrb[16].mxu0  ;;  %v1977_v30 = vadd.f32 %v9005_v44, %v8530_v33  ;;  %v1979_v50 = vadd.f32 %v9009_v24, %v8536_v62 }
 0x299   :  { %10250 = vst [vmem:[#allocation16_spill] sm:$0xff] %v9056_v35  ;;  %v1993_v52 = vadd.f32 %v1992_v19, %v8530_v33  ;;  %v1994_v37 = vpop.f32.mrb[121].mxu1  ;;  %v1604_v46 = vpop.f32.mrb[17].mxu0  ;;  %v2882_v10 = vmax.f32 %v1973_v63, 0.0  ;;  %v2883_v1 = vmax.f32 %v1975_v2, 0.0  ;;  %v10253_v19 = vld [vmem:[#allocation17_spill] sm:$0xff] }
 0x29a   :  { %10251 = vst [vmem:[#allocation93_spill] sm:$0xff] %v9062_v48  ;;  %v1995_v55 = vadd.f32 %v1994_v37, %v8536_v62  ;;  %v1996_v57 = vpop.f32.mrb[122].mxu1  ;;  %v1606_v32 = vpop.f32.mrb[18].mxu0  ;;  %v2886_v40 = vmax.f32 %v1977_v30, 0.0  ;;  %v2887_v24 = vmax.f32 %v1979_v50, 0.0  ;;  %v7098_v63 = vld [vmem:[%s10119_s0 + $0xf8] sm:$0xff]  }
 0x29b   :  { %v2898_v34 = vmax.f32 %v1993_v52, 0.0  ;;  %v1997_v41 = vadd.f32 %v1996_v57, %v8530_v33  ;;  %v1998_v6 = vpop.f32.mrb[123].mxu1  ;;  %v1608_v23 = vpop.f32.mrb[19].mxu0 }
 0x29c   :  { %v2899_v13 = vmax.f32 %v1995_v55, 0.0  ;;  %v1999_v44 = vadd.f32 %v1998_v6, %v8536_v62 }
 0x29d   :  { %v9074_v58 = vmax.f32 %v2882_v10, %v2898_v34  ;;  %v2902_v36 = vmax.f32 %v1997_v41, 0.0  ;;  %2294 = vmatmul.mubr.bf16.gmra.mrb[228].mxu1 %v10253_v19 }
 0x29e   :  { %v9077_v37 = vmax.f32 %v2883_v1, %v2899_v13  ;;  %v2903_v48 = vmax.f32 %v1999_v44, 0.0  ;;  %5996 = vmatprep.mubr.msk.bf16.mxu1 %vm775_vm0, %v7098_v63  ;;  %v10257_v1 = vld [vmem:[#allocation18_spill] sm:$0xff]  ;;  %v1603_v13 = vadd.f32 %v1602_v29, %v8530_v33  ;;  %v7099_v44 = vld [vmem:[%s10119_s0 + $0x100] sm:$0xff]  }
 0x29f   :  { %10252 = vst [vmem:[#allocation94_spill] sm:$0xff] %v9074_v58  ;;  %v9083_v2 = vmax.f32 %v2886_v40, %v2902_v36  ;;  %v1607_v40 = vadd.f32 %v1606_v32, %v8530_v33  ;;  %v1609_v36 = vadd.f32 %v1608_v23, %v8536_v62 }
 0x2a0   :  { %10254 = vst [vmem:[#allocation17_spill] sm:$0xff] %v9077_v37  ;;  %v9085_v52 = vmax.f32 %v2887_v24, %v2903_v48  ;;  %v2002_v30 = vpop.f32.mrb[124].mxu1  ;;  %v1612_v55 = vpop.f32.mrb[20].mxu0  ;;  %v1605_v48 = vadd.f32 %v1604_v46, %v8536_v62 }
 0x2a1   :  { %10255 = vst [vmem:[#allocation95_spill] sm:$0xff] %v9083_v2  ;;  %v2004_v57 = vpop.f32.mrb[125].mxu1  ;;  %v1614_v10 = vpop.f32.mrb[21].mxu0  ;;  %v2590_v58 = vmax.f32 %v1607_v40, 0.0  ;;  %v2003_v32 = vadd.f32 %v2002_v30, %v8530_v33  ;;  %v1613_v43 = vadd.f32 %v1612_v55, %v8530_v33 }
 0x2a2   :  { %10256 = vst [vmem:[#allocation96_spill] sm:$0xff] %v9085_v52  ;;  %v2006_v34 = vpop.f32.mrb[126].mxu1  ;;  %v1616_v41 = vpop.f32.mrb[22].mxu0  ;;  %v2587_v37 = vmax.f32 %v1605_v48, 0.0  ;;  %v1615_v38 = vadd.f32 %v1614_v10, %v8536_v62 }
 0x2a3   :  { %v2008_v50 = vpop.f32.mrb[127].mxu1  ;;  %v1618_v6 = vpop.f32.mrb[23].mxu0  ;;  %v1617_v30 = vadd.f32 %v1616_v41, %v8530_v33 }
 0x2a5   :  { %2304 = vmatmul.mubr.bf16.gmra.mrb[232].mxu1 %v10257_v1  ;;  %v2586_v1 = vmax.f32 %v1603_v13, 0.0 }
 0x2a6   :  { %5997 = vmatprep.mubr.msk.bf16.mxu1 %vm775_vm0, %v7099_v44  ;;  %v2591_v44 = vmax.f32 %v1609_v36, 0.0  ;;  %v10258_v36 = vld [vmem:[#allocation19_spill] sm:$0xff] }
 0x2a8   :  { %v9096_v19 = vpop.f32.mrb[128].mxu1  ;;  %v1622_v24 = vpop.f32.mrb[24].mxu0 }
 0x2a9   :  { %v9098_v63 = vpop.f32.mrb[129].mxu1  ;;  %v1623_v29 = vadd.f32 %v1622_v24, %v8530_v33  ;;  %v1624_v52 = vpop.f32.mrb[25].mxu0  ;;  %v2005_v24 = vadd.f32 %v2004_v57, %v8536_v62  ;;  %v1619_v57 = vadd.f32 %v1618_v6, %v8536_v62 }
 0x2aa   :  { %v9101_v2 = vpop.f32.mrb[130].mxu1  ;;  %v1625_v46 = vadd.f32 %v1624_v52, %v8536_v62  ;;  %v1626_v35 = vpop.f32.mrb[26].mxu0  ;;  %v2007_v52 = vadd.f32 %v2006_v34, %v8530_v33  ;;  %v2906_v34 = vmax.f32 %v2003_v32, 0.0 }
 0x2ab   :  { %v9105_v23 = vpop.f32.mrb[131].mxu1  ;;  %v2602_v15 = vmax.f32 %v1623_v29, 0.0  ;;  %v1627_v13 = vadd.f32 %v1626_v35, %v8530_v33  ;;  %v1628_v3 = vpop.f32.mrb[27].mxu0  ;;  %v2009_v29 = vadd.f32 %v2008_v50, %v8536_v62  ;;  %v7100_v35 = vld [vmem:[%s10119_s0 + $0x108] sm:$0xff]   ;;  %v2907_v41 = vmax.f32 %v2005_v24, 0.0 }
 0x2ac   :  { %v2603_v48 = vmax.f32 %v1625_v46, 0.0  ;;  %v1629_v40 = vadd.f32 %v1628_v3, %v8536_v62  ;;  %v2910_v49 = vmax.f32 %v2007_v52, 0.0 }
 0x2ad   :  { %2314 = vmatmul.mubr.bf16.gmra.mrb[236].mxu1 %v10258_v36  ;;  %v9115_v47 = vmax.f32 %v2586_v1, %v2602_v15  ;;  %v2606_v55 = vmax.f32 %v1627_v13, 0.0  ;;  %v2594_v1 = vmax.f32 %v1613_v43, 0.0  ;;  %v2595_v13 = vmax.f32 %v1615_v38, 0.0 }
 0x2ae   :  { %5998 = vmatprep.mubr.msk.bf16.mxu1 %vm775_vm0, %v7100_v35  ;;  %v9123_v3 = vmax.f32 %v2587_v37, %v2603_v48  ;;  %v2607_v10 = vmax.f32 %v1629_v40, 0.0  ;;  %v2598_v35 = vmax.f32 %v1617_v30, 0.0  ;;  %v2911_v48 = vmax.f32 %v2009_v29, 0.0 }
 0x2af   :  { %v9125_v46 = vmax.f32 %v2590_v58, %v2606_v55  ;;  %v2599_v40 = vmax.f32 %v1619_v57, 0.0 }
 0x2b0   :  { %v2022_v15 = vpop.f32.mrb[132].mxu1  ;;  %v9127_v36 = vmax.f32 %v2591_v44, %v2607_v10  ;;  %v1632_v50 = vpop.f32.mrb[28].mxu0 }
 0x2b1   :  { %v2023_v60 = vadd.f32 %v2022_v15, %v8530_v33  ;;  %v2024_v4 = vpop.f32.mrb[133].mxu1  ;;  %v1633_v6 = vadd.f32 %v1632_v50, %v8530_v33  ;;  %v1634_v37 = vpop.f32.mrb[29].mxu0 }
 0x2b2   :  { %v2025_v32 = vadd.f32 %v2024_v4, %v8536_v62  ;;  %v2026_v58 = vpop.f32.mrb[134].mxu1  ;;  %v1635_v24 = vadd.f32 %v1634_v37, %v8536_v62  ;;  %v1636_v43 = vpop.f32.mrb[30].mxu0 }
 0x2b3   :  { %v2922_v38 = vmax.f32 %v2023_v60, 0.0  ;;  %v2027_v44 = vadd.f32 %v2026_v58, %v8530_v33  ;;  %v2028_v55 = vpop.f32.mrb[135].mxu1  ;;  %v2610_v52 = vmax.f32 %v1633_v6, 0.0  ;;  %v1637_v10 = vadd.f32 %v1636_v43, %v8530_v33  ;;  %v1638_v15 = vpop.f32.mrb[31].mxu0 }
 0x2b4   :  { %v2923_v30 = vmax.f32 %v2025_v32, 0.0  ;;  %v2029_v50 = vadd.f32 %v2028_v55, %v8536_v62  ;;  %v2611_v17 = vmax.f32 %v1635_v24, 0.0  ;;  %v1639_v29 = vadd.f32 %v1638_v15, %v8536_v62  ;;  %v7101_v32 = vld [vmem:[%s10119_s0 + $0x110] sm:$0xff]  }
 0x2b5   :  { %v9137_v4 = vmax.f32 %v2906_v34, %v2922_v38  ;;  %v2926_v57 = vmax.f32 %v2027_v44, 0.0  ;;  %2324 = vmatmul.mubr.bf16.gmra.mrb[240].mxu1 %v10260_v0  ;;  %v9140_v37 = vmax.f32 %v2594_v1, %v2610_v52  ;;  %v2614_v60 = vmax.f32 %v1637_v10, 0.0 }
 0x2b6   :  { %v9142_v58 = vmax.f32 %v2907_v41, %v2923_v30  ;;  %v2927_v6 = vmax.f32 %v2029_v50, 0.0  ;;  %5999 = vmatprep.mubr.msk.bf16.mxu1 %vm775_vm0, %v7101_v32  ;;  %v9148_v24 = vmax.f32 %v2595_v13, %v2611_v17  ;;  %v2615_v43 = vmax.f32 %v1639_v29, 0.0 }
 0x2b7   :  { %10259 = vst [vmem:[#allocation18_spill] sm:$0xff] %v9137_v4  ;;  %v2013_v34 = vadd.f32 %v9096_v19, %v8530_v33  ;;  %v9152_v38 = vmax.f32 %v2910_v49, %v2926_v57  ;;  %v9154_v0 = vmax.f32 %v2598_v35, %v2614_v60  ;;  %v2015_v41 = vadd.f32 %v9098_v63, %v8536_v62 }
 0x2b8   :  { %10261 = vst [vmem:[#allocation19_spill] sm:$0xff] %v9142_v58  ;;  %v9158_v1 = vmax.f32 %v2911_v48, %v2927_v6  ;;  %v2032_v44 = vpop.f32.mrb[136].mxu1  ;;  %v9160_v55 = vmax.f32 %v2599_v40, %v2615_v43  ;;  %v1642_v52 = vpop.f32.mrb[32].mxu0  ;;  %v2017_v17 = vadd.f32 %v9101_v2, %v8530_v33  ;;  %v2019_v49 = vadd.f32 %v9105_v23, %v8536_v62 }
 0x2b9   :  { %10262 = vst [vmem:[#allocation20_spill] sm:$0xff] %v9152_v38  ;;  %v2033_v13 = vadd.f32 %v2032_v44, %v8530_v33  ;;  %v2034_v10 = vpop.f32.mrb[137].mxu1  ;;  %v1644_v19 = vpop.f32.mrb[33].mxu0  ;;  %v2914_v48 = vmax.f32 %v2013_v34, 0.0  ;;  %v2915_v57 = vmax.f32 %v2015_v41, 0.0  ;;  %v10265_v44 = vld [vmem:[#allocation21_spill] sm:$0xff] }
 0x2ba   :  { %10263 = vst [vmem:[#allocation97_spill] sm:$0xff] %v9158_v1  ;;  %v2035_v35 = vadd.f32 %v2034_v10, %v8536_v62  ;;  %v2036_v15 = vpop.f32.mrb[138].mxu1  ;;  %v1646_v63 = vpop.f32.mrb[34].mxu0  ;;  %v2918_v6 = vmax.f32 %v2017_v17, 0.0  ;;  %v2919_v23 = vmax.f32 %v2019_v49, 0.0  ;;  %v7102_v34 = vld [vmem:[%s10119_s0 + $0x118] sm:$0xff]  }
 0x2bb   :  { %v2930_v30 = vmax.f32 %v2033_v13, 0.0  ;;  %v2037_v40 = vadd.f32 %v2036_v15, %v8530_v33  ;;  %v2038_v50 = vpop.f32.mrb[139].mxu1  ;;  %v1648_v29 = vpop.f32.mrb[35].mxu0  ;;  %v1214_v15 = vsub.s32 2, %v8494_v11  ;;  %v1218_v49 = vsub.s32 3, %v8494_v11 }
 0x2bc   :  { %v2931_v60 = vmax.f32 %v2035_v35, 0.0  ;;  %v2039_v2 = vadd.f32 %v2038_v50, %v8536_v62  ;;  %v1647_v11 = vadd.f32 %v1646_v63, %v8530_v33  ;;  %v9214_v63 = vadd.f32 %v8532_v51, %v8536_v62 }
 0x2bd   :  { %v9170_v32 = vmax.f32 %v2914_v48, %v2930_v30  ;;  %v2934_v43 = vmax.f32 %v2037_v40, 0.0  ;;  %2334 = vmatmul.mubr.bf16.gmra.mrb[244].mxu1 %v10265_v44  ;;  %v7103_v44 = vld [vmem:[#allocation2] sm:$0xf] }
 0x2be   :  { %v9173_v10 = vmax.f32 %v2915_v57, %v2931_v60  ;;  %v2935_v1 = vmax.f32 %v2039_v2, 0.0  ;;  %6000 = vmatprep.mubr.msk.bf16.mxu1 %vm775_vm0, %v7102_v34  ;;  %v9187_v57 = vadd.f32 %v8517_v39, %v8530_v33  ;;  %v10269_v34 = vld [vmem:[#allocation22_spill] sm:$0xff]  ;;  %v1649_v39 = vadd.f32 %v1648_v29, %v8536_v62 }
 0x2bf   :  { %10264 = vst [vmem:[#allocation98_spill] sm:$0xff] %v9170_v32  ;;  %v9179_v41 = vmax.f32 %v2918_v6, %v2934_v43  ;;  %v1643_v6 = vadd.f32 %v1642_v52, %v8530_v33  ;;  %v1645_v43 = vadd.f32 %v1644_v19, %v8536_v62  ;;  %v9209_v19 = vadd.f32 %v8523_v21, %v8530_v33 }
 0x2c0   :  { %10266 = vst [vmem:[#allocation21_spill] sm:$0xff] %v9173_v10  ;;  %v9181_v13 = vmax.f32 %v2919_v23, %v2935_v1  ;;  %v2075_v17 = vpop.f32.mrb[140].mxu1  ;;  %v1652_v35 = vpop.f32.mrb[36].mxu0  ;;  %v9191_v1 = vadd.f32 %v8521_v16, %v8536_v62  ;;  %v9195_v23 = vrot.slane %v7103_v44, %v1214_v15  ;;  %v7104_v16 = vld [vmem:[%s10119_s0 + $0x120] sm:$0xff]   ;;  %v2622_v10 = vmax.f32 %v1647_v11, 0.0 }
 0x2c1   :  { %10267 = vst [vmem:[#allocation99_spill] sm:$0xff] %v9179_v41  ;;  %v2077_v48 = vpop.f32.mrb[141].mxu1  ;;  %v1654_v30 = vpop.f32.mrb[37].mxu0  ;;  %v2618_v29 = vmax.f32 %v1643_v6, 0.0  ;;  %v2623_v52 = vmax.f32 %v1649_v39, 0.0  ;;  %v1653_v51 = vadd.f32 %v1652_v35, %v8530_v33 }
 0x2c2   :  { %10268 = vst [vmem:[#allocation100_spill] sm:$0xff] %v9181_v13  ;;  %v2079_v40 = vpop.f32.mrb[142].mxu1  ;;  %v1656_v50 = vpop.f32.mrb[38].mxu0  ;;  %v9200_v13 = vrot.slane %v7103_v44, %v1218_v49  ;;  %v2619_v44 = vmax.f32 %v1645_v43, 0.0  ;;  %v9217_v41 = vadd.f32 %v2075_v17, %v9195_v23  ;;  %v9225_v6 = vadd.f32 %v1654_v30, %v8536_v62 }
 0x2c3   :  { %v2081_v60 = vpop.f32.mrb[143].mxu1  ;;  %v1658_v2 = vpop.f32.mrb[39].mxu0  ;;  %v9229_v17 = vadd.f32 %v2079_v40, %v9195_v23  ;;  %v9232_v39 = vadd.f32 %v1656_v50, %v8530_v33  ;;  %v2626_v54 = vmax.f32 %v1653_v51, 0.0 }
 0x2c4   :  { %v9221_v38 = vadd.f32 %v2077_v48, %v9200_v13  ;;  %v9236_v14 = vadd.f32 %v2081_v60, %v9200_v13  ;;  %v9239_v35 = vadd.f32 %v1658_v2, %v8536_v62  ;;  %v7105_v2 = vld [vmem:[%s10119_s0 + $0x128] sm:$0xff]  }
 0x2c5   :  { %2344 = vmatmul.mubr.bf16.gmra.mrb[248].mxu1 %v10269_v34 }
 0x2c6   :  { %6001 = vmatprep.mubr.msk.bf16.mxu1 %vm775_vm0, %v7104_v16  ;;  %v2631_v51 = vmax.f32 %v9239_v35, 0.0 }
 0x2c8   :  { %v2085_v49 = vpop.f32.mrb[144].mxu1  ;;  %v1662_v34 = vpop.f32.mrb[40].mxu0 }
 0x2c9   :  { %v2087_v16 = vpop.f32.mrb[145].mxu1  ;;  %v1663_v32 = vadd.f32 %v1662_v34, %v8530_v33  ;;  %v1664_v21 = vpop.f32.mrb[41].mxu0 }
 0x2ca   :  { %v2089_v15 = vpop.f32.mrb[146].mxu1  ;;  %v1665_v43 = vadd.f32 %v1664_v21, %v8536_v62  ;;  %v1666_v58 = vpop.f32.mrb[42].mxu0 }
 0x2cb   :  { %v2091_v11 = vpop.f32.mrb[147].mxu1  ;;  %v2634_v34 = vmax.f32 %v1663_v32, 0.0  ;;  %v1667_v48 = vadd.f32 %v1666_v58, %v8530_v33  ;;  %v1668_v4 = vpop.f32.mrb[43].mxu0  ;;  %v2556_v58 = vmax.f32 %v9217_v41, 0.0  ;;  %v2561_v41 = vmax.f32 %v9236_v14, 0.0 }
 0x2cc   :  { %v2635_v30 = vmax.f32 %v1665_v43, 0.0  ;;  %v1669_v21 = vadd.f32 %v1668_v4, %v8536_v62  ;;  %v6826_v4 = vld [vmem:[#allocation4 + $0x104] ss:$8 sps:$4 sm:$0xff]   ;;  %v2557_v43 = vmax.f32 %v9221_v38, 0.0  ;;  %v9268_v38 = vadd.f32 %v2087_v16, %v9200_v13 }
 0x2cd   :  { %2354 = vmatmul.mubr.bf16.gmra.mrb[252].mxu1 %v10270_v61  ;;  %v9245_v50 = vmax.f32 %v2618_v29, %v2634_v34  ;;  %v2638_v32 = vmax.f32 %v1667_v48, 0.0  ;;  %v2560_v61 = vmax.f32 %v9229_v17, 0.0  ;;  %v2627_v29 = vmax.f32 %v9225_v6, 0.0  ;;  %4439 = vmatprep.subr.bf16.mxu0 %v6826_v4 }
 0x2ce   :  { %v9248_v60 = vmax.f32 %v2619_v44, %v2635_v30  ;;  %v2639_v8 = vmax.f32 %v1669_v21, 0.0  ;;  %6002 = vmatprep.mubr.msk.bf16.mxu1 %vm775_vm0, %v7105_v2  ;;  %v2630_v44 = vmax.f32 %v9232_v39, 0.0  ;;  %v9265_v2 = vadd.f32 %v2085_v49, %v9195_v23 }
 0x2cf   :  { %v9257_v34 = vmax.f32 %v2622_v10, %v2638_v32  ;;  %v9273_v39 = vadd.f32 %v2089_v15, %v9195_v23 }
 0x2d0   :  { %v2095_v48 = vpop.f32.mrb[148].mxu1  ;;  %v9262_v30 = vmax.f32 %v2623_v52, %v2639_v8  ;;  %v1672_v21 = vpop.f32.mrb[44].mxu0  ;;  %v9276_v8 = vadd.f32 %v2091_v11, %v9200_v13 }
 0x2d1   :  { %v2096_v10 = vadd.f32 %v2095_v48, %v9195_v23  ;;  %v2097_v6 = vpop.f32.mrb[149].mxu1  ;;  %v1673_v14 = vadd.f32 %v1672_v21, %v8530_v33  ;;  %v1674_v17 = vpop.f32.mrb[45].mxu0 }
 0x2d2   :  { %v2098_v52 = vadd.f32 %v2097_v6, %v9200_v13  ;;  %v2099_v35 = vpop.f32.mrb[150].mxu1  ;;  %v1675_v49 = vadd.f32 %v1674_v17, %v8536_v62  ;;  %v1676_v32 = vpop.f32.mrb[46].mxu0  ;;  %v10271_v17 = vld [vmem:[#allocation24_spill] sm:$0xff] }
 0x2d3   :  { %v2572_v16 = vmax.f32 %v2096_v10, 0.0  ;;  %v2100_v4 = vadd.f32 %v2099_v35, %v9195_v23  ;;  %v2101_v48 = vpop.f32.mrb[151].mxu1  ;;  %v2642_v59 = vmax.f32 %v1673_v14, 0.0  ;;  %v1677_v21 = vadd.f32 %v1676_v32, %v8530_v33  ;;  %v1678_v40 = vpop.f32.mrb[47].mxu0 }
 0x2d4   :  { %v2573_v9 = vmax.f32 %v2098_v52, 0.0  ;;  %v2102_v15 = vadd.f32 %v2101_v48, %v9200_v13  ;;  %v2643_v45 = vmax.f32 %v1675_v49, 0.0  ;;  %v1679_v11 = vadd.f32 %v1678_v40, %v8536_v62  ;;  %v7106_v52 = vld [vmem:[%s10119_s0 + $0x130] sm:$0xff]  }
 0x2d5   :  { %v2940_v22 = vmax.f32 %v2556_v58, %v2572_v16  ;;  %v2576_v6 = vmax.f32 %v2100_v4, 0.0  ;;  %v9284_v7 = vmax.f32 %v2626_v54, %v2642_v59  ;;  %2364 = vmatmul.mubr.bf16.gmra.mrb[0].mxu1 %v10271_v17  ;;  %v2646_v10 = vmax.f32 %v1677_v21, 0.0 }
 0x2d6   :  { %v2941_v31 = vmax.f32 %v2557_v43, %v2573_v9  ;;  %v2577_v35 = vmax.f32 %v2102_v15, 0.0  ;;  %v9287_v28 = vmax.f32 %v2627_v29, %v2643_v45  ;;  %v2647_v14 = vmax.f32 %v1679_v11, 0.0  ;;  %6003 = vmatprep.mubr.msk.bf16.mxu1 %vm775_vm0, %v7106_v52 }
 0x2d7   :  { %v2564_v40 = vmax.f32 %v9265_v2, 0.0  ;;  %v3130_v58 = vmax.f32 %v9019_v53, %v2940_v22  ;;  %v2944_v54 = vmax.f32 %v2560_v61, %v2576_v6  ;;  %v9295_v59 = vmax.f32 %v2630_v44, %v2646_v10 }
 0x2d8   :  { %v2565_v49 = vmax.f32 %v9268_v38, 0.0  ;;  %v3131_v9 = vmax.f32 %v9027_v20, %v2941_v31  ;;  %v2945_v45 = vmax.f32 %v2561_v41, %v2577_v35  ;;  %v9299_v43 = vmax.f32 %v2631_v51, %v2647_v14  ;;  %v1682_v29 = vpop.f32.mrb[48].mxu0  ;;  %v2105_v32 = vpop.f32.mrb[152].mxu1 }
 0x2d9   :  { %v2568_v16 = vmax.f32 %v9273_v39, 0.0  ;;  %v3132_v4 = vmax.f32 %v9029_v27, %v2944_v54  ;;  %v1683_v2 = vadd.f32 %v1682_v29, %v8530_v33  ;;  %v2106_v22 = vadd.f32 %v2105_v32, %v9195_v23  ;;  %v1684_v53 = vpop.f32.mrb[49].mxu0  ;;  %v2107_v61 = vpop.f32.mrb[153].mxu1  ;;  %v10273_v54 = vld [vmem:[#allocation25_spill] sm:$0xff] }
 0x2da   :  { %v2569_v44 = vmax.f32 %v9276_v8, 0.0  ;;  %v3133_v38 = vmax.f32 %v9031_v18, %v2945_v45  ;;  %v1685_v31 = vadd.f32 %v1684_v53, %v8536_v62  ;;  %v2108_v20 = vadd.f32 %v2107_v61, %v9200_v13  ;;  %v1686_v41 = vpop.f32.mrb[50].mxu0  ;;  %v2109_v51 = vpop.f32.mrb[154].mxu1 }
 0x2db   :  { %v3226_v48 = vpack.c.bf16 %v3132_v4, %v3130_v58  ;;  %v2650_v39 = vmax.f32 %v1683_v2, 0.0  ;;  %v2580_v21 = vmax.f32 %v2106_v22, 0.0  ;;  %v1687_v27 = vadd.f32 %v1686_v41, %v8530_v33  ;;  %v1688_v15 = vpop.f32.mrb[51].mxu0  ;;  %v2111_v11 = vpop.f32.mrb[155].mxu1 }
 0x2dc   :  { %v2651_v6 = vmax.f32 %v1685_v31, 0.0  ;;  %v2581_v17 = vmax.f32 %v2108_v20, 0.0  ;;  %v2110_v10 = vadd.f32 %v2109_v51, %v9195_v23  ;;  %v1689_v8 = vadd.f32 %v1688_v15, %v8536_v62  ;;  %v7107_v62 = vld [vmem:[%s10119_s0 + $0x138] sm:$0xff]  }
 0x2dd   :  { %v10272_v18 = vmax.f32 %v9187_v57, 0.0  ;;  %v2948_v14 = vmax.f32 %v2564_v40, %v2580_v21  ;;  %v2654_v52 = vmax.f32 %v1687_v27, 0.0  ;;  %v2112_v58 = vadd.f32 %v2111_v11, %v9200_v13  ;;  %2374 = vmatmul.mubr.bf16.gmra.mrb[4].mxu1 %v10273_v54  ;;  %v6829_v51 = vld [vmem:[#allocation4 + $0x114] ss:$8 sps:$4 sm:$0xff]  }
 0x2de   :  { %v10274_v33 = vmax.f32 %v9191_v1, 0.0  ;;  %v2949_v29 = vmax.f32 %v2565_v49, %v2581_v17  ;;  %v2584_v32 = vmax.f32 %v2110_v10, 0.0  ;;  %v2655_v4 = vmax.f32 %v1689_v8, 0.0  ;;  %6004 = vmatprep.mubr.msk.bf16.mxu1 %vm775_vm0, %v7107_v62  ;;  %v6824_v1 = vld [vmem:[#allocation4 + $0x100] ss:$8 sps:$4 sm:$0xff]   ;;  %v10278_v8 = vld [vmem:[#allocation27_spill] sm:$0xff] }
 0x2df   :  { %v9314_v35 = vmax.f32 %v2650_v39, %v10272_v18  ;;  %v3134_v57 = vmax.f32 %v9044_v25, %v2948_v14  ;;  %v10275_v40 = vmax.f32 %v9209_v19, 0.0  ;;  %v2585_v22 = vmax.f32 %v2112_v58, 0.0  ;;  %v6833_v10 = vld [vmem:[#allocation4 + $0x130] ss:$8 sps:$4 sm:$0xff]   ;;  %v7109_v18 = vld [vmem:[%s10119_s0 + $0x148] sm:$0xff]  }
 0x2e0   :  { %v9320_v45 = vmax.f32 %v2651_v6, %v10274_v33  ;;  %v3227_v53 = vpack.c.bf16 %v3133_v38, %v3131_v9  ;;  %v3135_v61 = vmax.f32 %v9052_v12, %v2949_v29  ;;  %v2952_v49 = vmax.f32 %v2568_v16, %v2584_v32  ;;  %v2115_v41 = vpop.f32.mrb[156].mxu1  ;;  %v6827_v38 = vld [vmem:[#allocation4 + $0x110] ss:$8 sps:$4 sm:$0xff]   ;;  %v6832_v16 = vld [vmem:[#allocation4 + $0x124] ss:$8 sps:$4 sm:$0xff]  }
 0x2e1   :  { %v9329_v2 = vmax.f32 %v2654_v52, %v10275_v40  ;;  %v10276_v31 = vmax.f32 %v9214_v63, 0.0  ;;  %v2953_v39 = vmax.f32 %v2569_v44, %v2585_v22  ;;  %v2117_v21 = vpop.f32.mrb[157].mxu1  ;;  %v10277_v63 = vld [vmem:[#allocation26_spill] sm:$0xff]  ;;  %v7108_v44 = vld [vmem:[%s10119_s0 + $0x140] sm:$0xff]   ;;  %v2116_v52 = vadd.f32 %v2115_v41, %v9195_v23 }
 0x2e2   :  { %4278 = vmatprep.mubr.bf16.mxu0 %v3227_v53  ;;  %v3136_v25 = vmax.f32 %v9058_v56, %v2952_v49  ;;  %v2119_v19 = vpop.f32.mrb[158].mxu1  ;;  %v6830_v56 = vld [vmem:[#allocation4 + $0x120] ss:$8 sps:$4 sm:$0xff]   ;;  %v6838_v14 = vld [vmem:[#allocation4 + $0x144] ss:$8 sps:$4 sm:$0xff]   ;;  %v2118_v54 = vadd.f32 %v2117_v21, %v9200_v13 }
 0x2e3   :  { %v9334_v20 = vmax.f32 %v2655_v4, %v10276_v31  ;;  %4279 = vmatmul.mubr.bf16.vlgmr.msra.gmra.mrb[52].mxu0 %v3226_v48  ;;  %v3137_v27 = vmax.f32 %v9064_v42, %v2953_v39  ;;  %v2121_v9 = vpop.f32.mrb[159].mxu1  ;;  %v6835_v42 = vld [vmem:[#allocation4 + $0x134] ss:$8 sps:$4 sm:$0xff]   ;;  %v6836_v58 = vld [vmem:[#allocation4 + $0x140] ss:$8 sps:$4 sm:$0xff]   ;;  %v2120_v29 = vadd.f32 %v2119_v19, %v9195_v23  ;;  %v2588_v22 = vmax.f32 %v2116_v52, 0.0 }
 0x2e4   :  { %4440 = vmatpush1.bf16.msra.mxu0 %v6824_v1  ;;  %v3228_v12 = vpack.c.bf16 %v3136_v25, %v3134_v57  ;;  %v2122_v62 = vadd.f32 %v2121_v9, %v9200_v13  ;;  %v2589_v49 = vmax.f32 %v2118_v54, 0.0  ;;  %v10279_v25 = vld [vmem:[#allocation28_spill] sm:$0xff] }
 0x2e5   :  { %4441 = vmatprep.subr.bf16.mxu0 %v6829_v51  ;;  %2384 = vmatmul.mubr.bf16.gmra.mrb[8].mxu1 %v10277_v63  ;;  %v3229_v15 = vpack.c.bf16 %v3137_v27, %v3135_v61  ;;  %v2592_v51 = vmax.f32 %v2120_v29, 0.0 }
 0x2e6   :  { %6005 = vmatprep.mubr.msk.bf16.mxu1 %vm775_vm0, %v7108_v44  ;;  %v2593_v19 = vmax.f32 %v2122_v62, 0.0  ;;  %v6839_v62 = vld [vmem:[#allocation4 + $0x150] ss:$8 sps:$4 sm:$0xff]  }
 0x2e7   :  { %4288 = vmatprep.mubr.bf16.mxu0 %v3229_v15 }
 0x2e8   :  { %4442 = vmatpush1.bf16.msra.mxu0 %v6827_v38  ;;  %v2125_v48 = vpop.f32.mrb[160].mxu1  ;;  %v7110_v38 = vld [vmem:[%s10119_s0 + $0x150] sm:$0xff]  }
 0x2e9   :  { %4443 = vmatprep.subr.bf16.mxu0 %v6832_v16  ;;  %v2127_v11 = vpop.f32.mrb[161].mxu1 }
 0x2ea   :  { %v2129_v6 = vpop.f32.mrb[162].mxu1  ;;  %v2128_v15 = vadd.f32 %v2127_v11, %v9200_v13 }
 0x2eb   :  { %4289 = vmatmul.mubr.bf16.gmra.mrb[56].mxu0 %v3228_v12  ;;  %v2131_v17 = vpop.f32.mrb[163].mxu1  ;;  %v2126_v12 = vadd.f32 %v2125_v48, %v9195_v23 }
 0x2ec   :  { %4444 = vmatpush1.bf16.msra.mxu0 %v6830_v56  ;;  %v2132_v52 = vadd.f32 %v2131_v17, %v9200_v13  ;;  %v6841_v17 = vld [vmem:[#allocation4 + $0x154] ss:$8 sps:$4 sm:$0xff]  }
 0x2ed   :  { %4445 = vmatprep.subr.bf16.mxu0 %v6835_v42  ;;  %2394 = vmatmul.mubr.bf16.gmra.mrb[12].mxu1 %v10278_v8  ;;  %v2596_v54 = vmax.f32 %v2126_v12, 0.0 }
 0x2ee   :  { %6006 = vmatprep.mubr.msk.bf16.mxu1 %vm775_vm0, %v7109_v18 }
 0x2f0   :  { %4446 = vmatpush1.bf16.msra.mxu0 %v6833_v10  ;;  %v2135_v33 = vpop.f32.mrb[164].mxu1  ;;  %v2130_v10 = vadd.f32 %v2129_v6, %v9195_v23  ;;  %v2597_v6 = vmax.f32 %v2128_v15, 0.0  ;;  %v10281_v15 = vld [vmem:[#allocation30_spill] sm:$0xff] }
 0x2f1   :  { %4447 = vmatprep.subr.bf16.mxu0 %v6838_v14  ;;  %v2136_v32 = vadd.f32 %v2135_v33, %v9195_v23  ;;  %v2137_v4 = vpop.f32.mrb[165].mxu1 }
 0x2f2   :  { %v2138_v57 = vadd.f32 %v2137_v4, %v9200_v13  ;;  %v2139_v40 = vpop.f32.mrb[166].mxu1 }
 0x2f3   :  { %v2604_v53 = vmax.f32 %v2136_v32, 0.0  ;;  %v2140_v1 = vadd.f32 %v2139_v40, %v9195_v23  ;;  %v2141_v61 = vpop.f32.mrb[167].mxu1 }
 0x2f4   :  { %4448 = vmatpush1.bf16.msra.mxu0 %v6836_v58  ;;  %v2605_v31 = vmax.f32 %v2138_v57, 0.0  ;;  %v2142_v41 = vadd.f32 %v2141_v61, %v9200_v13  ;;  %v2600_v57 = vmax.f32 %v2130_v10, 0.0 }
 0x2f5   :  { %v2956_v39 = vmax.f32 %v2588_v22, %v2604_v53  ;;  %v2608_v21 = vmax.f32 %v2140_v1, 0.0  ;;  %2404 = vmatmul.mubr.bf16.gmra.mrb[16].mxu1 %v10279_v25  ;;  %v10280_v22 = vld [vmem:[#allocation29_spill] sm:$0xff]  ;;  %v2601_v53 = vmax.f32 %v2132_v52, 0.0  ;;  %4449 = vmatprep.subr.bf16.mxu0 %v6841_v17 }
 0x2f6   :  { %v2957_v27 = vmax.f32 %v2589_v49, %v2605_v31  ;;  %v2609_v9 = vmax.f32 %v2142_v41, 0.0  ;;  %6007 = vmatprep.mubr.msk.bf16.mxu1 %vm775_vm0, %v7110_v38  ;;  %v7111_v49 = vld [vmem:[%s10119_s0 + $0x158] sm:$0xff]  }
 0x2f7   :  { %v3138_v16 = vmax.f32 %v9115_v47, %v2956_v39  ;;  %v2960_v63 = vmax.f32 %v2592_v51, %v2608_v21 }
 0x2f8   :  { %v3139_v44 = vmax.f32 %v9123_v3, %v2957_v27  ;;  %v2961_v56 = vmax.f32 %v2593_v19, %v2609_v9  ;;  %v2145_v42 = vpop.f32.mrb[168].mxu1  ;;  %4450 = vmatpush1.bf16.msra.mxu0 %v6839_v62 }
 0x2f9   :  { %v3140_v8 = vmax.f32 %v9125_v46, %v2960_v63  ;;  %v2146_v18 = vadd.f32 %v2145_v42, %v9195_v23  ;;  %v2147_v14 = vpop.f32.mrb[169].mxu1  ;;  %v6844_v63 = vld [vmem:[#allocation4 + $0x164] ss:$8 sps:$4 sm:$0xff]  }
 0x2fa   :  { %v3141_v48 = vmax.f32 %v9127_v36, %v2961_v56  ;;  %v2148_v47 = vadd.f32 %v2147_v14, %v9200_v13  ;;  %v2149_v58 = vpop.f32.mrb[170].mxu1  ;;  %4451 = vmatprep.subr.bf16.mxu0 %v6844_v63  ;;  %v6850_v14 = vld [vmem:[#allocation4 + $0x184] ss:$8 sps:$4 sm:$0xff]  }
 0x2fb   :  { %v2612_v11 = vmax.f32 %v2146_v18, 0.0  ;;  %v2150_v3 = vadd.f32 %v2149_v58, %v9195_v23  ;;  %v2151_v33 = vpop.f32.mrb[171].mxu1  ;;  %v9372_v29 = vpack.c.bf16 %v3140_v8, %v3138_v16  ;;  %v7113_v8 = vld [vmem:[%s10119_s0 + $0x168] sm:$0xff]  }
 0x2fc   :  { %v2613_v32 = vmax.f32 %v2148_v47, 0.0  ;;  %v2152_v46 = vadd.f32 %v2151_v33, %v9200_v13  ;;  %v9375_v4 = vpack.c.bf16 %v3141_v48, %v3139_v44  ;;  %v6845_v44 = vld [vmem:[#allocation4 + $0x170] ss:$8 sps:$4 sm:$0xff]   ;;  %v6848_v18 = vld [vmem:[#allocation4 + $0x180] ss:$8 sps:$4 sm:$0xff]  }
 0x2fd   :  { %v2964_v36 = vmax.f32 %v2596_v54, %v2612_v11  ;;  %v2616_v40 = vmax.f32 %v2150_v3, 0.0  ;;  %2414 = vmatmul.mubr.bf16.gmra.mrb[20].mxu1 %v10280_v22 }
 0x2fe   :  { %v2965_v1 = vmax.f32 %v2597_v6, %v2613_v32  ;;  %v2617_v61 = vmax.f32 %v2152_v46, 0.0  ;;  %4298 = vmatprep.mubr.bf16.mxu0 %v9375_v4  ;;  %6008 = vmatprep.mubr.msk.bf16.mxu1 %vm775_vm0, %v7111_v49 }
 0x2ff   :  { %v3142_v31 = vmax.f32 %v9140_v37, %v2964_v36  ;;  %v2968_v41 = vmax.f32 %v2600_v57, %v2616_v40  ;;  %4299 = vmatmul.mubr.bf16.gmra.mrb[60].mxu0 %v9372_v29  ;;  %v6842_v37 = vld [vmem:[#allocation4 + $0x160] ss:$8 sps:$4 sm:$0xff]  }
 0x300   :  { %v3143_v51 = vmax.f32 %v9148_v24, %v2965_v1  ;;  %v2969_v39 = vmax.f32 %v2601_v53, %v2617_v61  ;;  %v2155_v21 = vpop.f32.mrb[172].mxu1  ;;  %v7112_v24 = vld [vmem:[%s10119_s0 + $0x160] sm:$0xff]   ;;  %4452 = vmatpush1.bf16.msra.mxu0 %v6842_v37 }
 0x301   :  { %v3144_v25 = vmax.f32 %v9154_v0, %v2968_v41  ;;  %v2157_v19 = vpop.f32.mrb[173].mxu1  ;;  %v6847_v0 = vld [vmem:[#allocation4 + $0x174] ss:$8 sps:$4 sm:$0xff]   ;;  %v2156_v52 = vadd.f32 %v2155_v21, %v9195_v23 }
 0x302   :  { %v3145_v27 = vmax.f32 %v9160_v55, %v2969_v39  ;;  %v2159_v9 = vpop.f32.mrb[174].mxu1  ;;  %4453 = vmatprep.subr.bf16.mxu0 %v6847_v0  ;;  %v2158_v48 = vadd.f32 %v2157_v19, %v9200_v13 }
 0x303   :  { %v2161_v38 = vpop.f32.mrb[175].mxu1  ;;  %v9388_v12 = vpack.c.bf16 %v3144_v25, %v3142_v31  ;;  %v2160_v58 = vadd.f32 %v2159_v9, %v9195_v23  ;;  %v2620_v6 = vmax.f32 %v2156_v52, 0.0  ;;  %v7114_v31 = vld [vmem:[%s10119_s0 + $0x170] sm:$0xff]  }
 0x304   :  { %v9390_v16 = vpack.c.bf16 %v3145_v27, %v3143_v51  ;;  %4454 = vmatpush1.bf16.msra.mxu0 %v6845_v44  ;;  %v2621_v17 = vmax.f32 %v2158_v48, 0.0 }
 0x305   :  { %2424 = vmatmul.mubr.bf16.gmra.mrb[24].mxu1 %v10281_v15  ;;  %4455 = vmatprep.subr.bf16.mxu0 %v6850_v14  ;;  %v2624_v40 = vmax.f32 %v2160_v58, 0.0  ;;  %v6851_v14 = vld [vmem:[#allocation4 + $0x190] ss:$8 sps:$4 sm:$0xff]  }
 0x306   :  { %4308 = vmatprep.mubr.bf16.mxu0 %v9390_v16  ;;  %6009 = vmatprep.mubr.msk.bf16.mxu1 %vm775_vm0, %v7112_v24 }
 0x307   :  { %4309 = vmatmul.mubr.bf16.gmra.mrb[64].mxu0 %v9388_v12 }
 0x308   :  { %v2165_v55 = vpop.f32.mrb[176].mxu1  ;;  %4456 = vmatpush1.bf16.msra.mxu0 %v6848_v18 }
 0x309   :  { %v2167_v56 = vpop.f32.mrb[177].mxu1  ;;  %v2166_v41 = vadd.f32 %v2165_v55, %v9195_v23 }
 0x30a   :  { %v2169_v42 = vpop.f32.mrb[178].mxu1  ;;  %v2168_v21 = vadd.f32 %v2167_v56, %v9200_v13 }
 0x30b   :  { %v2171_v10 = vpop.f32.mrb[179].mxu1  ;;  %v2170_v27 = vadd.f32 %v2169_v42, %v9195_v23  ;;  %v2628_v0 = vmax.f32 %v2166_v41, 0.0 }
 0x30c   :  { %v2172_v63 = vadd.f32 %v2171_v10, %v9200_v13  ;;  %v2629_v42 = vmax.f32 %v2168_v21, 0.0  ;;  %v6853_v10 = vld [vmem:[#allocation4 + $0x194] ss:$8 sps:$4 sm:$0xff]   ;;  %v7117_v21 = vld [vmem:[%s10119_s0 + $0x188] sm:$0xff]  }
 0x30d   :  { %2434 = vmatmul.mubr.bf16.gmra.mrb[28].mxu1 %v8407_v26  ;;  %v2162_v26 = vadd.f32 %v2161_v38, %v9200_v13  ;;  %v2632_v52 = vmax.f32 %v2170_v27, 0.0  ;;  %4457 = vmatprep.subr.bf16.mxu0 %v6853_v10 }
 0x30e   :  { %6010 = vmatprep.mubr.msk.bf16.mxu1 %vm775_vm0, %v7113_v8  ;;  %v2633_v58 = vmax.f32 %v2172_v63, 0.0  ;;  %4458 = vmatpush1.bf16.msra.mxu0 %v6851_v14 }
 0x30f   :  { %v2625_v1 = vmax.f32 %v2162_v26, 0.0  ;;  %v7115_v26 = vld [vmem:[%s10119_s0 + $0x178] sm:$0xff]  }
 0x310   :  { %v2175_v47 = vpop.f32.mrb[180].mxu1 }
 0x311   :  { %v2176_v54 = vadd.f32 %v2175_v47, %v9195_v23  ;;  %v2177_v11 = vpop.f32.mrb[181].mxu1  ;;  %v10282_v47 = vld [vmem:[#allocation34_spill] sm:$0xff] }
 0x312   :  { %v2178_v3 = vadd.f32 %v2177_v11, %v9200_v13  ;;  %v2179_v33 = vpop.f32.mrb[182].mxu1 }
 0x313   :  { %v2636_v32 = vmax.f32 %v2176_v54, 0.0  ;;  %v2180_v46 = vadd.f32 %v2179_v33, %v9195_v23  ;;  %v2181_v62 = vpop.f32.mrb[183].mxu1 }
 0x314   :  { %v2637_v57 = vmax.f32 %v2178_v3, 0.0  ;;  %v2182_v36 = vadd.f32 %v2181_v62, %v9200_v13 }
 0x315   :  { %v2972_v22 = vmax.f32 %v2620_v6, %v2636_v32  ;;  %v2640_v53 = vmax.f32 %v2180_v46, 0.0  ;;  %2444 = vmatmul.mubr.bf16.gmra.mrb[32].mxu1 %v8432_v5 }
 0x316   :  { %v2973_v61 = vmax.f32 %v2621_v17, %v2637_v57  ;;  %v2641_v49 = vmax.f32 %v2182_v36, 0.0  ;;  %6011 = vmatprep.mubr.msk.bf16.mxu1 %vm775_vm0, %v7114_v31 }
 0x317   :  { %v3146_v51 = vmax.f32 %v9245_v50, %v2972_v22  ;;  %v2976_v39 = vmax.f32 %v2624_v40, %v2640_v53 }
 0x318   :  { %v3147_v25 = vmax.f32 %v9248_v60, %v2973_v61  ;;  %v2977_v19 = vmax.f32 %v2625_v1, %v2641_v49  ;;  %v2185_v5 = vpop.f32.mrb[184].mxu1  ;;  %v6856_v1 = vld [vmem:[#allocation4 + $0x1a4] ss:$8 sps:$4 sm:$0xff]   ;;  %v10283_v61 = vld [vmem:[#allocation36_spill] sm:$0xff]  ;;  %v6857_v49 = vld [vmem:[#allocation4 + $0x1b0] ss:$8 sps:$4 sm:$0xff]  }
 0x319   :  { %v3148_v9 = vmax.f32 %v9257_v34, %v2976_v39  ;;  %v2186_v38 = vadd.f32 %v2185_v5, %v9195_v23  ;;  %v2187_v37 = vpop.f32.mrb[185].mxu1  ;;  %4459 = vmatprep.subr.bf16.mxu0 %v6856_v1  ;;  %v10284_v39 = vld [vmem:[#allocation38_spill] sm:$0xff] }
 0x31a   :  { %v3149_v15 = vmax.f32 %v9262_v30, %v2977_v19  ;;  %v2188_v50 = vadd.f32 %v2187_v37, %v9200_v13  ;;  %v2189_v24 = vpop.f32.mrb[186].mxu1  ;;  %v6862_v19 = vld [vmem:[#allocation4 + $0x1c4] ss:$8 sps:$4 sm:$0xff]  }
 0x31b   :  { %v2644_v55 = vmax.f32 %v2186_v38, 0.0  ;;  %v2190_v60 = vadd.f32 %v2189_v24, %v9195_v23  ;;  %v2191_v44 = vpop.f32.mrb[187].mxu1  ;;  %v9428_v56 = vpack.c.bf16 %v3148_v9, %v3146_v51 }
 0x31c   :  { %v2645_v8 = vmax.f32 %v2188_v50, 0.0  ;;  %v2192_v34 = vadd.f32 %v2191_v44, %v9200_v13  ;;  %v9431_v18 = vpack.c.bf16 %v3149_v15, %v3147_v25  ;;  %v6860_v25 = vld [vmem:[#allocation4 + $0x1c0] ss:$8 sps:$4 sm:$0xff]  }
 0x31d   :  { %v2980_v30 = vmax.f32 %v2628_v0, %v2644_v55  ;;  %v2648_v48 = vmax.f32 %v2190_v60, 0.0  ;;  %2454 = vmatmul.mubr.bf16.gmra.mrb[36].mxu1 %v10282_v47 }
 0x31e   :  { %v2981_v54 = vmax.f32 %v2629_v42, %v2645_v8  ;;  %v2649_v11 = vmax.f32 %v2192_v34, 0.0  ;;  %4318 = vmatprep.mubr.bf16.mxu0 %v9431_v18  ;;  %6012 = vmatprep.mubr.msk.bf16.mxu1 %vm775_vm0, %v7115_v26 }
 0x31f   :  { %v3150_v3 = vmax.f32 %v9284_v7, %v2980_v30  ;;  %v2984_v33 = vmax.f32 %v2632_v52, %v2648_v48  ;;  %4319 = vmatmul.mubr.bf16.gmra.mrb[68].mxu0 %v9428_v56  ;;  %v6854_v7 = vld [vmem:[#allocation4 + $0x1a0] ss:$8 sps:$4 sm:$0xff]   ;;  %v10285_v30 = vld [vmem:[#allocation39_spill] sm:$0xff] }
 0x320   :  { %v3151_v6 = vmax.f32 %v9287_v28, %v2981_v54  ;;  %v2985_v32 = vmax.f32 %v2633_v58, %v2649_v11  ;;  %v2195_v46 = vpop.f32.mrb[188].mxu1  ;;  %v7116_v28 = vld [vmem:[%s10119_s0 + $0x180] sm:$0xff]   ;;  %4460 = vmatpush1.bf16.msra.mxu0 %v6854_v7  ;;  %v7118_v54 = vld [vmem:[%s10119_s0 + $0x190] sm:$0xff]  }
 0x321   :  { %v3152_v62 = vmax.f32 %v9295_v59, %v2984_v33  ;;  %v2197_v17 = vpop.f32.mrb[189].mxu1  ;;  %v6859_v59 = vld [vmem:[#allocation4 + $0x1b4] ss:$8 sps:$4 sm:$0xff]   ;;  %v2196_v5 = vadd.f32 %v2195_v46, %v9195_v23 }
 0x322   :  { %v3153_v57 = vmax.f32 %v9299_v43, %v2985_v32  ;;  %v2199_v36 = vpop.f32.mrb[190].mxu1  ;;  %4461 = vmatprep.subr.bf16.mxu0 %v6859_v59  ;;  %v2198_v27 = vadd.f32 %v2197_v17, %v9200_v13 }
 0x323   :  { %v2201_v40 = vpop.f32.mrb[191].mxu1  ;;  %v9444_v22 = vpack.c.bf16 %v3152_v62, %v3150_v3  ;;  %v2200_v38 = vadd.f32 %v2199_v36, %v9195_v23  ;;  %v2652_v0 = vmax.f32 %v2196_v5, 0.0 }
 0x324   :  { %v9446_v53 = vpack.c.bf16 %v3153_v57, %v3151_v6  ;;  %4462 = vmatpush1.bf16.msra.mxu0 %v6857_v49  ;;  %v2202_v15 = vadd.f32 %v2201_v40, %v9200_v13  ;;  %v2653_v42 = vmax.f32 %v2198_v27, 0.0 }
 0x325   :  { %2464 = vmatmul.mubr.bf16.gmra.mrb[40].mxu1 %v10283_v61  ;;  %4463 = vmatprep.subr.bf16.mxu0 %v6862_v19  ;;  %v2656_v14 = vmax.f32 %v2200_v38, 0.0  ;;  %v10286_v19 = vld [vmem:[#allocation40_spill] sm:$0xff]  ;;  %v7119_v38 = vld [vmem:[%s10119_s0 + $0x198] sm:$0xff]  }
 0x326   :  { %4328 = vmatprep.mubr.bf16.mxu0 %v9446_v53  ;;  %6013 = vmatprep.mubr.msk.bf16.mxu1 %vm775_vm0, %v7116_v28  ;;  %v2657_v48 = vmax.f32 %v2202_v15, 0.0 }
 0x327   :  { %4329 = vmatmul.mubr.bf16.gmra.mrb[72].mxu0 %v9444_v22 }
 0x328   :  { %v2205_v43 = vpop.f32.mrb[192].mxu1  ;;  %4464 = vmatpush1.bf16.msra.mxu0 %v6860_v25 }
 0x329   :  { %v2207_v31 = vpop.f32.mrb[193].mxu1  ;;  %v2206_v11 = vadd.f32 %v2205_v43, %v9195_v23 }
 0x32a   :  { %v2209_v41 = vpop.f32.mrb[194].mxu1  ;;  %v2208_v33 = vadd.f32 %v2207_v31, %v9200_v13 }
 0x32b   :  { %v2211_v51 = vpop.f32.mrb[195].mxu1  ;;  %v2210_v62 = vadd.f32 %v2209_v41, %v9195_v23  ;;  %v2660_v61 = vmax.f32 %v2206_v11, 0.0  ;;  %v6871_v11 = vld [vmem:[#allocation4 + $0x1f4] ss:$8 sps:$4 sm:$0xff]  }
 0x32c   :  { %v2212_v40 = vadd.f32 %v2211_v51, %v9200_v13  ;;  %v2661_v49 = vmax.f32 %v2208_v33, 0.0  ;;  %v6865_v51 = vld [vmem:[#allocation4 + $0x1d4] ss:$8 sps:$4 sm:$0xff]  }
 0x32d   :  { %2474 = vmatmul.mubr.bf16.gmra.mrb[44].mxu1 %v10284_v39  ;;  %v6863_v39 = vld [vmem:[#allocation4 + $0x1d0] ss:$8 sps:$4 sm:$0xff]   ;;  %4465 = vmatprep.subr.bf16.mxu0 %v6865_v51 }
 0x32e   :  { %6014 = vmatprep.mubr.msk.bf16.mxu1 %vm775_vm0, %v7117_v21  ;;  %v2664_v21 = vmax.f32 %v2210_v62, 0.0  ;;  %v2665_v5 = vmax.f32 %v2212_v40, 0.0  ;;  %4466 = vmatpush1.bf16.msra.mxu0 %v6863_v39  ;;  %v7121_v62 = vld [vmem:[%s10119_s0 + $0x1a8] sm:$0xff]  }
 0x330   :  { %v2215_v9 = vpop.f32.mrb[196].mxu1 }
 0x331   :  { %v2216_v37 = vadd.f32 %v2215_v9, %v9195_v23  ;;  %v2217_v63 = vpop.f32.mrb[197].mxu1 }
 0x332   :  { %v2218_v50 = vadd.f32 %v2217_v63, %v9200_v13  ;;  %v2219_v24 = vpop.f32.mrb[198].mxu1 }
 0x333   :  { %v2668_v55 = vmax.f32 %v2216_v37, 0.0  ;;  %v2220_v60 = vadd.f32 %v2219_v24, %v9195_v23  ;;  %v2221_v44 = vpop.f32.mrb[199].mxu1  ;;  %v10287_v37 = vld [vmem:[#allocation41_spill] sm:$0xff] }
 0x334   :  { %v2669_v8 = vmax.f32 %v2218_v50, 0.0  ;;  %v2222_v34 = vadd.f32 %v2221_v44, %v9200_v13  ;;  %v10288_v50 = vld [vmem:[#allocation42_spill] sm:$0xff] }
 0x335   :  { %v2988_v10 = vmax.f32 %v2652_v0, %v2668_v55  ;;  %v2672_v52 = vmax.f32 %v2220_v60, 0.0  ;;  %2484 = vmatmul.mubr.bf16.gmra.mrb[48].mxu1 %v10285_v30  ;;  %v10289_v60 = vld [vmem:[#allocation43_spill] sm:$0xff] }
 0x336   :  { %v2989_v47 = vmax.f32 %v2653_v42, %v2669_v8  ;;  %v2673_v58 = vmax.f32 %v2222_v34, 0.0  ;;  %6015 = vmatprep.mubr.msk.bf16.mxu1 %vm775_vm0, %v7118_v54  ;;  %v10290_v8 = vld [vmem:[#allocation44_spill] sm:$0xff] }
 0x337   :  { %v3154_v26 = vmax.f32 %v9314_v35, %v2988_v10  ;;  %v2992_v3 = vmax.f32 %v2656_v14, %v2672_v52  ;;  %v7120_v54 = vld [vmem:[%s10119_s0 + $0x1a0] sm:$0xff]  }
 0x338   :  { %v3155_v6 = vmax.f32 %v9320_v45, %v2989_v47  ;;  %v2993_v32 = vmax.f32 %v2657_v48, %v2673_v58  ;;  %v2225_v46 = vpop.f32.mrb[200].mxu1  ;;  %v6866_v48 = vld [vmem:[#allocation4 + $0x1e0] ss:$8 sps:$4 sm:$0xff]   ;;  %v6868_v47 = vld [vmem:[#allocation4 + $0x1e4] ss:$8 sps:$4 sm:$0xff]  }
 0x339   :  { %v3156_v17 = vmax.f32 %v9329_v2, %v2992_v3  ;;  %v2226_v57 = vadd.f32 %v2225_v46, %v9195_v23  ;;  %v2227_v36 = vpop.f32.mrb[201].mxu1  ;;  %v10291_v58 = vld [vmem:[#allocation45_spill] sm:$0xff]  ;;  %4467 = vmatprep.subr.bf16.mxu0 %v6868_v47  ;;  %v6869_v3 = vld [vmem:[#allocation4 + $0x1f0] ss:$8 sps:$4 sm:$0xff]  }
 0x33a   :  { %v3157_v7 = vmax.f32 %v9334_v20, %v2993_v32  ;;  %v2228_v35 = vadd.f32 %v2227_v36, %v9200_v13  ;;  %v2229_v1 = vpop.f32.mrb[202].mxu1  ;;  %4468 = vmatpush1.bf16.msra.mxu0 %v6866_v48  ;;  %v10292_v46 = vld [vmem:[#allocation31_spill] sm:$0xff] }
 0x33b   :  { %v9483_v28 = vpack.c.bf16 %v3156_v17, %v3154_v26  ;;  %v2676_v45 = vmax.f32 %v2226_v57, 0.0  ;;  %v2230_v59 = vadd.f32 %v2229_v1, %v9195_v23  ;;  %v2231_v43 = vpop.f32.mrb[203].mxu1  ;;  %4469 = vmatprep.subr.bf16.mxu0 %v6871_v11  ;;  %v6874_v17 = vld [vmem:[#allocation4 + $0x204] ss:$8 sps:$4 sm:$0xff]  }
 0x33c   :  { %v9486_v31 = vpack.c.bf16 %v3157_v7, %v3155_v6  ;;  %v2677_v2 = vmax.f32 %v2228_v35, 0.0  ;;  %v2232_v41 = vadd.f32 %v2231_v43, %v9200_v13 }
 0x33d   :  { %v2996_v20 = vmax.f32 %v2660_v61, %v2676_v45  ;;  %v2680_v25 = vmax.f32 %v2230_v59, 0.0  ;;  %2494 = vmatmul.mubr.bf16.gmra.mrb[52].mxu1 %v10286_v19 }
 0x33e   :  { %v2997_v27 = vmax.f32 %v2661_v49, %v2677_v2  ;;  %v2681_v9 = vmax.f32 %v2232_v41, 0.0  ;;  %4338 = vmatprep.mubr.bf16.mxu0 %v9486_v31  ;;  %6016 = vmatprep.mubr.msk.bf16.mxu1 %vm775_vm0, %v7119_v38 }
 0x33f   :  { %v3158_v63 = vmax.f32 %v10287_v37, %v2996_v20  ;;  %v3000_v15 = vmax.f32 %v2664_v21, %v2680_v25  ;;  %4339 = vmatmul.mubr.bf16.gmra.mrb[76].mxu0 %v9483_v28  ;;  %v7122_v37 = vld [vmem:[%s10119_s0 + $0x1b0] sm:$0xff]  }
 0x340   :  { %v3159_v24 = vmax.f32 %v10288_v50, %v2997_v27  ;;  %v3001_v0 = vmax.f32 %v2665_v5, %v2681_v9  ;;  %v2235_v55 = vpop.f32.mrb[204].mxu1  ;;  %4470 = vmatpush1.bf16.msra.mxu0 %v6869_v3  ;;  %v10293_v5 = vld [vmem:[#allocation32_spill] sm:$0xff] }
 0x341   :  { %v3160_v44 = vmax.f32 %v10289_v60, %v3000_v15  ;;  %v2237_v42 = vpop.f32.mrb[205].mxu1  ;;  %v2236_v57 = vadd.f32 %v2235_v55, %v9195_v23  ;;  %4632 = vmatprep.subr.bf16.mxu0 %v6874_v17  ;;  %v10294_v15 = vld [vmem:[#allocation46_spill] sm:$0xff]  ;;  %v10295_v55 = vld [vmem:[#allocation47_spill] sm:$0xff] }
 0x342   :  { %v3161_v34 = vmax.f32 %v10290_v8, %v3001_v0  ;;  %v2239_v14 = vpop.f32.mrb[206].mxu1  ;;  %v2238_v36 = vadd.f32 %v2237_v42, %v9200_v13 }
 0x343   :  { %v9500_v10 = vpack.c.bf16 %v3160_v44, %v3158_v63  ;;  %v2241_v52 = vpop.f32.mrb[207].mxu1  ;;  %v2240_v7 = vadd.f32 %v2239_v14, %v9195_v23  ;;  %v2684_v43 = vmax.f32 %v2236_v57, 0.0 }
 0x344   :  { %v9502_v30 = vpack.c.bf16 %v3161_v34, %v3159_v24  ;;  %v2242_v61 = vadd.f32 %v2241_v52, %v9200_v13  ;;  %v2685_v39 = vmax.f32 %v2238_v36, 0.0  ;;  %v10296_v34 = vld [vmem:[#allocation48_spill] sm:$0xff] }
 0x345   :  { %2504 = vmatmul.mubr.bf16.gmra.mrb[56].mxu1 %v10291_v58  ;;  %v2688_v20 = vmax.f32 %v2240_v7, 0.0  ;;  %v10297_v58 = vld [vmem:[#allocation49_spill] sm:$0xff] }
 0x346   :  { %4348 = vmatprep.mubr.bf16.mxu0 %v9502_v30  ;;  %6017 = vmatprep.mubr.msk.bf16.mxu1 %vm775_vm0, %v7120_v54  ;;  %v2689_v27 = vmax.f32 %v2242_v61, 0.0 }
 0x347   :  { %4349 = vmatmul.mubr.bf16.gmra.mrb[80].mxu0 %v9500_v10 }
 0x348   :  { %v2245_v26 = vpop.f32.mrb[208].mxu1 }
 0x349   :  { %v2247_v33 = vpop.f32.mrb[209].mxu1  ;;  %v2246_v63 = vadd.f32 %v2245_v26, %v9195_v23 }
 0x34a   :  { %v2249_v6 = vpop.f32.mrb[210].mxu1  ;;  %v2248_v0 = vadd.f32 %v2247_v33, %v9200_v13 }
 0x34b   :  { %v2251_v32 = vpop.f32.mrb[211].mxu1  ;;  %v2250_v8 = vadd.f32 %v2249_v6, %v9195_v23  ;;  %v2692_v3 = vmax.f32 %v2246_v63, 0.0 }
 0x34c   :  { %v2252_v47 = vadd.f32 %v2251_v32, %v9200_v13  ;;  %v2693_v6 = vmax.f32 %v2248_v0, 0.0 }
 0x34d   :  { %2514 = vmatmul.mubr.bf16.gmra.mrb[60].mxu1 %v10292_v46  ;;  %v2696_v7 = vmax.f32 %v2250_v8, 0.0 }
 0x34e   :  { %6018 = vmatprep.mubr.msk.bf16.mxu1 %vm775_vm0, %v7121_v62  ;;  %v2697_v61 = vmax.f32 %v2252_v47, 0.0 }
 0x350   :  { %v2255_v40 = vpop.f32.mrb[212].mxu1 }
 0x351   :  { %v2256_v35 = vadd.f32 %v2255_v40, %v9195_v23  ;;  %v2257_v1 = vpop.f32.mrb[213].mxu1 }
 0x352   :  { %v2258_v45 = vadd.f32 %v2257_v1, %v9200_v13  ;;  %v2259_v59 = vpop.f32.mrb[214].mxu1  ;;  %v10298_v1 = vld [vmem:[#allocation33_spill] sm:$0xff] }
 0x353   :  { %v2700_v49 = vmax.f32 %v2256_v35, 0.0  ;;  %v2260_v2 = vadd.f32 %v2259_v59, %v9195_v23  ;;  %v2261_v41 = vpop.f32.mrb[215].mxu1 }
 0x354   :  { %v2701_v51 = vmax.f32 %v2258_v45, 0.0  ;;  %v2262_v21 = vadd.f32 %v2261_v41, %v9200_v13 }
 0x355   :  { %v3004_v25 = vmax.f32 %v2684_v43, %v2700_v49  ;;  %v2704_v19 = vmax.f32 %v2260_v2, 0.0  ;;  %2524 = vmatmul.mubr.bf16.gmra.mrb[64].mxu1 %v10293_v5  ;;  %v7123_v43 = vld [vmem:[%s10119_s0 + $0x1b8] sm:$0xff]   ;;  %v10299_v49 = vld [vmem:[#allocation50_spill] sm:$0xff] }
 0x356   :  { %v3005_v9 = vmax.f32 %v2685_v39, %v2701_v51  ;;  %v2705_v38 = vmax.f32 %v2262_v21, 0.0  ;;  %6019 = vmatprep.mubr.msk.bf16.mxu1 %vm775_vm0, %v7122_v37  ;;  %v10300_v39 = vld [vmem:[#allocation51_spill] sm:$0xff] }
 0x357   :  { %v3162_v50 = vmax.f32 %v10294_v15, %v3004_v25  ;;  %v3008_v24 = vmax.f32 %v2688_v20, %v2704_v19  ;;  %v10301_v25 = vld [vmem:[#allocation52_spill] sm:$0xff] }
 0x358   :  { %v3163_v60 = vmax.f32 %v10295_v55, %v3005_v9  ;;  %v3009_v44 = vmax.f32 %v2689_v27, %v2705_v38  ;;  %v2265_v42 = vpop.f32.mrb[216].mxu1  ;;  %v10302_v27 = vld [vmem:[#allocation53_spill] sm:$0xff] }
 0x359   :  { %v3164_v14 = vmax.f32 %v10296_v34, %v3008_v24  ;;  %v2266_v52 = vadd.f32 %v2265_v42, %v9195_v23  ;;  %v2267_v48 = vpop.f32.mrb[217].mxu1 }
 0x35a   :  { %v3165_v54 = vmax.f32 %v10297_v58, %v3009_v44  ;;  %v2268_v11 = vadd.f32 %v2267_v48, %v9200_v13  ;;  %v2269_v26 = vpop.f32.mrb[218].mxu1 }
 0x35b   :  { %v9539_v33 = vpack.c.bf16 %v3164_v14, %v3162_v50  ;;  %v2708_v46 = vmax.f32 %v2266_v52, 0.0  ;;  %v2270_v62 = vadd.f32 %v2269_v26, %v9195_v23  ;;  %v2271_v17 = vpop.f32.mrb[219].mxu1  ;;  %v10303_v50 = vld [vmem:[#allocation35_spill] sm:$0xff] }
 0x35c   :  { %v9542_v57 = vpack.c.bf16 %v3165_v54, %v3163_v60  ;;  %v2709_v36 = vmax.f32 %v2268_v11, 0.0  ;;  %v2272_v40 = vadd.f32 %v2271_v17, %v9200_v13 }
 0x35d   :  { %v3012_v32 = vmax.f32 %v2692_v3, %v2708_v46  ;;  %v2712_v35 = vmax.f32 %v2270_v62, 0.0  ;;  %2534 = vmatmul.mubr.bf16.gmra.mrb[68].mxu1 %v10298_v1 }
 0x35e   :  { %v3013_v45 = vmax.f32 %v2693_v6, %v2709_v36  ;;  %v2713_v59 = vmax.f32 %v2272_v40, 0.0  ;;  %4358 = vmatprep.mubr.bf16.mxu0 %v9542_v57  ;;  %6020 = vmatprep.mubr.msk.bf16.mxu1 %vm775_vm0, %v7123_v43 }
 0x35f   :  { %v3166_v2 = vmax.f32 %v10299_v49, %v3012_v32  ;;  %v3016_v41 = vmax.f32 %v2696_v7, %v2712_v35  ;;  %4359 = vmatmul.mubr.bf16.gmra.mrb[84].mxu0 %v9539_v33  ;;  %v10305_v49 = vld [vmem:[#allocation55_spill] sm:$0xff] }
 0x360   :  { %v3167_v51 = vmax.f32 %v10300_v39, %v3013_v45  ;;  %v3017_v21 = vmax.f32 %v2697_v61, %v2713_v59  ;;  %v2275_v20 = vpop.f32.mrb[220].mxu1  ;;  %v10304_v61 = vld [vmem:[#allocation54_spill] sm:$0xff] }
 0x361   :  { %v3168_v19 = vmax.f32 %v10301_v25, %v3016_v41  ;;  %v2277_v5 = vpop.f32.mrb[221].mxu1  ;;  %v2276_v44 = vadd.f32 %v2275_v20, %v9195_v23 }
 0x362   :  { %v3169_v9 = vmax.f32 %v10302_v27, %v3017_v21  ;;  %v2279_v38 = vpop.f32.mrb[222].mxu1  ;;  %v2278_v42 = vadd.f32 %v2277_v5, %v9200_v13  ;;  %v10306_v21 = vld [vmem:[#allocation56_spill] sm:$0xff]  ;;  %v10307_v27 = vld [vmem:[#allocation57_spill] sm:$0xff] }
 0x363   :  { %v9556_v37 = vpack.c.bf16 %v3168_v19, %v3166_v2  ;;  %v2281_v63 = vpop.f32.mrb[223].mxu1  ;;  %v2280_v34 = vadd.f32 %v2279_v38, %v9195_v23  ;;  %v2716_v54 = vmax.f32 %v2276_v44, 0.0 }
 0x364   :  { %v9558_v15 = vpack.c.bf16 %v3169_v9, %v3167_v51  ;;  %v2282_v48 = vadd.f32 %v2281_v63, %v9200_v13  ;;  %v2717_v46 = vmax.f32 %v2278_v42, 0.0 }
 0x365   :  { %2544 = vmatmul.mubr.bf16.gmra.mrb[72].mxu1 %v10303_v50  ;;  %v2720_v6 = vmax.f32 %v2280_v34, 0.0 }
 0x366   :  { %4368 = vmatprep.mubr.bf16.mxu0 %v9558_v15  ;;  %v2721_v7 = vmax.f32 %v2282_v48, 0.0 }
 0x367   :  { %4369 = vmatmul.mubr.bf16.gmra.mrb[88].mxu0 %v9556_v37 }
 0x368   :  { %v2285_v24 = vpop.f32.mrb[224].mxu1 }
 0x369   :  { %v2287_v0 = vpop.f32.mrb[225].mxu1  ;;  %v2286_v1 = vadd.f32 %v2285_v24, %v9195_v23 }
 0x36a   :  { %v2289_v55 = vpop.f32.mrb[226].mxu1  ;;  %v2288_v43 = vadd.f32 %v2287_v0, %v9200_v13 }
 0x36b   :  { %v2291_v60 = vpop.f32.mrb[227].mxu1  ;;  %v2290_v51 = vadd.f32 %v2289_v55, %v9195_v23  ;;  %v2724_v50 = vmax.f32 %v2286_v1, 0.0 }
 0x36c   :  { %v2292_v5 = vadd.f32 %v2291_v60, %v9200_v13  ;;  %v2725_v55 = vmax.f32 %v2288_v43, 0.0 }
 0x370   :  { %v2295_v8 = vpop.f32.mrb[228].mxu1 }
 0x371   :  { %v2296_v14 = vadd.f32 %v2295_v8, %v9195_v23  ;;  %v2297_v52 = vpop.f32.mrb[229].mxu1 }
 0x372   :  { %v2298_v47 = vadd.f32 %v2297_v52, %v9200_v13  ;;  %v2299_v58 = vpop.f32.mrb[230].mxu1  ;;  %v2728_v52 = vmax.f32 %v2290_v51, 0.0 }
 0x373   :  { %v2732_v11 = vmax.f32 %v2296_v14, 0.0  ;;  %v2300_v26 = vadd.f32 %v2299_v58, %v9195_v23  ;;  %v2301_v3 = vpop.f32.mrb[231].mxu1 }
 0x374   :  { %v2733_v62 = vmax.f32 %v2298_v47, 0.0  ;;  %v2302_v17 = vadd.f32 %v2301_v3, %v9200_v13  ;;  %v2729_v47 = vmax.f32 %v2292_v5, 0.0 }
 0x375   :  { %v3020_v36 = vmax.f32 %v2716_v54, %v2732_v11  ;;  %v2736_v40 = vmax.f32 %v2300_v26, 0.0  ;;  %v10308_v11 = vld [vmem:[#allocation58_spill] sm:$0xff] }
 0x376   :  { %v3021_v32 = vmax.f32 %v2717_v46, %v2733_v62  ;;  %v2737_v35 = vmax.f32 %v2302_v17, 0.0  ;;  %v10309_v46 = vld [vmem:[#allocation59_spill] sm:$0xff] }
 0x377   :  { %v3170_v45 = vmax.f32 %v10304_v61, %v3020_v36  ;;  %v3024_v59 = vmax.f32 %v2720_v6, %v2736_v40  ;;  %v10310_v36 = vld [vmem:[#allocation60_spill] sm:$0xff] }
 0x378   :  { %v3171_v2 = vmax.f32 %v10305_v49, %v3021_v32  ;;  %v3025_v41 = vmax.f32 %v2721_v7, %v2737_v35  ;;  %v2305_v39 = vpop.f32.mrb[232].mxu1  ;;  %v10311_v32 = vld [vmem:[#allocation61_spill] sm:$0xff] }
 0x379   :  { %v3172_v20 = vmax.f32 %v10306_v21, %v3024_v59  ;;  %v2306_v25 = vadd.f32 %v2305_v39, %v9195_v23  ;;  %v2307_v19 = vpop.f32.mrb[233].mxu1 }
 0x37a   :  { %v3173_v9 = vmax.f32 %v10307_v27, %v3025_v41  ;;  %v2308_v38 = vadd.f32 %v2307_v19, %v9200_v13  ;;  %v2309_v63 = vpop.f32.mrb[234].mxu1 }
 0x37b   :  { %v9581_v24 = vpack.c.bf16 %v3172_v20, %v3170_v45  ;;  %v2740_v0 = vmax.f32 %v2306_v25, 0.0  ;;  %v2310_v44 = vadd.f32 %v2309_v63, %v9195_v23  ;;  %v2311_v42 = vpop.f32.mrb[235].mxu1 }
 0x37c   :  { %v9584_v8 = vpack.c.bf16 %v3173_v9, %v3171_v2  ;;  %v2741_v34 = vmax.f32 %v2308_v38, 0.0  ;;  %v2312_v14 = vadd.f32 %v2311_v42, %v9200_v13 }
 0x37d   :  { %v3028_v60 = vmax.f32 %v2724_v50, %v2740_v0  ;;  %v2744_v48 = vmax.f32 %v2310_v44, 0.0 }
 0x37e   :  { %v3029_v58 = vmax.f32 %v2725_v55, %v2741_v34  ;;  %v2745_v54 = vmax.f32 %v2312_v14, 0.0  ;;  %4378 = vmatprep.mubr.bf16.mxu0 %v9584_v8 }
 0x37f   :  { %v3174_v26 = vmax.f32 %v10308_v11, %v3028_v60  ;;  %v3032_v3 = vmax.f32 %v2728_v52, %v2744_v48  ;;  %4379 = vmatmul.mubr.bf16.gmra.mrb[92].mxu0 %v9581_v24 }
 0x380   :  { %v3175_v62 = vmax.f32 %v10309_v46, %v3029_v58  ;;  %v3033_v17 = vmax.f32 %v2729_v47, %v2745_v54  ;;  %v2315_v6 = vpop.f32.mrb[236].mxu1  ;;  %v10312_v54 = vld [vmem:[#allocation62_spill] sm:$0xff]  ;;  %v10313_v46 = vld [vmem:[#allocation63_spill] sm:$0xff] }
 0x381   :  { %v3176_v40 = vmax.f32 %v10310_v36, %v3032_v3  ;;  %v2317_v7 = vpop.f32.mrb[237].mxu1  ;;  %v2316_v39 = vadd.f32 %v2315_v6, %v9195_v23 }
 0x382   :  { %v3177_v35 = vmax.f32 %v10311_v32, %v3033_v17  ;;  %v2319_v1 = vpop.f32.mrb[238].mxu1  ;;  %v2318_v51 = vadd.f32 %v2317_v7, %v9200_v13 }
 0x383   :  { %v9593_v61 = vpack.c.bf16 %v3176_v40, %v3174_v26  ;;  %v2321_v45 = vpop.f32.mrb[239].mxu1  ;;  %v2320_v20 = vadd.f32 %v2319_v1, %v9195_v23  ;;  %v2748_v38 = vmax.f32 %v2316_v39, 0.0  ;;  %v10314_v40 = vld [vmem:[#allocation64_spill] sm:$0xff] }
 0x384   :  { %v9595_v59 = vpack.c.bf16 %v3177_v35, %v3175_v62  ;;  %v2322_v5 = vadd.f32 %v2321_v45, %v9200_v13  ;;  %v2749_v44 = vmax.f32 %v2318_v51, 0.0  ;;  %v10315_v45 = vld [vmem:[#allocation65_spill] sm:$0xff] }
 0x385   :  { %v2752_v34 = vmax.f32 %v2320_v20, 0.0 }
 0x386   :  { %4388 = vmatprep.mubr.bf16.mxu0 %v9595_v59  ;;  %v2753_v60 = vmax.f32 %v2322_v5, 0.0 }
 0x387   :  { %4389 = vmatmul.mubr.bf16.gmra.mrb[96].mxu0 %v9593_v61 }
 0x388   :  { %v2325_v43 = vpop.f32.mrb[240].mxu1 }
 0x389   :  { %v2327_v49 = vpop.f32.mrb[241].mxu1  ;;  %v2326_v58 = vadd.f32 %v2325_v43, %v9195_v23 }
 0x38a   :  { %v2329_v2 = vpop.f32.mrb[242].mxu1  ;;  %v2328_v3 = vadd.f32 %v2327_v49, %v9200_v13 }
 0x38b   :  { %v2331_v41 = vpop.f32.mrb[243].mxu1  ;;  %v2330_v36 = vadd.f32 %v2329_v2, %v9195_v23 }
 0x38c   :  { %v2332_v1 = vadd.f32 %v2331_v41, %v9200_v13  ;;  %v2757_v2 = vmax.f32 %v2328_v3, 0.0 }
 0x390   :  { %v2335_v21 = vpop.f32.mrb[244].mxu1 }
 0x391   :  { %v2336_v25 = vadd.f32 %v2335_v21, %v9195_v23  ;;  %v2337_v19 = vpop.f32.mrb[245].mxu1  ;;  %v2756_v21 = vmax.f32 %v2326_v58, 0.0 }
 0x392   :  { %v2338_v27 = vadd.f32 %v2337_v19, %v9200_v13  ;;  %v2339_v9 = vpop.f32.mrb[246].mxu1 }
 0x393   :  { %v2764_v63 = vmax.f32 %v2336_v25, 0.0  ;;  %v2340_v50 = vadd.f32 %v2339_v9, %v9195_v23  ;;  %v2341_v0 = vpop.f32.mrb[247].mxu1 }
 0x394   :  { %v2765_v42 = vmax.f32 %v2338_v27, 0.0  ;;  %v2342_v55 = vadd.f32 %v2341_v0, %v9200_v13 }
 0x395   :  { %v3036_v14 = vmax.f32 %v2748_v38, %v2764_v63  ;;  %v2768_v52 = vmax.f32 %v2340_v50, 0.0  ;;  %v2760_v38 = vmax.f32 %v2330_v36, 0.0  ;;  %v2761_v50 = vmax.f32 %v2332_v1, 0.0 }
 0x396   :  { %v3037_v48 = vmax.f32 %v2749_v44, %v2765_v42  ;;  %v2769_v47 = vmax.f32 %v2342_v55, 0.0  ;;  %v10316_v42 = vld [vmem:[#allocation66_spill] sm:$0xff] }
 0x397   :  { %v3178_v11 = vmax.f32 %v10312_v54, %v3036_v14  ;;  %v3040_v26 = vmax.f32 %v2752_v34, %v2768_v52  ;;  %v10317_v14 = vld [vmem:[#allocation67_spill] sm:$0xff] }
 0x398   :  { %v3179_v62 = vmax.f32 %v10313_v46, %v3037_v48  ;;  %v3041_v17 = vmax.f32 %v2753_v60, %v2769_v47  ;;  %v2345_v6 = vpop.f32.mrb[248].mxu1  ;;  %v10318_v47 = vld [vmem:[#allocation68_spill] sm:$0xff] }
 0x399   :  { %v3180_v7 = vmax.f32 %v10314_v40, %v3040_v26  ;;  %v2346_v32 = vadd.f32 %v2345_v6, %v9195_v23  ;;  %v2347_v35 = vpop.f32.mrb[249].mxu1 }
 0x39a   :  { %v3181_v43 = vmax.f32 %v10315_v45, %v3041_v17  ;;  %v2348_v39 = vadd.f32 %v2347_v35, %v9200_v13  ;;  %v2349_v51 = vpop.f32.mrb[250].mxu1 }
 0x39b   :  { %v9617_v49 = vpack.c.bf16 %v3180_v7, %v3178_v11  ;;  %v2772_v20 = vmax.f32 %v2346_v32, 0.0  ;;  %v2350_v25 = vadd.f32 %v2349_v51, %v9195_v23  ;;  %v2351_v19 = vpop.f32.mrb[251].mxu1  ;;  %v10319_v11 = vld [vmem:[#allocation69_spill] sm:$0xff] }
 0x39c   :  { %v9620_v5 = vpack.c.bf16 %v3181_v43, %v3179_v62  ;;  %v2773_v27 = vmax.f32 %v2348_v39, 0.0  ;;  %v2352_v9 = vadd.f32 %v2351_v19, %v9200_v13 }
 0x39d   :  { %v3044_v41 = vmax.f32 %v2756_v21, %v2772_v20  ;;  %v2776_v63 = vmax.f32 %v2350_v25, 0.0 }
 0x39e   :  { %v3045_v0 = vmax.f32 %v2757_v2, %v2773_v27  ;;  %v2777_v44 = vmax.f32 %v2352_v9, 0.0  ;;  %4398 = vmatprep.mubr.bf16.mxu0 %v9620_v5 }
 0x39f   :  { %v3182_v55 = vmax.f32 %v10316_v42, %v3044_v41  ;;  %v3048_v34 = vmax.f32 %v2760_v38, %v2776_v63  ;;  %4399 = vmatmul.mubr.bf16.gmra.mrb[100].mxu0 %v9617_v49 }
 0x3a0   :  { %v3183_v52 = vmax.f32 %v10317_v14, %v3045_v0  ;;  %v3049_v60 = vmax.f32 %v2761_v50, %v2777_v44  ;;  %v2355_v48 = vpop.f32.mrb[252].mxu1  ;;  %v10320_v14 = vld [vmem:[#allocation70_spill] sm:$0xff] }
 0x3a1   :  { %v3184_v58 = vmax.f32 %v10318_v47, %v3048_v34  ;;  %v2357_v54 = vpop.f32.mrb[253].mxu1  ;;  %v2356_v32 = vadd.f32 %v2355_v48, %v9195_v23  ;;  %v10321_v47 = vld [vmem:[#allocation71_spill] sm:$0xff] }
 0x3a2   :  { %v3185_v26 = vmax.f32 %v10319_v11, %v3049_v60  ;;  %v2359_v3 = vpop.f32.mrb[254].mxu1  ;;  %v2358_v35 = vadd.f32 %v2357_v54, %v9200_v13 }
 0x3a3   :  { %v9629_v46 = vpack.c.bf16 %v3184_v58, %v3182_v55  ;;  %v2361_v62 = vpop.f32.mrb[255].mxu1  ;;  %v2360_v45 = vadd.f32 %v2359_v3, %v9195_v23  ;;  %v2780_v25 = vmax.f32 %v2356_v32, 0.0  ;;  %v10322_v3 = vld [vmem:[#allocation72_spill] sm:$0xff] }
 0x3a4   :  { %v9631_v17 = vpack.c.bf16 %v3185_v26, %v3183_v52  ;;  %v2362_v51 = vadd.f32 %v2361_v62, %v9200_v13  ;;  %v2781_v9 = vmax.f32 %v2358_v35, 0.0 }
 0x3a5   :  { %v2784_v63 = vmax.f32 %v2360_v45, 0.0  ;;  %v10323_v45 = vld [vmem:[#allocation73_spill] sm:$0xff] }
 0x3a6   :  { %4408 = vmatprep.mubr.bf16.mxu0 %v9631_v17  ;;  %v2785_v44 = vmax.f32 %v2362_v51, 0.0 }
 0x3a7   :  { %4409 = vmatmul.mubr.bf16.gmra.mrb[104].mxu0 %v9629_v46 }
 0x3a8   :  { %v2365_v6 = vpop.f32.mrb[0].mxu1 }
 0x3a9   :  { %v2367_v36 = vpop.f32.mrb[1].mxu1  ;;  %v2366_v34 = vadd.f32 %v2365_v6, %v9195_v23 }
 0x3aa   :  { %v2369_v40 = vpop.f32.mrb[2].mxu1  ;;  %v2368_v48 = vadd.f32 %v2367_v36, %v9200_v13 }
 0x3ab   :  { %v2371_v7 = vpop.f32.mrb[3].mxu1  ;;  %v2370_v26 = vadd.f32 %v2369_v40, %v9195_v23  ;;  %v2788_v51 = vmax.f32 %v2366_v34, 0.0 }
 0x3ac   :  { %v2789_v40 = vmax.f32 %v2368_v48, 0.0 }
 0x3b0   :  { %v2375_v1 = vpop.f32.mrb[4].mxu1 }
 0x3b1   :  { %v2376_v43 = vadd.f32 %v2375_v1, %v9195_v23  ;;  %v2377_v39 = vpop.f32.mrb[5].mxu1  ;;  %v2372_v1 = vadd.f32 %v2371_v7, %v9200_v13 }
 0x3b2   :  { %v2378_v21 = vadd.f32 %v2377_v39, %v9200_v13  ;;  %v2379_v20 = vpop.f32.mrb[6].mxu1 }
 0x3b3   :  { %v2796_v19 = vmax.f32 %v2376_v43, 0.0  ;;  %v2380_v2 = vadd.f32 %v2379_v20, %v9195_v23  ;;  %v2381_v27 = vpop.f32.mrb[7].mxu1 }
 0x3b4   :  { %v2797_v38 = vmax.f32 %v2378_v21, 0.0  ;;  %v2382_v41 = vadd.f32 %v2381_v27, %v9200_v13 }
 0x3b5   :  { %v3052_v50 = vmax.f32 %v2780_v25, %v2796_v19  ;;  %v2800_v0 = vmax.f32 %v2380_v2, 0.0 }
 0x3b6   :  { %v3053_v42 = vmax.f32 %v2781_v9, %v2797_v38  ;;  %v2801_v55 = vmax.f32 %v2382_v41, 0.0  ;;  %v2792_v9 = vmax.f32 %v2370_v26, 0.0  ;;  %v2793_v41 = vmax.f32 %v2372_v1, 0.0 }
 0x3b7   :  { %v3186_v52 = vmax.f32 %v10320_v14, %v3052_v50  ;;  %v3056_v60 = vmax.f32 %v2784_v63, %v2800_v0  ;;  %v10324_v0 = vld [vmem:[#allocation74_spill] sm:$0xff] }
 0x3b8   :  { %v3187_v58 = vmax.f32 %v10321_v47, %v3053_v42  ;;  %v3057_v54 = vmax.f32 %v2785_v44, %v2801_v55  ;;  %v2385_v11 = vpop.f32.mrb[8].mxu1  ;;  %v10325_v55 = vld [vmem:[#allocation75_spill] sm:$0xff] }
 0x3b9   :  { %v3188_v62 = vmax.f32 %v10322_v3, %v3056_v60  ;;  %v2386_v32 = vadd.f32 %v2385_v11, %v9195_v23  ;;  %v2387_v35 = vpop.f32.mrb[9].mxu1  ;;  %v10326_v60 = vld [vmem:[#allocation76_spill] sm:$0xff] }
 0x3ba   :  { %v3189_v6 = vmax.f32 %v10323_v45, %v3057_v54  ;;  %v2388_v43 = vadd.f32 %v2387_v35, %v9200_v13  ;;  %v2389_v39 = vpop.f32.mrb[10].mxu1 }
 0x3bb   :  { %v9653_v36 = vpack.c.bf16 %v3188_v62, %v3186_v52  ;;  %v2804_v21 = vmax.f32 %v2386_v32, 0.0  ;;  %v2390_v20 = vadd.f32 %v2389_v39, %v9195_v23  ;;  %v2391_v25 = vpop.f32.mrb[11].mxu1 }
 0x3bc   :  { %v9656_v19 = vpack.c.bf16 %v3189_v6, %v3187_v58  ;;  %v2805_v2 = vmax.f32 %v2388_v43, 0.0  ;;  %v2392_v27 = vadd.f32 %v2391_v25, %v9200_v13  ;;  %v10327_v58 = vld [vmem:[#allocation77_spill] sm:$0xff]  ;;  %v6877_v43 = vld [vmem:[#allocation4 + $0x214] ss:$8 sps:$4 sm:$0xff]  }
 0x3bd   :  { %v3060_v7 = vmax.f32 %v2788_v51, %v2804_v21  ;;  %v2808_v38 = vmax.f32 %v2390_v20, 0.0  ;;  %v6872_v6 = vld [vmem:[#allocation4 + $0x200] ss:$8 sps:$4 sm:$0xff]   ;;  %v6875_v20 = vld [vmem:[#allocation4 + $0x210] ss:$8 sps:$4 sm:$0xff]  }
 0x3be   :  { %v3061_v63 = vmax.f32 %v2789_v40, %v2805_v2  ;;  %v2809_v50 = vmax.f32 %v2392_v27, 0.0  ;;  %4418 = vmatprep.mubr.bf16.mxu0 %v9656_v19  ;;  %v6880_v2 = vld [vmem:[#allocation4 + $0x224] ss:$8 sps:$4 sm:$0xff]  }
 0x3bf   :  { %v3190_v44 = vmax.f32 %v10324_v0, %v3060_v7  ;;  %v3064_v42 = vmax.f32 %v2792_v9, %v2808_v38  ;;  %4419 = vmatmul.mubr.bf16.gmra.mrb[108].mxu0 %v9653_v36 }
 0x3c0   :  { %v3191_v34 = vmax.f32 %v10325_v55, %v3061_v63  ;;  %v3065_v14 = vmax.f32 %v2793_v41, %v2809_v50  ;;  %v2395_v52 = vpop.f32.mrb[12].mxu1 }
 0x3c1   :  { %v3192_v48 = vmax.f32 %v10326_v60, %v3064_v42  ;;  %v2397_v47 = vpop.f32.mrb[13].mxu1  ;;  %v2396_v39 = vadd.f32 %v2395_v52, %v9195_v23 }
 0x3c2   :  { %v3193_v54 = vmax.f32 %v10327_v58, %v3065_v14  ;;  %v2399_v11 = vpop.f32.mrb[14].mxu1  ;;  %v2398_v51 = vadd.f32 %v2397_v47, %v9200_v13  ;;  %v6883_v14 = vld [vmem:[#allocation4 + $0x234] ss:$8 sps:$4 sm:$0xff]   ;;  %v10328_v58 = vld [vmem:[#allocation78_spill] sm:$0xff] }
 0x3c3   :  { %v9665_v26 = vpack.c.bf16 %v3192_v48, %v3190_v44  ;;  %v2401_v3 = vpop.f32.mrb[15].mxu1  ;;  %v2400_v25 = vadd.f32 %v2399_v11, %v9195_v23  ;;  %v6878_v44 = vld [vmem:[#allocation4 + $0x220] ss:$8 sps:$4 sm:$0xff]  }
 0x3c4   :  { %v9667_v62 = vpack.c.bf16 %v3193_v54, %v3191_v34  ;;  %v2402_v27 = vadd.f32 %v2401_v3, %v9200_v13  ;;  %v2813_v50 = vmax.f32 %v2398_v51, 0.0 }
 0x3c5   :  { %v2816_v42 = vmax.f32 %v2400_v25, 0.0  ;;  %v10330_v25 = vld [vmem:[#allocation80_spill] sm:$0xff] }
 0x3c6   :  { %4428 = vmatprep.mubr.bf16.mxu0 %v9667_v62  ;;  %v2817_v52 = vmax.f32 %v2402_v27, 0.0 }
 0x3c7   :  { %4429 = vmatmul.mubr.bf16.gmra.mrb[112].mxu0 %v9665_v26 }
 0x3c8   :  { %v2405_v32 = vpop.f32.mrb[16].mxu1  ;;  %4471 = vmatprep.mubr.bf16.mxu0 %v9375_v4 }
 0x3c9   :  { %v2407_v35 = vpop.f32.mrb[17].mxu1  ;;  %v2406_v47 = vadd.f32 %v2405_v32, %v9195_v23 }
 0x3ca   :  { %v2409_v1 = vpop.f32.mrb[18].mxu1  ;;  %v2408_v3 = vadd.f32 %v2407_v35, %v9200_v13  ;;  %v10331_v35 = vld [vmem:[#allocation81_spill] sm:$0xff] }
 0x3cb   :  { %v2411_v45 = vpop.f32.mrb[19].mxu1 }
 0x3cf   :  { %4472 = vmatmul.mubr.bf16.vlgmr.msra.gmra.mrb[52].mxu0 %v9372_v29  ;;  %v2812_v29 = vmax.f32 %v2396_v39, 0.0 }
 0x3d0   :  { %4633 = vmatpush1.bf16.msra.mxu0 %v6872_v6  ;;  %v2415_v21 = vpop.f32.mrb[20].mxu1  ;;  %4481 = vmatprep.mubr.bf16.mxu0 %v9390_v16  ;;  %v10329_v6 = vld [vmem:[#allocation79_spill] sm:$0xff] }
 0x3d1   :  { %v2416_v4 = vadd.f32 %v2415_v21, %v9195_v23  ;;  %v2417_v40 = vpop.f32.mrb[21].mxu1  ;;  %4634 = vmatprep.subr.bf16.mxu0 %v6877_v43  ;;  %v6881_v21 = vld [vmem:[#allocation4 + $0x230] ss:$8 sps:$4 sm:$0xff]  }
 0x3d2   :  { %v2418_v9 = vadd.f32 %v2417_v40, %v9200_v13  ;;  %v2419_v7 = vpop.f32.mrb[22].mxu1 }
 0x3d3   :  { %v2828_v38 = vmax.f32 %v2416_v4, 0.0  ;;  %v2420_v41 = vadd.f32 %v2419_v7, %v9195_v23  ;;  %v2421_v63 = vpop.f32.mrb[23].mxu1 }
 0x3d4   :  { %v2829_v16 = vmax.f32 %v2418_v9, 0.0  ;;  %v2422_v0 = vadd.f32 %v2421_v63, %v9200_v13  ;;  %4635 = vmatpush1.bf16.msra.mxu0 %v6875_v20  ;;  %v2410_v20 = vadd.f32 %v2409_v1, %v9195_v23 }
 0x3d5   :  { %v3068_v55 = vmax.f32 %v2812_v29, %v2828_v38  ;;  %v2832_v34 = vmax.f32 %v2420_v41, 0.0  ;;  %4636 = vmatprep.subr.bf16.mxu0 %v6880_v2  ;;  %v6886_v2 = vld [vmem:[#allocation4 + $0x244] ss:$8 sps:$4 sm:$0xff]   ;;  %v2820_v29 = vmax.f32 %v2406_v47, 0.0 }
 0x3d6   :  { %v3069_v60 = vmax.f32 %v2813_v50, %v2829_v16  ;;  %v2833_v48 = vmax.f32 %v2422_v0, 0.0  ;;  %v2821_v50 = vmax.f32 %v2408_v3, 0.0  ;;  %v10332_v47 = vld [vmem:[#allocation82_spill] sm:$0xff] }
 0x3d7   :  { %v3194_v54 = vmax.f32 %v10328_v58, %v3068_v55  ;;  %v3072_v11 = vmax.f32 %v2816_v42, %v2832_v34  ;;  %4482 = vmatmul.mubr.bf16.gmra.mrb[56].mxu0 %v9388_v12  ;;  %v2412_v12 = vadd.f32 %v2411_v45, %v9200_v13  ;;  %v6884_v45 = vld [vmem:[#allocation4 + $0x240] ss:$8 sps:$4 sm:$0xff]   ;;  %v2824_v42 = vmax.f32 %v2410_v20, 0.0 }
 0x3d8   :  { %v3195_v43 = vmax.f32 %v10329_v6, %v3069_v60  ;;  %v3073_v39 = vmax.f32 %v2817_v52, %v2833_v48  ;;  %v2425_v51 = vpop.f32.mrb[24].mxu1  ;;  %4491 = vmatprep.mubr.bf16.mxu0 %v9431_v18  ;;  %4637 = vmatpush1.bf16.msra.mxu0 %v6878_v44 }
 0x3d9   :  { %v3196_v4 = vmax.f32 %v10330_v25, %v3072_v11  ;;  %v2426_v32 = vadd.f32 %v2425_v51, %v9195_v23  ;;  %v2427_v40 = vpop.f32.mrb[25].mxu1  ;;  %4638 = vmatprep.subr.bf16.mxu0 %v6883_v14  ;;  %v6889_v14 = vld [vmem:[#allocation4 + $0x254] ss:$8 sps:$4 sm:$0xff]   ;;  %v2825_v52 = vmax.f32 %v2412_v12, 0.0  ;;  %v6892_v25 = vld [vmem:[#allocation4 + $0x264] ss:$8 sps:$4 sm:$0xff]  }
 0x3da   :  { %v3197_v27 = vmax.f32 %v10331_v35, %v3073_v39  ;;  %v2428_v9 = vadd.f32 %v2427_v40, %v9200_v13  ;;  %v2429_v7 = vpop.f32.mrb[26].mxu1  ;;  %v10333_v11 = vld [vmem:[#allocation83_spill] sm:$0xff]  ;;  %v10334_v51 = vld [vmem:[#allocation84_spill] sm:$0xff] }
 0x3db   :  { %v9694_v38 = vpack.c.bf16 %v3196_v4, %v3194_v54  ;;  %v2836_v41 = vmax.f32 %v2426_v32, 0.0  ;;  %v2430_v1 = vadd.f32 %v2429_v7, %v9195_v23  ;;  %v2431_v63 = vpop.f32.mrb[27].mxu1  ;;  %v6887_v39 = vld [vmem:[#allocation4 + $0x250] ss:$8 sps:$4 sm:$0xff]   ;;  %v10335_v4 = vld [vmem:[#allocation85_spill] sm:$0xff] }
 0x3dc   :  { %v9697_v16 = vpack.c.bf16 %v3197_v27, %v3195_v43  ;;  %v2837_v0 = vmax.f32 %v2428_v9, 0.0  ;;  %v2432_v44 = vadd.f32 %v2431_v63, %v9200_v13  ;;  %4639 = vmatpush1.bf16.msra.mxu0 %v6881_v21  ;;  %v6890_v27 = vld [vmem:[#allocation4 + $0x260] ss:$8 sps:$4 sm:$0xff]   ;;  %v6895_v9 = vld [vmem:[#allocation4 + $0x274] ss:$8 sps:$4 sm:$0xff]  }
 0x3dd   :  { %v3076_v55 = vmax.f32 %v2820_v29, %v2836_v41  ;;  %v2840_v34 = vmax.f32 %v2430_v1, 0.0  ;;  %4640 = vmatprep.subr.bf16.mxu0 %v6886_v2  ;;  %v6893_v29 = vld [vmem:[#allocation4 + $0x270] ss:$8 sps:$4 sm:$0xff]   ;;  %v6898_v1 = vld [vmem:[#allocation4 + $0x284] ss:$8 sps:$4 sm:$0xff]  }
 0x3de   :  { %v3077_v60 = vmax.f32 %v2821_v50, %v2837_v0  ;;  %v2841_v48 = vmax.f32 %v2432_v44, 0.0  ;;  %v6896_v0 = vld [vmem:[#allocation4 + $0x280] ss:$8 sps:$4 sm:$0xff]   ;;  %v6901_v44 = vld [vmem:[#allocation4 + $0x294] ss:$8 sps:$4 sm:$0xff]  }
 0x3df   :  { %v3198_v58 = vmax.f32 %v10332_v47, %v3076_v55  ;;  %v3080_v54 = vmax.f32 %v2824_v42, %v2840_v34  ;;  %4492 = vmatmul.mubr.bf16.gmra.mrb[60].mxu0 %v9428_v56  ;;  %v6899_v34 = vld [vmem:[#allocation4 + $0x290] ss:$8 sps:$4 sm:$0xff]  }
 0x3e0   :  { %v3199_v3 = vmax.f32 %v10333_v11, %v3077_v60  ;;  %v3081_v6 = vmax.f32 %v2825_v52, %v2841_v48  ;;  %v2435_v43 = vpop.f32.mrb[28].mxu1  ;;  %4501 = vmatprep.mubr.bf16.mxu0 %v9446_v53  ;;  %4641 = vmatpush1.bf16.msra.mxu0 %v6884_v45  ;;  %v6904_v48 = vld [vmem:[#allocation4 + $0x2a4] ss:$8 sps:$4 sm:$0xff]  }
 0x3e1   :  { %v3200_v21 = vmax.f32 %v10334_v51, %v3080_v54  ;;  %v2437_v20 = vpop.f32.mrb[29].mxu1  ;;  %4642 = vmatprep.subr.bf16.mxu0 %v6889_v14  ;;  %v2436_v45 = vadd.f32 %v2435_v43, %v9195_v23 }
 0x3e2   :  { %v3201_v32 = vmax.f32 %v10335_v4, %v3081_v6  ;;  %v2439_v40 = vpop.f32.mrb[30].mxu1  ;;  %v2438_v42 = vadd.f32 %v2437_v20, %v9200_v13  ;;  %v6902_v20 = vld [vmem:[#allocation4 + $0x2a0] ss:$8 sps:$4 sm:$0xff]  }
 0x3e3   :  { %v9706_v2 = vpack.c.bf16 %v3200_v21, %v3198_v58  ;;  %v2441_v12 = vpop.f32.mrb[31].mxu1  ;;  %v2440_v14 = vadd.f32 %v2439_v40, %v9195_v23  ;;  %v2844_v11 = vmax.f32 %v2436_v45, 0.0  ;;  %v6907_v40 = vld [vmem:[#allocation4 + $0x2b4] ss:$8 sps:$4 sm:$0xff]  }
 0x3e4   :  { %v9708_v35 = vpack.c.bf16 %v3201_v32, %v3199_v3  ;;  %4643 = vmatpush1.bf16.msra.mxu0 %v6887_v39  ;;  %v2442_v47 = vadd.f32 %v2441_v12, %v9200_v13  ;;  %v2845_v39 = vmax.f32 %v2438_v42, 0.0  ;;  %v10337_v42 = vld [vmem:[#allocation87_spill] sm:$0xff] }
 0x3e5   :  { %4644 = vmatprep.subr.bf16.mxu0 %v6892_v25  ;;  %v2848_v25 = vmax.f32 %v2440_v14, 0.0 }
 0x3e6   :  { %v2849_v12 = vmax.f32 %v2442_v47, 0.0 }
 0x3e7   :  { %4502 = vmatmul.mubr.bf16.gmra.mrb[64].mxu0 %v9444_v22 }
 0x3e8   :  { %v2445_v7 = vpop.f32.mrb[32].mxu1  ;;  %4511 = vmatprep.mubr.bf16.mxu0 %v9486_v31  ;;  %4645 = vmatpush1.bf16.msra.mxu0 %v6890_v27 }
 0x3e9   :  { %v2447_v41 = vpop.f32.mrb[33].mxu1  ;;  %4646 = vmatprep.subr.bf16.mxu0 %v6895_v9 }
 0x3ea   :  { %v2449_v63 = vpop.f32.mrb[34].mxu1  ;;  %v2448_v45 = vadd.f32 %v2447_v41, %v9200_v13  ;;  %v10339_v41 = vld [vmem:[#allocation89_spill] sm:$0xff] }
 0x3eb   :  { %v2451_v50 = vpop.f32.mrb[35].mxu1 }
 0x3ec   :  { %4647 = vmatpush1.bf16.msra.mxu0 %v6893_v29  ;;  %v2446_v29 = vadd.f32 %v2445_v7, %v9195_v23 }
 0x3ed   :  { %4648 = vmatprep.subr.bf16.mxu0 %v6898_v1  ;;  %v10336_v1 = vld [vmem:[#allocation86_spill] sm:$0xff] }
 0x3ef   :  { %4512 = vmatmul.mubr.bf16.gmra.mrb[68].mxu0 %v9483_v28 }
 0x3f0   :  { %v2455_v55 = vpop.f32.mrb[36].mxu1  ;;  %4521 = vmatprep.mubr.bf16.mxu0 %v9502_v30  ;;  %4649 = vmatpush1.bf16.msra.mxu0 %v6896_v0 }
 0x3f1   :  { %v2456_v52 = vadd.f32 %v2455_v55, %v9195_v23  ;;  %v2457_v60 = vpop.f32.mrb[37].mxu1  ;;  %4650 = vmatprep.subr.bf16.mxu0 %v6901_v44 }
 0x3f2   :  { %v2458_v58 = vadd.f32 %v2457_v60, %v9200_v13  ;;  %v2459_v54 = vpop.f32.mrb[38].mxu1  ;;  %v2450_v60 = vadd.f32 %v2449_v63, %v9195_v23 }
 0x3f3   :  { %v2860_v3 = vmax.f32 %v2456_v52, 0.0  ;;  %v2460_v6 = vadd.f32 %v2459_v54, %v9195_v23  ;;  %v2461_v43 = vpop.f32.mrb[39].mxu1  ;;  %v6905_v52 = vld [vmem:[#allocation4 + $0x2b0] ss:$8 sps:$4 sm:$0xff]   ;;  %v6910_v54 = vld [vmem:[#allocation4 + $0x2c4] ss:$8 sps:$4 sm:$0xff]  }
 0x3f4   :  { %v2861_v51 = vmax.f32 %v2458_v58, 0.0  ;;  %v2462_v21 = vadd.f32 %v2461_v43, %v9200_v13  ;;  %4651 = vmatpush1.bf16.msra.mxu0 %v6899_v34 }
 0x3f5   :  { %v3084_v4 = vmax.f32 %v2844_v11, %v2860_v3  ;;  %v2864_v32 = vmax.f32 %v2460_v6, 0.0  ;;  %4652 = vmatprep.subr.bf16.mxu0 %v6904_v48  ;;  %v10338_v48 = vld [vmem:[#allocation88_spill] sm:$0xff]  ;;  %v2452_v11 = vadd.f32 %v2451_v50, %v9200_v13  ;;  %v2856_v50 = vmax.f32 %v2450_v60, 0.0  ;;  %v10342_v60 = vld [vmem:[#allocation91_spill] sm:$0xff] }
 0x3f6   :  { %v3085_v27 = vmax.f32 %v2845_v39, %v2861_v51  ;;  %v2865_v9 = vmax.f32 %v2462_v21, 0.0  ;;  %v2852_v39 = vmax.f32 %v2446_v29, 0.0 }
 0x3f7   :  { %v3202_v0 = vmax.f32 %v10336_v1, %v3084_v4  ;;  %v3088_v44 = vmax.f32 %v2848_v25, %v2864_v32  ;;  %4522 = vmatmul.mubr.bf16.gmra.mrb[72].mxu0 %v9500_v10  ;;  %v2853_v25 = vmax.f32 %v2448_v45, 0.0  ;;  %v6913_v1 = vld [vmem:[#allocation4 + $0x2d4] ss:$8 sps:$4 sm:$0xff]   ;;  %v2857_v29 = vmax.f32 %v2452_v11, 0.0  ;;  %v10341_v45 = vld [vmem:[#allocation13_spill] sm:$0xff] }
 0x3f8   :  { %v3203_v55 = vmax.f32 %v10337_v42, %v3085_v27  ;;  %v3089_v34 = vmax.f32 %v2849_v12, %v2865_v9  ;;  %v2465_v14 = vpop.f32.mrb[40].mxu1  ;;  %4531 = vmatprep.mubr.bf16.mxu0 %v9542_v57  ;;  %4653 = vmatpush1.bf16.msra.mxu0 %v6902_v20  ;;  %v10343_v11 = vld [vmem:[#allocation92_spill] sm:$0xff] }
 0x3f9   :  { %v3204_v47 = vmax.f32 %v10338_v48, %v3088_v44  ;;  %v2466_v7 = vadd.f32 %v2465_v14, %v9195_v23  ;;  %v2467_v58 = vpop.f32.mrb[41].mxu1  ;;  %4654 = vmatprep.subr.bf16.mxu0 %v6907_v40  ;;  %v6908_v40 = vld [vmem:[#allocation4 + $0x2c0] ss:$8 sps:$4 sm:$0xff]  }
 0x3fa   :  { %v3205_v3 = vmax.f32 %v10339_v41, %v3089_v34  ;;  %v2468_v6 = vadd.f32 %v2467_v58, %v9200_v13  ;;  %v2469_v43 = vpop.f32.mrb[42].mxu1  ;;  %v10340_v34 = vld [vmem:[#allocation90_spill] sm:$0xff] }
 0x3fb   :  { %v2868_v51 = vmax.f32 %v2466_v7, 0.0  ;;  %v2470_v21 = vadd.f32 %v2469_v43, %v9195_v23  ;;  %v2471_v20 = vpop.f32.mrb[43].mxu1  ;;  %v9735_v63 = vpack.c.bf16 %v3204_v47, %v3202_v0 }
 0x3fc   :  { %v2869_v4 = vmax.f32 %v2468_v6, 0.0  ;;  %v2472_v32 = vadd.f32 %v2471_v20, %v9200_v13  ;;  %4655 = vmatpush1.bf16.msra.mxu0 %v6905_v52  ;;  %v9738_v12 = vpack.c.bf16 %v3205_v3, %v3203_v55  ;;  %v6911_v55 = vld [vmem:[#allocation4 + $0x2d0] ss:$8 sps:$4 sm:$0xff]  }
 0x3fd   :  { %v3092_v27 = vmax.f32 %v2852_v39, %v2868_v51  ;;  %v2872_v9 = vmax.f32 %v2470_v21, 0.0  ;;  %4656 = vmatprep.subr.bf16.mxu0 %v6910_v54  ;;  %v6916_v54 = vld [vmem:[#allocation4 + $0x2e4] ss:$8 sps:$4 sm:$0xff]   ;;  %v6914_v39 = vld [vmem:[#allocation4 + $0x2e0] ss:$8 sps:$4 sm:$0xff]  }
 0x3fe   :  { %v3093_v44 = vmax.f32 %v2853_v25, %v2869_v4  ;;  %v2873_v42 = vmax.f32 %v2472_v32, 0.0  ;;  %v6919_v21 = vld [vmem:[#allocation4 + $0x2f4] ss:$8 sps:$4 sm:$0xff]   ;;  %v6917_v25 = vld [vmem:[#allocation4 + $0x2f0] ss:$8 sps:$4 sm:$0xff]  }
 0x3ff   :  { %v3206_v14 = vmax.f32 %v10340_v34, %v3092_v27  ;;  %v3096_v0 = vmax.f32 %v2856_v50, %v2872_v9  ;;  %4532 = vmatmul.mubr.bf16.gmra.mrb[76].mxu0 %v9539_v33  ;;  %v6922_v32 = vld [vmem:[#allocation4 + $0x304] ss:$8 sps:$4 sm:$0xff]  }
 0x400   :  { %v3207_v48 = vmax.f32 %v10341_v45, %v3093_v44  ;;  %v3097_v47 = vmax.f32 %v2857_v29, %v2873_v42  ;;  %v2475_v52 = vpop.f32.mrb[44].mxu1  ;;  %4541 = vmatprep.mubr.bf16.mxu0 %v9558_v15  ;;  %4657 = vmatpush1.bf16.msra.mxu0 %v6908_v40 }
 0x401   :  { %v3208_v7 = vmax.f32 %v10342_v60, %v3096_v0  ;;  %v2477_v58 = vpop.f32.mrb[45].mxu1  ;;  %4658 = vmatprep.subr.bf16.mxu0 %v6913_v1  ;;  %v2476_v27 = vadd.f32 %v2475_v52, %v9195_v23 }
 0x402   :  { %v3209_v41 = vmax.f32 %v10343_v11, %v3097_v47  ;;  %v2479_v3 = vpop.f32.mrb[46].mxu1  ;;  %v2478_v9 = vadd.f32 %v2477_v58, %v9200_v13 }
 0x403   :  { %v2481_v6 = vpop.f32.mrb[47].mxu1  ;;  %v9746_v43 = vpack.c.bf16 %v3208_v7, %v3206_v14  ;;  %v2480_v29 = vadd.f32 %v2479_v3, %v9195_v23  ;;  %v2876_v45 = vmax.f32 %v2476_v27, 0.0 }
 0x404   :  { %4659 = vmatpush1.bf16.msra.mxu0 %v6911_v55  ;;  %v9748_v51 = vpack.c.bf16 %v3209_v41, %v3207_v48  ;;  %v2482_v34 = vadd.f32 %v2481_v6, %v9200_v13  ;;  %v2877_v55 = vmax.f32 %v2478_v9, 0.0 }
 0x405   :  { %4660 = vmatprep.subr.bf16.mxu0 %v6916_v54  ;;  %v2880_v58 = vmax.f32 %v2480_v29, 0.0 }
 0x406   :  { %v2881_v41 = vmax.f32 %v2482_v34, 0.0  ;;  %v10346_v34 = vld [vmem:[#allocation16_spill] sm:$0xff] }
 0x407   :  { %4542 = vmatmul.mubr.bf16.gmra.mrb[80].mxu0 %v9556_v37 }
 0x408   :  { %v2485_v20 = vpop.f32.mrb[48].mxu1  ;;  %4551 = vmatprep.mubr.bf16.mxu0 %v9584_v8  ;;  %4661 = vmatpush1.bf16.msra.mxu0 %v6914_v39 }
 0x409   :  { %v2487_v4 = vpop.f32.mrb[49].mxu1  ;;  %4662 = vmatprep.subr.bf16.mxu0 %v6919_v21  ;;  %v2486_v6 = vadd.f32 %v2485_v20, %v9195_v23  ;;  %v10344_v21 = vld [vmem:[#allocation14_spill] sm:$0xff] }
 0x40a   :  { %v2489_v40 = vpop.f32.mrb[50].mxu1  ;;  %v2488_v27 = vadd.f32 %v2487_v4, %v9200_v13 }
 0x40b   :  { %v2491_v50 = vpop.f32.mrb[51].mxu1  ;;  %v2490_v29 = vadd.f32 %v2489_v40, %v9195_v23 }
 0x40c   :  { %4663 = vmatpush1.bf16.msra.mxu0 %v6917_v25  ;;  %v2885_v40 = vmax.f32 %v2488_v27, 0.0 }
 0x40d   :  { %4825 = vmatprep.subr.bf16.mxu0 %v6922_v32 }
 0x40f   :  { %4552 = vmatmul.mubr.bf16.gmra.mrb[84].mxu0 %v9581_v24 }
 0x410   :  { %v2495_v1 = vpop.f32.mrb[52].mxu1  ;;  %4561 = vmatprep.mubr.bf16.mxu0 %v9595_v59 }
 0x411   :  { %v2496_v44 = vadd.f32 %v2495_v1, %v9195_v23  ;;  %v2497_v42 = vpop.f32.mrb[53].mxu1  ;;  %v10345_v1 = vld [vmem:[#allocation15_spill] sm:$0xff] }
 0x412   :  { %v2498_v14 = vadd.f32 %v2497_v42, %v9200_v13  ;;  %v2499_v0 = vpop.f32.mrb[54].mxu1 }
 0x413   :  { %v2892_v48 = vmax.f32 %v2496_v44, 0.0  ;;  %v2500_v47 = vadd.f32 %v2499_v0, %v9195_v23  ;;  %v2501_v52 = vpop.f32.mrb[55].mxu1 }
 0x414   :  { %v2893_v60 = vmax.f32 %v2498_v14, 0.0  ;;  %v2502_v7 = vadd.f32 %v2501_v52, %v9200_v13 }
 0x415   :  { %v3100_v54 = vmax.f32 %v2876_v45, %v2892_v48  ;;  %v2896_v11 = vmax.f32 %v2500_v47, 0.0  ;;  %v2492_v45 = vadd.f32 %v2491_v50, %v9200_v13  ;;  %v10347_v48 = vld [vmem:[#allocation93_spill] sm:$0xff] }
 0x416   :  { %v3101_v3 = vmax.f32 %v2877_v55, %v2893_v60  ;;  %v2897_v39 = vmax.f32 %v2502_v7, 0.0  ;;  %v2884_v55 = vmax.f32 %v2486_v6, 0.0 }
 0x417   :  { %v3210_v25 = vmax.f32 %v10344_v21, %v3100_v54  ;;  %v3104_v32 = vmax.f32 %v2880_v58, %v2896_v11  ;;  %4562 = vmatmul.mubr.bf16.gmra.mrb[88].mxu0 %v9593_v61 }
 0x418   :  { %v3211_v9 = vmax.f32 %v10345_v1, %v3101_v3  ;;  %v3105_v44 = vmax.f32 %v2881_v41, %v2897_v39  ;;  %v2505_v42 = vpop.f32.mrb[56].mxu1  ;;  %4571 = vmatprep.mubr.bf16.mxu0 %v9620_v5  ;;  %v2888_v39 = vmax.f32 %v2490_v29, 0.0  ;;  %v10351_v29 = vld [vmem:[#allocation96_spill] sm:$0xff] }
 0x419   :  { %v3212_v14 = vmax.f32 %v10346_v34, %v3104_v32  ;;  %v2506_v0 = vadd.f32 %v2505_v42, %v9195_v23  ;;  %v2507_v20 = vpop.f32.mrb[57].mxu1  ;;  %v2889_v32 = vmax.f32 %v2492_v45, 0.0  ;;  %v10348_v42 = vld [vmem:[#allocation94_spill] sm:$0xff] }
 0x41a   :  { %v3213_v47 = vmax.f32 %v10347_v48, %v3105_v44  ;;  %v2508_v52 = vadd.f32 %v2507_v20, %v9200_v13  ;;  %v2509_v4 = vpop.f32.mrb[58].mxu1  ;;  %v10350_v20 = vld [vmem:[#allocation95_spill] sm:$0xff] }
 0x41b   :  { %v2900_v60 = vmax.f32 %v2506_v0, 0.0  ;;  %v2510_v7 = vadd.f32 %v2509_v4, %v9195_v23  ;;  %v2511_v58 = vpop.f32.mrb[59].mxu1  ;;  %v9775_v54 = vpack.c.bf16 %v3212_v14, %v3210_v25  ;;  %v10349_v0 = vld [vmem:[#allocation17_spill] sm:$0xff] }
 0x41c   :  { %v2901_v11 = vmax.f32 %v2508_v52, 0.0  ;;  %v2512_v41 = vadd.f32 %v2511_v58, %v9200_v13  ;;  %v9778_v3 = vpack.c.bf16 %v3213_v47, %v3211_v9 }
 0x41d   :  { %v3108_v50 = vmax.f32 %v2884_v55, %v2900_v60  ;;  %v2904_v21 = vmax.f32 %v2510_v7, 0.0 }
 0x41e   :  { %v3109_v1 = vmax.f32 %v2885_v40, %v2901_v11  ;;  %v2905_v44 = vmax.f32 %v2512_v41, 0.0 }
 0x41f   :  { %v3214_v6 = vmax.f32 %v10348_v42, %v3108_v50  ;;  %v3112_v34 = vmax.f32 %v2888_v39, %v2904_v21  ;;  %4572 = vmatmul.mubr.bf16.gmra.mrb[92].mxu0 %v9617_v49 }
 0x420   :  { %v3215_v25 = vmax.f32 %v10349_v0, %v3109_v1  ;;  %v3113_v14 = vmax.f32 %v2889_v32, %v2905_v44  ;;  %v2515_v27 = vpop.f32.mrb[60].mxu1  ;;  %4581 = vmatprep.mubr.bf16.mxu0 %v9631_v17 }
 0x421   :  { %v3216_v9 = vmax.f32 %v10350_v20, %v3112_v34  ;;  %v2517_v48 = vpop.f32.mrb[61].mxu1  ;;  %v2516_v11 = vadd.f32 %v2515_v27, %v9195_v23 }
 0x422   :  { %v3217_v47 = vmax.f32 %v10351_v29, %v3113_v14  ;;  %v2519_v52 = vpop.f32.mrb[62].mxu1  ;;  %v2518_v41 = vadd.f32 %v2517_v48, %v9200_v13 }
 0x423   :  { %v2521_v45 = vpop.f32.mrb[63].mxu1  ;;  %v9786_v4 = vpack.c.bf16 %v3216_v9, %v3214_v6  ;;  %v2520_v50 = vadd.f32 %v2519_v52, %v9195_v23  ;;  %v2908_v6 = vmax.f32 %v2516_v11, 0.0 }
 0x424   :  { %v9788_v55 = vpack.c.bf16 %v3217_v47, %v3215_v25  ;;  %v2522_v1 = vadd.f32 %v2521_v45, %v9200_v13  ;;  %v2909_v14 = vmax.f32 %v2518_v41, 0.0 }
 0x425   :  { %10352 = vst [vmem:[#allocation22_spill] sm:$0xff] %v9786_v4  ;;  %v2912_v9 = vmax.f32 %v2520_v50, 0.0  ;;  %v10354_v4 = vld [vmem:[#allocation18_spill] sm:$0xff] }
 0x426   :  { %10353 = vst [vmem:[#allocation23_spill] sm:$0xff] %v9788_v55  ;;  %v2913_v47 = vmax.f32 %v2522_v1, 0.0  ;;  %v10356_v1 = vld [vmem:[#allocation20_spill] sm:$0xff] }
 0x427   :  { %4582 = vmatmul.mubr.bf16.gmra.mrb[96].mxu0 %v9629_v46 }
 0x428   :  { %v2525_v60 = vpop.f32.mrb[64].mxu1  ;;  %4591 = vmatprep.mubr.bf16.mxu0 %v9656_v19 }
 0x429   :  { %v2527_v7 = vpop.f32.mrb[65].mxu1  ;;  %v2526_v45 = vadd.f32 %v2525_v60, %v9195_v23 }
 0x42a   :  { %v2529_v58 = vpop.f32.mrb[66].mxu1  ;;  %v2528_v11 = vadd.f32 %v2527_v7, %v9200_v13 }
 0x42b   :  { %v2531_v40 = vpop.f32.mrb[67].mxu1  ;;  %v2530_v50 = vadd.f32 %v2529_v58, %v9195_v23 }
 0x42c   :  { %v2917_v58 = vmax.f32 %v2528_v11, 0.0  ;;  %v10360_v11 = vld [vmem:[#allocation99_spill] sm:$0xff] }
 0x42f   :  { %4592 = vmatmul.mubr.bf16.gmra.mrb[100].mxu0 %v9653_v36 }
 0x430   :  { %v2535_v39 = vpop.f32.mrb[68].mxu1  ;;  %4601 = vmatprep.mubr.bf16.mxu0 %v9667_v62 }
 0x431   :  { %v2536_v21 = vadd.f32 %v2535_v39, %v9195_v23  ;;  %v2537_v32 = vpop.f32.mrb[69].mxu1 }
 0x432   :  { %v2538_v44 = vadd.f32 %v2537_v32, %v9200_v13  ;;  %v2539_v42 = vpop.f32.mrb[70].mxu1 }
 0x433   :  { %v2924_v34 = vmax.f32 %v2536_v21, 0.0  ;;  %v2540_v0 = vadd.f32 %v2539_v42, %v9195_v23  ;;  %v2541_v25 = vpop.f32.mrb[71].mxu1  ;;  %v10355_v21 = vld [vmem:[#allocation19_spill] sm:$0xff] }
 0x434   :  { %v2925_v27 = vmax.f32 %v2538_v44, 0.0  ;;  %v2542_v20 = vadd.f32 %v2541_v25, %v9200_v13 }
 0x435   :  { %v3116_v48 = vmax.f32 %v2908_v6, %v2924_v34  ;;  %v2928_v29 = vmax.f32 %v2540_v0, 0.0  ;;  %v10357_v0 = vld [vmem:[#allocation97_spill] sm:$0xff] }
 0x436   :  { %v3117_v52 = vmax.f32 %v2909_v14, %v2925_v27  ;;  %v2929_v39 = vmax.f32 %v2542_v20, 0.0  ;;  %v2916_v27 = vmax.f32 %v2526_v45, 0.0 }
 0x437   :  { %v3218_v32 = vmax.f32 %v10354_v4, %v3116_v48  ;;  %v3120_v55 = vmax.f32 %v2912_v9, %v2928_v29  ;;  %4602 = vmatmul.mubr.bf16.gmra.mrb[104].mxu0 %v9665_v26  ;;  %v2532_v4 = vadd.f32 %v2531_v40, %v9200_v13 }
 0x438   :  { %v3219_v41 = vmax.f32 %v10355_v21, %v3117_v52  ;;  %v3121_v44 = vmax.f32 %v2913_v47, %v2929_v39  ;;  %v2545_v42 = vpop.f32.mrb[72].mxu1  ;;  %4611 = vmatprep.mubr.bf16.mxu0 %v9697_v16  ;;  %v2920_v39 = vmax.f32 %v2530_v50, 0.0 }
 0x439   :  { %v3220_v6 = vmax.f32 %v10356_v1, %v3120_v55  ;;  %v2546_v34 = vadd.f32 %v2545_v42, %v9195_v23  ;;  %v2547_v60 = vpop.f32.mrb[73].mxu1 }
 0x43a   :  { %v3221_v25 = vmax.f32 %v10357_v0, %v3121_v44  ;;  %v2548_v14 = vadd.f32 %v2547_v60, %v9200_v13  ;;  %v2549_v7 = vpop.f32.mrb[74].mxu1  ;;  %v2921_v44 = vmax.f32 %v2532_v4, 0.0  ;;  %v10358_v60 = vld [vmem:[#allocation98_spill] sm:$0xff]  ;;  %v6920_v4 = vld [vmem:[#allocation4 + $0x300] ss:$8 sps:$4 sm:$0xff]  }
 0x43b   :  { %v2932_v20 = vmax.f32 %v2546_v34, 0.0  ;;  %v2550_v9 = vadd.f32 %v2549_v7, %v9195_v23  ;;  %v2551_v48 = vpop.f32.mrb[75].mxu1  ;;  %v9815_v29 = vpack.c.bf16 %v3220_v6, %v3218_v32  ;;  %v10359_v23 = vld [vmem:[#allocation21_spill] sm:$0xff]  ;;  %v6923_v7 = vld [vmem:[#allocation4 + $0x310] ss:$8 sps:$4 sm:$0xff]  }
 0x43c   :  { %v2933_v47 = vmax.f32 %v2548_v14, 0.0  ;;  %v2552_v55 = vadd.f32 %v2551_v48, %v9200_v13  ;;  %v9818_v52 = vpack.c.bf16 %v3221_v25, %v3219_v41  ;;  %v10361_v41 = vld [vmem:[#allocation100_spill] sm:$0xff]  ;;  %v6934_v48 = vld [vmem:[#allocation4 + $0x344] ss:$8 sps:$4 sm:$0xff]  }
 0x43d   :  { %v3124_v40 = vmax.f32 %v2916_v27, %v2932_v20  ;;  %v2936_v21 = vmax.f32 %v2550_v9, 0.0  ;;  %v6925_v14 = vld [vmem:[#allocation4 + $0x314] ss:$8 sps:$4 sm:$0xff]   ;;  %v6928_v27 = vld [vmem:[#allocation4 + $0x324] ss:$8 sps:$4 sm:$0xff]  }
 0x43e   :  { %v3125_v42 = vmax.f32 %v2917_v58, %v2933_v47  ;;  %v2937_v1 = vmax.f32 %v2552_v55, 0.0  ;;  %v6926_v20 = vld [vmem:[#allocation4 + $0x320] ss:$8 sps:$4 sm:$0xff]   ;;  %v6931_v9 = vld [vmem:[#allocation4 + $0x334] ss:$8 sps:$4 sm:$0xff]  }
 0x43f   :  { %v3222_v45 = vmax.f32 %v10358_v60, %v3124_v40  ;;  %v3128_v34 = vmax.f32 %v2920_v39, %v2936_v21  ;;  %4612 = vmatmul.mubr.bf16.gmra.mrb[108].mxu0 %v9694_v38  ;;  %v6937_v58 = vld [vmem:[#allocation4 + $0x354] ss:$8 sps:$4 sm:$0xff]   ;;  %v6940_v47 = vld [vmem:[#allocation4 + $0x364] ss:$8 sps:$4 sm:$0xff]   ;;  %v6941_v39 = vld [vmem:[#allocation4 + $0x370] ss:$8 sps:$4 sm:$0xff]  }
 0x440   :  { %v3223_v32 = vmax.f32 %v10359_v23, %v3125_v42  ;;  %v3129_v6 = vmax.f32 %v2921_v44, %v2937_v1  ;;  %4621 = vmatprep.mubr.bf16.mxu0 %v9708_v35  ;;  %v6943_v55 = vld [vmem:[#allocation4 + $0x374] ss:$8 sps:$4 sm:$0xff]   ;;  %v6946_v40 = vld [vmem:[#allocation4 + $0x384] ss:$8 sps:$4 sm:$0xff]   ;;  %v6944_v21 = vld [vmem:[#allocation4 + $0x380] ss:$8 sps:$4 sm:$0xff]  }
 0x441   :  { %v3224_v13 = vmax.f32 %v10360_v11, %v3128_v34  ;;  %v6949_v44 = vld [vmem:[#allocation4 + $0x394] ss:$8 sps:$4 sm:$0xff]   ;;  %v6947_v42 = vld [vmem:[#allocation4 + $0x390] ss:$8 sps:$4 sm:$0xff]   ;;  %v6952_v1 = vld [vmem:[#allocation4 + $0x3a4] ss:$8 sps:$4 sm:$0xff]  }
 0x442   :  { %v3225_v0 = vmax.f32 %v10361_v41, %v3129_v6  ;;  %v6950_v60 = vld [vmem:[#allocation4 + $0x3a0] ss:$8 sps:$4 sm:$0xff]   ;;  %v6953_v34 = vld [vmem:[#allocation4 + $0x3b0] ss:$8 sps:$4 sm:$0xff]   ;;  %v6958_v23 = vld [vmem:[#allocation4 + $0x3c4] ss:$8 sps:$4 sm:$0xff]  }
 0x443   :  { %v9826_v50 = vpack.c.bf16 %v3224_v13, %v3222_v45  ;;  %v6955_v45 = vld [vmem:[#allocation4 + $0x3b4] ss:$8 sps:$4 sm:$0xff]   ;;  %v6959_v11 = vld [vmem:[#allocation4 + $0x3d0] ss:$8 sps:$4 sm:$0xff]  }
 0x444   :  { %v9828_v25 = vpack.c.bf16 %v3225_v0, %v3223_v32  ;;  %v6956_v32 = vld [vmem:[#allocation4 + $0x3c0] ss:$8 sps:$4 sm:$0xff]   ;;  %v6961_v6 = vld [vmem:[#allocation4 + $0x3d4] ss:$8 sps:$4 sm:$0xff]   ;;  %v6964_v0 = vld [vmem:[#allocation4 + $0x3e4] ss:$8 sps:$4 sm:$0xff]  }
 0x445   :  { %v6989_v13 = vld [vmem:[%s10124_s5 + $0x40] sm:$0xff]  }
 0x446   :  { %v6990_v41 = vld [vmem:[%s10124_s5] sm:$0xff]   ;;  %6223 = vmatprep.subr.bf16.mxu1 %v6989_v13  ;;  %v7008_v13 = vld [vmem:[#allocation4 + $0x4c4] ss:$8 sps:$4 sm:$0xff]  }
 0x447   :  { %4622 = vmatmul.mubr.bf16.gmra.mrb[112].mxu0 %v9706_v2  ;;  %6224 = vmatpush3.bf16.msra.mxu1 %v6990_v41  ;;  %v7006_v41 = vld [vmem:[#allocation4 + $0x4c0] ss:$8 sps:$4 sm:$0xff]  }
 0x448   :  { %4664 = vmatprep.mubr.bf16.mxu0 %v9431_v18  ;;  %v6929_v18 = vld [vmem:[#allocation4 + $0x330] ss:$8 sps:$4 sm:$0xff]  }
 0x44f   :  { %4665 = vmatmul.mubr.bf16.vlgmr.msra.gmra.mrb[52].mxu0 %v9428_v56  ;;  %v6932_v56 = vld [vmem:[#allocation4 + $0x340] ss:$8 sps:$4 sm:$0xff]  }
 0x450   :  { %4826 = vmatpush1.bf16.msra.mxu0 %v6920_v4  ;;  %4674 = vmatprep.mubr.bf16.mxu0 %v9446_v53  ;;  %v6935_v53 = vld [vmem:[#allocation4 + $0x350] ss:$8 sps:$4 sm:$0xff]   ;;  %v6962_v4 = vld [vmem:[#allocation4 + $0x3e0] ss:$8 sps:$4 sm:$0xff]  }
 0x451   :  { %4827 = vmatprep.subr.bf16.mxu0 %v6925_v14  ;;  %v6967_v14 = vld [vmem:[#allocation4 + $0x3f4] ss:$8 sps:$4 sm:$0xff]  }
 0x454   :  { %4828 = vmatpush1.bf16.msra.mxu0 %v6923_v7  ;;  %v6965_v7 = vld [vmem:[#allocation4 + $0x3f0] ss:$8 sps:$4 sm:$0xff]  }
 0x455   :  { %4829 = vmatprep.subr.bf16.mxu0 %v6928_v27  ;;  %v6970_v27 = vld [vmem:[#allocation4 + $0x404] ss:$8 sps:$4 sm:$0xff]  }
 0x457   :  { %4675 = vmatmul.mubr.bf16.gmra.mrb[56].mxu0 %v9444_v22  ;;  %v6938_v22 = vld [vmem:[#allocation4 + $0x360] ss:$8 sps:$4 sm:$0xff]  }
 0x458   :  { %4684 = vmatprep.mubr.bf16.mxu0 %v9486_v31  ;;  %4830 = vmatpush1.bf16.msra.mxu0 %v6926_v20  ;;  %v7009_v20 = vld [vmem:[%s10124_s5 + $0x48] sm:$0xff]  }
 0x459   :  { %4831 = vmatprep.subr.bf16.mxu0 %v6931_v9  ;;  %v7010_v9 = vld [vmem:[%s10124_s5 + $0x8] sm:$0xff]   ;;  %6225 = vmatprep.subr.bf16.mxu1 %v7009_v20  ;;  %v7017_v20 = vld [vmem:[#allocation4 + $0x4f0] ss:$8 sps:$4 sm:$0xff]  }
 0x45a   :  { %6226 = vmatpush3.bf16.msra.mxu1 %v7010_v9  ;;  %v7022_v9 = vld [vmem:[%s10124_s5 + $0x58] sm:$0xff]  }
 0x45c   :  { %4832 = vmatpush1.bf16.msra.mxu0 %v6929_v18  ;;  %v6968_v18 = vld [vmem:[#allocation4 + $0x400] ss:$8 sps:$4 sm:$0xff]  }
 0x45d   :  { %4833 = vmatprep.subr.bf16.mxu0 %v6934_v48  ;;  %v6973_v48 = vld [vmem:[#allocation4 + $0x414] ss:$8 sps:$4 sm:$0xff]  }
 0x45f   :  { %4685 = vmatmul.mubr.bf16.gmra.mrb[60].mxu0 %v9483_v28 }
 0x460   :  { %4694 = vmatprep.mubr.bf16.mxu0 %v9502_v30  ;;  %4834 = vmatpush1.bf16.msra.mxu0 %v6932_v56  ;;  %v6971_v56 = vld [vmem:[#allocation4 + $0x410] ss:$8 sps:$4 sm:$0xff]  }
 0x461   :  { %4835 = vmatprep.subr.bf16.mxu0 %v6937_v58  ;;  %v6976_v58 = vld [vmem:[#allocation4 + $0x424] ss:$8 sps:$4 sm:$0xff]  }
 0x464   :  { %4836 = vmatpush1.bf16.msra.mxu0 %v6935_v53  ;;  %v6974_v53 = vld [vmem:[#allocation4 + $0x420] ss:$8 sps:$4 sm:$0xff]  }
 0x465   :  { %4837 = vmatprep.subr.bf16.mxu0 %v6940_v47  ;;  %v6979_v47 = vld [vmem:[#allocation4 + $0x434] ss:$8 sps:$4 sm:$0xff]  }
 0x467   :  { %4695 = vmatmul.mubr.bf16.gmra.mrb[64].mxu0 %v9500_v10 }
 0x468   :  { %4704 = vmatprep.mubr.bf16.mxu0 %v9542_v57  ;;  %4838 = vmatpush1.bf16.msra.mxu0 %v6938_v22  ;;  %v6982_v22 = vld [vmem:[#allocation4 + $0x444] ss:$8 sps:$4 sm:$0xff]  }
 0x469   :  { %4839 = vmatprep.subr.bf16.mxu0 %v6943_v55  ;;  %v6985_v55 = vld [vmem:[#allocation4 + $0x454] ss:$8 sps:$4 sm:$0xff]  }
 0x46c   :  { %4840 = vmatpush1.bf16.msra.mxu0 %v6941_v39  ;;  %v7021_v39 = vld [vmem:[%s10124_s5 + $0x10] sm:$0xff]  }
 0x46d   :  { %4841 = vmatprep.subr.bf16.mxu0 %v6946_v40  ;;  %v6988_v40 = vld [vmem:[#allocation4 + $0x464] ss:$8 sps:$4 sm:$0xff]  }
 0x46f   :  { %4705 = vmatmul.mubr.bf16.gmra.mrb[68].mxu0 %v9539_v33 }
 0x470   :  { %4714 = vmatprep.mubr.bf16.mxu0 %v9558_v15  ;;  %4842 = vmatpush1.bf16.msra.mxu0 %v6944_v21  ;;  %v6986_v21 = vld [vmem:[#allocation4 + $0x460] ss:$8 sps:$4 sm:$0xff]  }
 0x471   :  { %4843 = vmatprep.subr.bf16.mxu0 %v6949_v44  ;;  %v6993_v44 = vld [vmem:[#allocation4 + $0x474] ss:$8 sps:$4 sm:$0xff]  }
 0x474   :  { %4844 = vmatpush1.bf16.msra.mxu0 %v6947_v42  ;;  %v6991_v42 = vld [vmem:[#allocation4 + $0x470] ss:$8 sps:$4 sm:$0xff]  }
 0x475   :  { %4845 = vmatprep.subr.bf16.mxu0 %v6952_v1  ;;  %v6996_v1 = vld [vmem:[#allocation4 + $0x484] ss:$8 sps:$4 sm:$0xff]  }
 0x477   :  { %4715 = vmatmul.mubr.bf16.gmra.mrb[72].mxu0 %v9556_v37 }
 0x478   :  { %4724 = vmatprep.mubr.bf16.mxu0 %v9584_v8  ;;  %4846 = vmatpush1.bf16.msra.mxu0 %v6950_v60  ;;  %v6994_v60 = vld [vmem:[#allocation4 + $0x480] ss:$8 sps:$4 sm:$0xff]  }
 0x479   :  { %4847 = vmatprep.subr.bf16.mxu0 %v6955_v45  ;;  %v6999_v45 = vld [vmem:[#allocation4 + $0x494] ss:$8 sps:$4 sm:$0xff]  }
 0x47c   :  { %4848 = vmatpush1.bf16.msra.mxu0 %v6953_v34  ;;  %v6997_v34 = vld [vmem:[#allocation4 + $0x490] ss:$8 sps:$4 sm:$0xff]  }
 0x47d   :  { %4849 = vmatprep.subr.bf16.mxu0 %v6958_v23  ;;  %v7002_v23 = vld [vmem:[#allocation4 + $0x4a4] ss:$8 sps:$4 sm:$0xff]  }
 0x47f   :  { %4725 = vmatmul.mubr.bf16.gmra.mrb[76].mxu0 %v9581_v24 }
 0x480   :  { %4734 = vmatprep.mubr.bf16.mxu0 %v9595_v59  ;;  %4850 = vmatpush1.bf16.msra.mxu0 %v6956_v32  ;;  %v7000_v32 = vld [vmem:[#allocation4 + $0x4a0] ss:$8 sps:$4 sm:$0xff]  }
 0x481   :  { %4851 = vmatprep.subr.bf16.mxu0 %v6961_v6  ;;  %v7005_v6 = vld [vmem:[#allocation4 + $0x4b4] ss:$8 sps:$4 sm:$0xff]  }
 0x484   :  { %4852 = vmatpush1.bf16.msra.mxu0 %v6959_v11  ;;  %v7003_v11 = vld [vmem:[#allocation4 + $0x4b0] ss:$8 sps:$4 sm:$0xff]  }
 0x485   :  { %4853 = vmatprep.subr.bf16.mxu0 %v6964_v0  ;;  %v7013_v0 = vld [vmem:[#allocation4 + $0x4d4] ss:$8 sps:$4 sm:$0xff]  }
 0x487   :  { %4735 = vmatmul.mubr.bf16.gmra.mrb[80].mxu0 %v9593_v61 }
 0x488   :  { %4744 = vmatprep.mubr.bf16.mxu0 %v9620_v5  ;;  %4854 = vmatpush1.bf16.msra.mxu0 %v6962_v4  ;;  %v7011_v4 = vld [vmem:[#allocation4 + $0x4d0] ss:$8 sps:$4 sm:$0xff]  }
 0x489   :  { %4855 = vmatprep.subr.bf16.mxu0 %v6967_v14  ;;  %v7016_v14 = vld [vmem:[#allocation4 + $0x4e4] ss:$8 sps:$4 sm:$0xff]  }
 0x48c   :  { %4856 = vmatpush1.bf16.msra.mxu0 %v6965_v7  ;;  %v7014_v7 = vld [vmem:[#allocation4 + $0x4e0] ss:$8 sps:$4 sm:$0xff]  }
 0x48d   :  { %5018 = vmatprep.subr.bf16.mxu0 %v6970_v27  ;;  %v7019_v27 = vld [vmem:[#allocation4 + $0x4f4] ss:$8 sps:$4 sm:$0xff]  }
 0x48f   :  { %4745 = vmatmul.mubr.bf16.gmra.mrb[84].mxu0 %v9617_v49 }
 0x490   :  { %4754 = vmatprep.mubr.bf16.mxu0 %v9631_v17 }
 0x497   :  { %4755 = vmatmul.mubr.bf16.gmra.mrb[88].mxu0 %v9629_v46 }
 0x498   :  { %4764 = vmatprep.mubr.bf16.mxu0 %v9656_v19 }
 0x49f   :  { %4765 = vmatmul.mubr.bf16.gmra.mrb[92].mxu0 %v9653_v36 }
 0x4a0   :  { %4774 = vmatprep.mubr.bf16.mxu0 %v9667_v62 }
 0x4a7   :  { %4775 = vmatmul.mubr.bf16.gmra.mrb[96].mxu0 %v9665_v26 }
 0x4a8   :  { %4784 = vmatprep.mubr.bf16.mxu0 %v9697_v16 }
 0x4af   :  { %4785 = vmatmul.mubr.bf16.gmra.mrb[100].mxu0 %v9694_v38 }
 0x4b0   :  { %4794 = vmatprep.mubr.bf16.mxu0 %v9708_v35 }
 0x4b7   :  { %4795 = vmatmul.mubr.bf16.gmra.mrb[104].mxu0 %v9706_v2 }
 0x4b8   :  { %4804 = vmatprep.mubr.bf16.mxu0 %v9738_v12 }
 0x4bf   :  { %4805 = vmatmul.mubr.bf16.gmra.mrb[108].mxu0 %v9735_v63 }
 0x4c0   :  { %4814 = vmatprep.mubr.bf16.mxu0 %v9748_v51 }
 0x4c7   :  { %4815 = vmatmul.mubr.bf16.gmra.mrb[112].mxu0 %v9746_v43 }
 0x4c8   :  { %4857 = vmatprep.mubr.bf16.mxu0 %v9486_v31  ;;  %v6977_v31 = vld [vmem:[#allocation4 + $0x430] ss:$8 sps:$4 sm:$0xff]  }
 0x4cf   :  { %4858 = vmatmul.mubr.bf16.vlgmr.msra.gmra.mrb[52].mxu0 %v9483_v28  ;;  %v6980_v28 = vld [vmem:[#allocation4 + $0x440] ss:$8 sps:$4 sm:$0xff]  }
 0x4d0   :  { %5019 = vmatpush1.bf16.msra.mxu0 %v6968_v18  ;;  %4867 = vmatprep.mubr.bf16.mxu0 %v9502_v30  ;;  %v6983_v30 = vld [vmem:[#allocation4 + $0x450] ss:$8 sps:$4 sm:$0xff]  }
 0x4d1   :  { %5020 = vmatprep.subr.bf16.mxu0 %v6973_v48  ;;  %v7023_v18 = vld [vmem:[%s10124_s5 + $0x18] sm:$0xff]  }
 0x4d2   :  { %v10362_v48 = vld [vmem:[#allocation23_spill] sm:$0xff] }
 0x4d4   :  { %5021 = vmatpush1.bf16.msra.mxu0 %v6971_v56  ;;  %v7024_v56 = vld [vmem:[%s10124_s5 + $0x60] sm:$0xff]  }
 0x4d5   :  { %5022 = vmatprep.subr.bf16.mxu0 %v6976_v58  ;;  %v7025_v58 = vld [vmem:[%s10124_s5 + $0x20] sm:$0xff]  }
 0x4d7   :  { %4868 = vmatmul.mubr.bf16.gmra.mrb[56].mxu0 %v9500_v10  ;;  %v7020_v10 = vld [vmem:[%s10124_s5 + $0x50] sm:$0xff]  }
 0x4d8   :  { %4877 = vmatprep.mubr.bf16.mxu0 %v9542_v57  ;;  %5023 = vmatpush1.bf16.msra.mxu0 %v6974_v53  ;;  %v10363_v53 = vld [vmem:[#allocation22_spill] sm:$0xff] }
 0x4d9   :  { %5024 = vmatprep.subr.bf16.mxu0 %v6979_v47  ;;  %6227 = vmatprep.subr.bf16.mxu1 %v7020_v10  ;;  %v7026_v47 = vld [vmem:[%s10124_s5 + $0x68] sm:$0xff]  }
 0x4da   :  { %6228 = vmatpush3.bf16.msra.mxu1 %v7021_v39 }
 0x4db   :  { %6229 = vmatprep.subr.bf16.mxu1 %v7022_v9 }
 0x4dc   :  { %5025 = vmatpush1.bf16.msra.mxu0 %v6977_v31  ;;  %v7027_v31 = vld [vmem:[%s10124_s5 + $0x28] sm:$0xff]  }
 0x4dd   :  { %5026 = vmatprep.subr.bf16.mxu0 %v6982_v22  ;;  %v7028_v22 = vld [vmem:[%s10124_s5 + $0x70] sm:$0xff]  }
 0x4de   :  { %6230 = vmatpush3.bf16.msra.mxu1 %v7023_v18 }
 0x4df   :  { %4878 = vmatmul.mubr.bf16.gmra.mrb[60].mxu0 %v9539_v33  ;;  %6231 = vmatprep.subr.bf16.mxu1 %v7024_v56 }
 0x4e0   :  { %4887 = vmatprep.mubr.bf16.mxu0 %v9558_v15  ;;  %5027 = vmatpush1.bf16.msra.mxu0 %v6980_v28 }
 0x4e1   :  { %5028 = vmatprep.subr.bf16.mxu0 %v6985_v55 }
 0x4e2   :  { %6232 = vmatpush3.bf16.msra.mxu1 %v7025_v58 }
 0x4e3   :  { %6233 = vmatprep.subr.bf16.mxu1 %v7026_v47 }
 0x4e4   :  { %5029 = vmatpush1.bf16.msra.mxu0 %v6983_v30 }
 0x4e5   :  { %5030 = vmatprep.subr.bf16.mxu0 %v6988_v40 }
 0x4e6   :  { %6234 = vmatpush3.bf16.msra.mxu1 %v7027_v31 }
 0x4e7   :  { %4888 = vmatmul.mubr.bf16.gmra.mrb[64].mxu0 %v9556_v37  ;;  %6235 = vmatprep.subr.bf16.mxu1 %v7028_v22 }
 0x4e8   :  { %4897 = vmatprep.mubr.bf16.mxu0 %v9584_v8  ;;  %5031 = vmatpush1.bf16.msra.mxu0 %v6986_v21 }
 0x4e9   :  { %5032 = vmatprep.subr.bf16.mxu0 %v6993_v44 }
 0x4ec   :  { %5033 = vmatpush1.bf16.msra.mxu0 %v6991_v42 }
 0x4ed   :  { %5034 = vmatprep.subr.bf16.mxu0 %v6996_v1 }
 0x4ef   :  { %4898 = vmatmul.mubr.bf16.gmra.mrb[68].mxu0 %v9581_v24 }
 0x4f0   :  { %4907 = vmatprep.mubr.bf16.mxu0 %v9595_v59  ;;  %5035 = vmatpush1.bf16.msra.mxu0 %v6994_v60 }
 0x4f1   :  { %5036 = vmatprep.subr.bf16.mxu0 %v6999_v45 }
 0x4f4   :  { %5037 = vmatpush1.bf16.msra.mxu0 %v6997_v34 }
 0x4f5   :  { %5038 = vmatprep.subr.bf16.mxu0 %v7002_v23 }
 0x4f7   :  { %4908 = vmatmul.mubr.bf16.gmra.mrb[72].mxu0 %v9593_v61 }
 0x4f8   :  { %4917 = vmatprep.mubr.bf16.mxu0 %v9620_v5  ;;  %5039 = vmatpush1.bf16.msra.mxu0 %v7000_v32 }
 0x4f9   :  { %5040 = vmatprep.subr.bf16.mxu0 %v7005_v6 }
 0x4fc   :  { %5041 = vmatpush1.bf16.msra.mxu0 %v7003_v11 }
 0x4fd   :  { %5042 = vmatprep.subr.bf16.mxu0 %v7008_v13 }
 0x4ff   :  { %4918 = vmatmul.mubr.bf16.gmra.mrb[76].mxu0 %v9617_v49 }
 0x500   :  { %4927 = vmatprep.mubr.bf16.mxu0 %v9631_v17  ;;  %5043 = vmatpush1.bf16.msra.mxu0 %v7006_v41 }
 0x501   :  { %5044 = vmatprep.subr.bf16.mxu0 %v7013_v0 }
 0x504   :  { %5045 = vmatpush1.bf16.msra.mxu0 %v7011_v4 }
 0x505   :  { %5046 = vmatprep.subr.bf16.mxu0 %v7016_v14 }
 0x507   :  { %4928 = vmatmul.mubr.bf16.gmra.mrb[80].mxu0 %v9629_v46 }
 0x508   :  { %4937 = vmatprep.mubr.bf16.mxu0 %v9656_v19  ;;  %5047 = vmatpush1.bf16.msra.mxu0 %v7014_v7 }
 0x509   :  { %5048 = vmatprep.subr.bf16.mxu0 %v7019_v27 }
 0x50c   :  { %5049 = vmatpush1.bf16.msra.mxu0 %v7017_v20 }
 0x50f   :  { %4938 = vmatmul.mubr.bf16.gmra.mrb[84].mxu0 %v9653_v36 }
 0x510   :  { %4947 = vmatprep.mubr.bf16.mxu0 %v9667_v62 }
 0x517   :  { %4948 = vmatmul.mubr.bf16.gmra.mrb[88].mxu0 %v9665_v26 }
 0x518   :  { %4957 = vmatprep.mubr.bf16.mxu0 %v9697_v16 }
 0x51f   :  { %4958 = vmatmul.mubr.bf16.gmra.mrb[92].mxu0 %v9694_v38 }
 0x520   :  { %4967 = vmatprep.mubr.bf16.mxu0 %v9708_v35 }
 0x527   :  { %4968 = vmatmul.mubr.bf16.gmra.mrb[96].mxu0 %v9706_v2 }
 0x528   :  { %4977 = vmatprep.mubr.bf16.mxu0 %v9738_v12 }
 0x52f   :  { %4978 = vmatmul.mubr.bf16.gmra.mrb[100].mxu0 %v9735_v63 }
 0x530   :  { %4987 = vmatprep.mubr.bf16.mxu0 %v9748_v51 }
 0x537   :  { %4988 = vmatmul.mubr.bf16.gmra.mrb[104].mxu0 %v9746_v43 }
 0x538   :  { %4997 = vmatprep.mubr.bf16.mxu0 %v9778_v3 }
 0x53f   :  { %4998 = vmatmul.mubr.bf16.gmra.mrb[108].mxu0 %v9775_v54 }
 0x540   :  { %5007 = vmatprep.mubr.bf16.mxu0 %v10362_v48 }
 0x547   :  { %5008 = vmatmul.mubr.bf16.gmra.mrb[112].mxu0 %v10363_v53 }
 0x548   :  { %5050 = vmatprep.mubr.bf16.mxu0 %v9542_v57  ;;  %v7030_v57 = vld [vmem:[%s10124_s5 + $0x78] sm:$0xff]  }
 0x54f   :  { %5051 = vmatmul.mubr.bf16.vlgmr.msra.gmra.mrb[52].mxu0 %v9539_v33  ;;  %v7029_v33 = vld [vmem:[%s10124_s5 + $0x30] sm:$0xff]  }
 0x550   :  { %5060 = vmatprep.mubr.bf16.mxu0 %v9558_v15  ;;  %6236 = vmatpush3.bf16.msra.mxu1 %v7029_v33  ;;  %v7032_v15 = vld [vmem:[%s10124_s5 + $0xc0] sm:$0xff]  }
 0x551   :  { %6237 = vmatprep.subr.bf16.mxu1 %v7030_v57 }
 0x557   :  { %5061 = vmatmul.mubr.bf16.gmra.mrb[56].mxu0 %v9556_v37  ;;  %v7031_v37 = vld [vmem:[%s10124_s5 + $0x38] sm:$0xff]  }
 0x558   :  { %5070 = vmatprep.mubr.bf16.mxu0 %v9584_v8  ;;  %6238 = vmatpush3.bf16.msra.mxu1 %v7031_v37 }
 0x559   :  { %6251 = vmatprep.subr.bf16.mxu1 %v7032_v15 }
 0x55f   :  { %5071 = vmatmul.mubr.bf16.gmra.mrb[60].mxu0 %v9581_v24 }
 0x560   :  { %5080 = vmatprep.mubr.bf16.mxu0 %v9595_v59 }
 0x567   :  { %5081 = vmatmul.mubr.bf16.gmra.mrb[64].mxu0 %v9593_v61 }
 0x568   :  { %5090 = vmatprep.mubr.bf16.mxu0 %v9620_v5 }
 0x56f   :  { %5091 = vmatmul.mubr.bf16.gmra.mrb[68].mxu0 %v9617_v49  ;;  %v3434_v49 = vld [vmem:[%s10123_s4] sm:$0x3] }
 0x570   :  { %5100 = vmatprep.mubr.bf16.mxu0 %v9631_v17 }
 0x577   :  { %5101 = vmatmul.mubr.bf16.gmra.mrb[72].mxu0 %v9629_v46 }
 0x578   :  { %5110 = vmatprep.mubr.bf16.mxu0 %v9656_v19 }
 0x57f   :  { %5111 = vmatmul.mubr.bf16.gmra.mrb[76].mxu0 %v9653_v36  ;;  %v10364_v36 = vld [vmem:[#allocation37_spill] sm:$0xff] }
 0x580   :  { %5120 = vmatprep.mubr.bf16.mxu0 %v9667_v62  ;;  %v10365_v19 = vsub.s32 0, %v10364_v36 }
 0x587   :  { %5121 = vmatmul.mubr.bf16.gmra.mrb[80].mxu0 %v9665_v26  ;;  %v9983_v26 = vrot.slane %v3434_v49, %v10365_v19 }
 0x588   :  { %5130 = vmatprep.mubr.bf16.mxu0 %v9697_v16 }
 0x58f   :  { %5131 = vmatmul.mubr.bf16.gmra.mrb[84].mxu0 %v9694_v38  ;;  %v10366_v38 = vsub.s32 1, %v10364_v36 }
 0x590   :  { %5140 = vmatprep.mubr.bf16.mxu0 %v9708_v35 }
 0x591   :  { %v9987_v16 = vrot.slane %v3434_v49, %v10366_v38 }
 0x597   :  { %5141 = vmatmul.mubr.bf16.gmra.mrb[88].mxu0 %v9706_v2 }
 0x598   :  { %5150 = vmatprep.mubr.bf16.mxu0 %v9738_v12 }
 0x59f   :  { %5151 = vmatmul.mubr.bf16.gmra.mrb[92].mxu0 %v9735_v63 }
 0x5a0   :  { %5160 = vmatprep.mubr.bf16.mxu0 %v9748_v51 }
 0x5a7   :  { %5161 = vmatmul.mubr.bf16.gmra.mrb[96].mxu0 %v9746_v43 }
 0x5a8   :  { %5170 = vmatprep.mubr.bf16.mxu0 %v9778_v3 }
 0x5af   :  { %5171 = vmatmul.mubr.bf16.gmra.mrb[100].mxu0 %v9775_v54 }
 0x5b0   :  { %5180 = vmatprep.mubr.bf16.mxu0 %v10362_v48 }
 0x5b7   :  { %5181 = vmatmul.mubr.bf16.gmra.mrb[104].mxu0 %v10363_v53 }
 0x5b8   :  { %5190 = vmatprep.mubr.bf16.mxu0 %v9818_v52 }
 0x5bf   :  { %5191 = vmatmul.mubr.bf16.gmra.mrb[108].mxu0 %v9815_v29 }
 0x5c0   :  { %5200 = vmatprep.mubr.bf16.mxu0 %v9828_v25 }
 0x5c7   :  { %5201 = vmatmul.mubr.bf16.gmra.mrb[112].mxu0 %v9826_v50 }
 0x622   :  { %v5052_v24 = vpop.f32.mrb[52].mxu0 }
 0x623   :  { %v5054_v8 = vpop.f32.mrb[53].mxu0  ;;  %v6329_v2 = vadd.f32 %v5052_v24, %v9983_v26 }
 0x624   :  { %v5056_v61 = vpop.f32.mrb[54].mxu0  ;;  %v6330_v35 = vadd.f32 %v5054_v8, %v9987_v16 }
 0x625   :  { %v5058_v59 = vpop.f32.mrb[55].mxu0  ;;  %v6331_v12 = vadd.f32 %v5056_v61, %v9983_v26  ;;  %v5211_v52 = vmax.f32 %v6329_v2, 0.0 }
 0x626   :  { %v6332_v54 = vadd.f32 %v5058_v59, %v9987_v16  ;;  %v5212_v55 = vmax.f32 %v6330_v35, 0.0 }
 0x627   :  { %v5213_v39 = vmax.f32 %v6331_v12, 0.0 }
 0x628   :  { %v5214_v44 = vmax.f32 %v6332_v54, 0.0 }
 0x62a   :  { %v5062_v5 = vpop.f32.mrb[56].mxu0 }
 0x62b   :  { %v5064_v46 = vpop.f32.mrb[57].mxu0  ;;  %v6333_v60 = vadd.f32 %v5062_v5, %v9983_v26 }
 0x62c   :  { %v5066_v17 = vpop.f32.mrb[58].mxu0  ;;  %v6334_v34 = vadd.f32 %v5064_v46, %v9987_v16 }
 0x62d   :  { %v5068_v62 = vpop.f32.mrb[59].mxu0  ;;  %v6335_v11 = vadd.f32 %v5066_v17, %v9983_v26  ;;  %v5215_v27 = vmax.f32 %v6333_v60, 0.0 }
 0x62e   :  { %v6336_v0 = vadd.f32 %v5068_v62, %v9987_v16  ;;  %v5216_v48 = vmax.f32 %v6334_v34, 0.0 }
 0x62f   :  { %v5217_v47 = vmax.f32 %v6335_v11, 0.0 }
 0x630   :  { %v5218_v33 = vmax.f32 %v6336_v0, 0.0 }
 0x632   :  { %v5072_v63 = vpop.f32.mrb[60].mxu0 }
 0x633   :  { %v6337_v43 = vadd.f32 %v5072_v63, %v9983_v26  ;;  %v5074_v51 = vpop.f32.mrb[61].mxu0 }
 0x634   :  { %v6338_v3 = vadd.f32 %v5074_v51, %v9987_v16  ;;  %v5076_v29 = vpop.f32.mrb[62].mxu0 }
 0x635   :  { %v5219_v50 = vmax.f32 %v6337_v43, 0.0  ;;  %v6339_v25 = vadd.f32 %v5076_v29, %v9983_v26  ;;  %v5078_v28 = vpop.f32.mrb[63].mxu0 }
 0x636   :  { %v5220_v30 = vmax.f32 %v6338_v3, 0.0  ;;  %v6340_v10 = vadd.f32 %v5078_v28, %v9987_v16 }
 0x637   :  { %v5275_v40 = vmax.f32 %v5211_v52, %v5219_v50  ;;  %v5221_v21 = vmax.f32 %v6339_v25, 0.0 }
 0x638   :  { %v5276_v42 = vmax.f32 %v5212_v55, %v5220_v30  ;;  %v5222_v1 = vmax.f32 %v6340_v10, 0.0 }
 0x639   :  { %v5277_v45 = vmax.f32 %v5213_v39, %v5221_v21 }
 0x63a   :  { %v5307_v23 = vmax.f32 %v5275_v40, %v5276_v42  ;;  %v5278_v32 = vmax.f32 %v5214_v44, %v5222_v1  ;;  %v5082_v6 = vpop.f32.mrb[64].mxu0 }
 0x63b   :  { %v6341_v13 = vadd.f32 %v5082_v6, %v9983_v26  ;;  %v5084_v41 = vpop.f32.mrb[65].mxu0 }
 0x63c   :  { %v5308_v4 = vmax.f32 %v5277_v45, %v5278_v32  ;;  %v6342_v14 = vadd.f32 %v5084_v41, %v9987_v16  ;;  %v5086_v7 = vpop.f32.mrb[66].mxu0 }
 0x63d   :  { %v5223_v20 = vmax.f32 %v6341_v13, 0.0  ;;  %v6343_v9 = vadd.f32 %v5086_v7, %v9983_v26  ;;  %v5088_v18 = vpop.f32.mrb[67].mxu0 }
 0x63e   :  { %v10004_v56 = vpack.c.bf16 %v5308_v4, %v5307_v23  ;;  %v5224_v58 = vmax.f32 %v6342_v14, 0.0  ;;  %v6344_v53 = vadd.f32 %v5088_v18, %v9987_v16 }
 0x63f   :  { %v5279_v31 = vmax.f32 %v5215_v27, %v5223_v20  ;;  %v5225_v22 = vmax.f32 %v6343_v9, 0.0 }
 0x640   :  { %v5280_v57 = vmax.f32 %v5216_v48, %v5224_v58  ;;  %v5226_v37 = vmax.f32 %v6344_v53, 0.0 }
 0x641   :  { %v5281_v15 = vmax.f32 %v5217_v47, %v5225_v22 }
 0x642   :  { %v5309_v24 = vmax.f32 %v5279_v31, %v5280_v57  ;;  %v5282_v8 = vmax.f32 %v5218_v33, %v5226_v37  ;;  %v5092_v61 = vpop.f32.mrb[68].mxu0  ;;  %v7033_v31 = vld [vmem:[%s10124_s5 + $0x80] sm:$0xff]   ;;  %v7034_v37 = vld [vmem:[%s10124_s5 + $0xc8] sm:$0xff]  }
 0x643   :  { %v5094_v59 = vpop.f32.mrb[69].mxu0  ;;  %v6345_v2 = vadd.f32 %v5092_v61, %v9983_v26 }
 0x644   :  { %v5310_v49 = vmax.f32 %v5281_v15, %v5282_v8  ;;  %v5096_v5 = vpop.f32.mrb[70].mxu0  ;;  %v6346_v35 = vadd.f32 %v5094_v59, %v9987_v16 }
 0x645   :  { %v5098_v46 = vpop.f32.mrb[71].mxu0  ;;  %v6347_v12 = vadd.f32 %v5096_v5, %v9983_v26  ;;  %v5227_v52 = vmax.f32 %v6345_v2, 0.0 }
 0x646   :  { %v10007_v17 = vpack.c.bf16 %v5310_v49, %v5309_v24  ;;  %v6348_v54 = vadd.f32 %v5098_v46, %v9987_v16  ;;  %v5228_v55 = vmax.f32 %v6346_v35, 0.0  ;;  %v7035_v46 = vld [vmem:[%s10124_s5 + $0x88] sm:$0xff]  }
 0x647   :  { %v5229_v39 = vmax.f32 %v6347_v12, 0.0 }
 0x648   :  { %v5230_v44 = vmax.f32 %v6348_v54, 0.0  ;;  %v7040_v54 = vld [vmem:[%s10124_s5 + $0xe0] sm:$0xff]  }
 0x64a   :  { %v5102_v36 = vpop.f32.mrb[72].mxu0 }
 0x64b   :  { %v5104_v19 = vpop.f32.mrb[73].mxu0  ;;  %v6349_v60 = vadd.f32 %v5102_v36, %v9983_v26 }
 0x64c   :  { %v5106_v62 = vpop.f32.mrb[74].mxu0  ;;  %v6350_v34 = vadd.f32 %v5104_v19, %v9987_v16  ;;  %v7036_v19 = vld [vmem:[%s10124_s5 + $0xd0] sm:$0xff]  }
 0x64d   :  { %v5108_v38 = vpop.f32.mrb[75].mxu0  ;;  %v6351_v11 = vadd.f32 %v5106_v62, %v9983_v26  ;;  %v5231_v27 = vmax.f32 %v6349_v60, 0.0 }
 0x64e   :  { %v6352_v0 = vadd.f32 %v5108_v38, %v9987_v16  ;;  %v5232_v48 = vmax.f32 %v6350_v34, 0.0 }
 0x64f   :  { %v5233_v22 = vmax.f32 %v6351_v11, 0.0  ;;  %v7045_v11 = vld [vmem:[%s10124_s5 + $0xb0] sm:$0xff]  }
 0x650   :  { %v5234_v15 = vmax.f32 %v6352_v0, 0.0 }
 0x652   :  { %v5112_v63 = vpop.f32.mrb[76].mxu0 }
 0x653   :  { %v6353_v43 = vadd.f32 %v5112_v63, %v9983_v26  ;;  %v5114_v51 = vpop.f32.mrb[77].mxu0  ;;  %v7038_v63 = vld [vmem:[%s10124_s5 + $0xd8] sm:$0xff]  }
 0x654   :  { %v6354_v3 = vadd.f32 %v5114_v51, %v9987_v16  ;;  %v5116_v29 = vpop.f32.mrb[78].mxu0 }
 0x655   :  { %v5235_v50 = vmax.f32 %v6353_v43, 0.0  ;;  %v6355_v25 = vadd.f32 %v5116_v29, %v9983_v26  ;;  %v5118_v28 = vpop.f32.mrb[79].mxu0  ;;  %v7039_v43 = vld [vmem:[%s10124_s5 + $0x98] sm:$0xff]  }
 0x656   :  { %v5236_v30 = vmax.f32 %v6354_v3, 0.0  ;;  %v6356_v10 = vadd.f32 %v5118_v28, %v9987_v16 }
 0x657   :  { %v5283_v40 = vmax.f32 %v5227_v52, %v5235_v50  ;;  %v5237_v21 = vmax.f32 %v6355_v25, 0.0  ;;  %v7041_v52 = vld [vmem:[%s10124_s5 + $0xa0] sm:$0xff]  }
 0x658   :  { %v5284_v42 = vmax.f32 %v5228_v55, %v5236_v30  ;;  %v5238_v1 = vmax.f32 %v6356_v10, 0.0  ;;  %v7043_v55 = vld [vmem:[%s10124_s5 + $0xa8] sm:$0xff]  }
 0x659   :  { %v5285_v45 = vmax.f32 %v5229_v39, %v5237_v21 }
 0x65a   :  { %v5311_v23 = vmax.f32 %v5283_v40, %v5284_v42  ;;  %v5286_v32 = vmax.f32 %v5230_v44, %v5238_v1  ;;  %v5122_v6 = vpop.f32.mrb[80].mxu0  ;;  %v7044_v40 = vld [vmem:[%s10124_s5 + $0xf0] sm:$0xff]  }
 0x65b   :  { %v6357_v13 = vadd.f32 %v5122_v6, %v9983_v26  ;;  %v5124_v41 = vpop.f32.mrb[81].mxu0 }
 0x65c   :  { %v5312_v4 = vmax.f32 %v5285_v45, %v5286_v32  ;;  %v6358_v14 = vadd.f32 %v5124_v41, %v9987_v16  ;;  %v5126_v7 = vpop.f32.mrb[82].mxu0 }
 0x65d   :  { %v5239_v20 = vmax.f32 %v6357_v13, 0.0  ;;  %v6359_v9 = vadd.f32 %v5126_v7, %v9983_v26  ;;  %v5128_v18 = vpop.f32.mrb[83].mxu0 }
 0x65e   :  { %v5240_v58 = vmax.f32 %v6358_v14, 0.0  ;;  %v6360_v53 = vadd.f32 %v5128_v18, %v9987_v16  ;;  %v5325_v47 = vpack.c.bf16 %v5312_v4, %v5311_v23  ;;  %v7046_v4 = vld [vmem:[%s10124_s5 + $0xf8] sm:$0xff]  }
 0x65f   :  { %v5287_v33 = vmax.f32 %v5231_v27, %v5239_v20  ;;  %v5241_v57 = vmax.f32 %v6359_v9, 0.0 }
 0x660   :  { %v5288_v24 = vmax.f32 %v5232_v48, %v5240_v58  ;;  %v5242_v8 = vmax.f32 %v6360_v53, 0.0  ;;  %5626 = vmatprep.mubr.bf16.mxu1 %v5325_v47  ;;  %v7047_v47 = vld [vmem:[%s10124_s5 + $0xb8] sm:$0xff]  }
 0x661   :  { %v5289_v61 = vmax.f32 %v5233_v22, %v5241_v57  ;;  %5627 = vmatmul.mubr.bf16.vlgmr.msra.gmra.mrb[76].mxu1 %v10004_v56  ;;  %v7037_v56 = vld [vmem:[%s10124_s5 + $0x90] sm:$0xff]  }
 0x662   :  { %v5313_v59 = vmax.f32 %v5287_v33, %v5288_v24  ;;  %v5290_v49 = vmax.f32 %v5234_v15, %v5242_v8  ;;  %v5132_v5 = vpop.f32.mrb[84].mxu0  ;;  %6252 = vmatpush3.bf16.msra.mxu1 %v7033_v31 }
 0x663   :  { %v5134_v36 = vpop.f32.mrb[85].mxu0  ;;  %6253 = vmatprep.subr.bf16.mxu1 %v7034_v37  ;;  %v6361_v50 = vadd.f32 %v5132_v5, %v9983_v26 }
 0x664   :  { %v5314_v62 = vmax.f32 %v5289_v61, %v5290_v49  ;;  %v5136_v38 = vpop.f32.mrb[86].mxu0  ;;  %v6362_v25 = vadd.f32 %v5134_v36, %v9987_v16 }
 0x665   :  { %v5138_v2 = vpop.f32.mrb[87].mxu0  ;;  %v6363_v30 = vadd.f32 %v5136_v38, %v9983_v26  ;;  %v5243_v1 = vmax.f32 %v6361_v50, 0.0 }
 0x666   :  { %v5326_v35 = vpack.c.bf16 %v5314_v62, %v5313_v59  ;;  %6254 = vmatpush3.bf16.msra.mxu1 %v7035_v46  ;;  %v6364_v21 = vadd.f32 %v5138_v2, %v9987_v16  ;;  %v5244_v23 = vmax.f32 %v6362_v25, 0.0 }
 0x667   :  { %6255 = vmatprep.subr.bf16.mxu1 %v7036_v19  ;;  %v5245_v13 = vmax.f32 %v6363_v30, 0.0 }
 0x668   :  { %5634 = vmatprep.mubr.bf16.mxu1 %v5326_v35  ;;  %v5246_v14 = vmax.f32 %v6364_v21, 0.0 }
 0x669   :  { %5635 = vmatmul.mubr.bf16.gmra.mrb[80].mxu1 %v10007_v17  ;;  %v7042_v17 = vld [vmem:[%s10124_s5 + $0xe8] sm:$0xff]  }
 0x66a   :  { %v5142_v12 = vpop.f32.mrb[88].mxu0  ;;  %6256 = vmatpush3.bf16.msra.mxu1 %v7037_v56 }
 0x66b   :  { %v5144_v51 = vpop.f32.mrb[89].mxu0  ;;  %6257 = vmatprep.subr.bf16.mxu1 %v7038_v63  ;;  %v6365_v20 = vadd.f32 %v5142_v12, %v9983_v26 }
 0x66c   :  { %v5146_v3 = vpop.f32.mrb[90].mxu0  ;;  %v6366_v18 = vadd.f32 %v5144_v51, %v9987_v16 }
 0x66d   :  { %v5148_v29 = vpop.f32.mrb[91].mxu0  ;;  %v6367_v31 = vadd.f32 %v5146_v3, %v9983_v26  ;;  %v5247_v8 = vmax.f32 %v6365_v20, 0.0 }
 0x66e   :  { %6258 = vmatpush3.bf16.msra.mxu1 %v7039_v43  ;;  %v6368_v57 = vadd.f32 %v5148_v29, %v9987_v16  ;;  %v5248_v5 = vmax.f32 %v6366_v18, 0.0 }
 0x66f   :  { %6259 = vmatprep.subr.bf16.mxu1 %v7040_v54  ;;  %v5249_v62 = vmax.f32 %v6367_v31, 0.0 }
 0x670   :  { %v5250_v35 = vmax.f32 %v6368_v57, 0.0 }
 0x672   :  { %v5152_v28 = vpop.f32.mrb[92].mxu0  ;;  %6260 = vmatpush3.bf16.msra.mxu1 %v7041_v52 }
 0x673   :  { %v6369_v10 = vadd.f32 %v5152_v28, %v9983_v26  ;;  %v5154_v39 = vpop.f32.mrb[93].mxu0  ;;  %6261 = vmatprep.subr.bf16.mxu1 %v7042_v17 }
 0x674   :  { %v6370_v44 = vadd.f32 %v5154_v39, %v9987_v16  ;;  %v5156_v42 = vpop.f32.mrb[94].mxu0 }
 0x675   :  { %v5251_v60 = vmax.f32 %v6369_v10, 0.0  ;;  %v6371_v45 = vadd.f32 %v5156_v42, %v9983_v26  ;;  %v5158_v34 = vpop.f32.mrb[95].mxu0 }
 0x676   :  { %v5252_v32 = vmax.f32 %v6370_v44, 0.0  ;;  %v6372_v6 = vadd.f32 %v5158_v34, %v9987_v16  ;;  %6262 = vmatpush3.bf16.msra.mxu1 %v7043_v55 }
 0x677   :  { %v5291_v41 = vmax.f32 %v5243_v1, %v5251_v60  ;;  %v5253_v0 = vmax.f32 %v6371_v45, 0.0  ;;  %6263 = vmatprep.subr.bf16.mxu1 %v7044_v40 }
 0x678   :  { %v5292_v7 = vmax.f32 %v5244_v23, %v5252_v32  ;;  %v5254_v27 = vmax.f32 %v6372_v6, 0.0 }
 0x679   :  { %v5293_v9 = vmax.f32 %v5245_v13, %v5253_v0 }
 0x67a   :  { %v5315_v48 = vmax.f32 %v5291_v41, %v5292_v7  ;;  %v5294_v58 = vmax.f32 %v5246_v14, %v5254_v27  ;;  %v5162_v53 = vpop.f32.mrb[96].mxu0  ;;  %6264 = vmatpush3.bf16.msra.mxu1 %v7045_v11 }
 0x67b   :  { %v6373_v22 = vadd.f32 %v5162_v53, %v9983_v26  ;;  %v5164_v33 = vpop.f32.mrb[97].mxu0  ;;  %6265 = vmatprep.subr.bf16.mxu1 %v7046_v4 }
 0x67c   :  { %v5316_v37 = vmax.f32 %v5293_v9, %v5294_v58  ;;  %v6374_v15 = vadd.f32 %v5164_v33, %v9987_v16  ;;  %v5166_v24 = vpop.f32.mrb[98].mxu0 }
 0x67d   :  { %v5255_v61 = vmax.f32 %v6373_v22, 0.0  ;;  %v6375_v59 = vadd.f32 %v5166_v24, %v9983_v26  ;;  %v5168_v49 = vpop.f32.mrb[99].mxu0 }
 0x67e   :  { %v10087_v46 = vpack.c.bf16 %v5316_v37, %v5315_v48  ;;  %v5256_v36 = vmax.f32 %v6374_v15, 0.0  ;;  %v6376_v19 = vadd.f32 %v5168_v49, %v9987_v16  ;;  %6266 = vmatpush3.bf16.msra.mxu1 %v7047_v47 }
 0x67f   :  { %v5295_v38 = vmax.f32 %v5247_v8, %v5255_v61  ;;  %v5257_v2 = vmax.f32 %v6375_v59, 0.0 }
 0x680   :  { %v5296_v56 = vmax.f32 %v5248_v5, %v5256_v36  ;;  %v5258_v63 = vmax.f32 %v6376_v19, 0.0 }
 0x681   :  { %v5297_v12 = vmax.f32 %v5249_v62, %v5257_v2 }
 0x682   :  { %v5317_v43 = vmax.f32 %v5295_v38, %v5296_v56  ;;  %v5298_v51 = vmax.f32 %v5250_v35, %v5258_v63  ;;  %v5172_v54 = vpop.f32.mrb[100].mxu0 }
 0x683   :  { %v5174_v3 = vpop.f32.mrb[101].mxu0  ;;  %v6377_v10 = vadd.f32 %v5172_v54, %v9983_v26 }
 0x684   :  { %v5318_v29 = vmax.f32 %v5297_v12, %v5298_v51  ;;  %v5176_v52 = vpop.f32.mrb[102].mxu0  ;;  %v6378_v39 = vadd.f32 %v5174_v3, %v9987_v16 }
 0x685   :  { %v5178_v17 = vpop.f32.mrb[103].mxu0  ;;  %v6379_v21 = vadd.f32 %v5176_v52, %v9983_v26  ;;  %v5259_v34 = vmax.f32 %v6377_v10, 0.0  ;;  %v7049_v52 = vld [vmem:[#allocation7 + $0x8] sm:$0xff]  }
 0x686   :  { %v5328_v50 = vpack.c.bf16 %v5318_v29, %v5317_v43  ;;  %v6380_v1 = vadd.f32 %v5178_v17, %v9987_v16  ;;  %v5260_v11 = vmax.f32 %v6378_v39, 0.0  ;;  %v7048_v29 = vld [vmem:[#allocation7] sm:$0xff]   ;;  %v7051_v17 = vld [vmem:[#allocation7 + $0x18] sm:$0xff]  }
 0x687   :  { %v5261_v0 = vmax.f32 %v6379_v21, 0.0  ;;  %6289 = vmatprep.subr.bf16.mxu1 %v7048_v29 }
 0x688   :  { %v5262_v7 = vmax.f32 %v6380_v1, 0.0 }
 0x68a   :  { %v5182_v25 = vpop.f32.mrb[104].mxu0 }
 0x68b   :  { %v5184_v28 = vpop.f32.mrb[105].mxu0  ;;  %v6381_v9 = vadd.f32 %v5182_v25, %v9983_v26  ;;  %v7052_v25 = vld [vmem:[#allocation7 + $0x20] sm:$0xff]  }
 0x68c   :  { %v5186_v55 = vpop.f32.mrb[106].mxu0  ;;  %v6382_v48 = vadd.f32 %v5184_v28, %v9987_v16  ;;  %v7054_v28 = vld [vmem:[#allocation7 + $0x30] sm:$0xff]  }
 0x68d   :  { %v5188_v30 = vpop.f32.mrb[107].mxu0  ;;  %v6383_v31 = vadd.f32 %v5186_v55, %v9983_v26  ;;  %v5263_v8 = vmax.f32 %v6381_v9, 0.0 }
 0x68e   :  { %v6384_v57 = vadd.f32 %v5188_v30, %v9987_v16  ;;  %v5264_v5 = vmax.f32 %v6382_v48, 0.0 }
 0x68f   :  { %v5265_v38 = vmax.f32 %v6383_v31, 0.0 }
 0x690   :  { %v5266_v56 = vmax.f32 %v6384_v57, 0.0 }
 0x692   :  { %v5192_v40 = vpop.f32.mrb[108].mxu0 }
 0x693   :  { %v6385_v44 = vadd.f32 %v5192_v40, %v9983_v26  ;;  %v5194_v42 = vpop.f32.mrb[109].mxu0 }
 0x694   :  { %v6386_v60 = vadd.f32 %v5194_v42, %v9987_v16  ;;  %v5196_v45 = vpop.f32.mrb[110].mxu0 }
 0x695   :  { %v5267_v23 = vmax.f32 %v6385_v44, 0.0  ;;  %v6387_v32 = vadd.f32 %v5196_v45, %v9983_v26  ;;  %v5198_v6 = vpop.f32.mrb[111].mxu0 }
 0x696   :  { %v5268_v13 = vmax.f32 %v6386_v60, 0.0  ;;  %v6388_v41 = vadd.f32 %v5198_v6, %v9987_v16 }
 0x697   :  { %v5299_v4 = vmax.f32 %v5259_v34, %v5267_v23  ;;  %v5269_v14 = vmax.f32 %v6387_v32, 0.0  ;;  %v6181_v23 = vld [vmem:[#allocation6] ss:$0 sm:$0xff] }
 0x698   :  { %v5300_v27 = vmax.f32 %v5260_v11, %v5268_v13  ;;  %v5270_v20 = vmax.f32 %v6388_v41, 0.0 }
 0x699   :  { %v5301_v18 = vmax.f32 %v5261_v0, %v5269_v14 }
 0x69a   :  { %v5319_v58 = vmax.f32 %v5299_v4, %v5300_v27  ;;  %v5302_v53 = vmax.f32 %v5262_v7, %v5270_v20  ;;  %v5202_v47 = vpop.f32.mrb[112].mxu0 }
 0x69b   :  { %v6389_v22 = vadd.f32 %v5202_v47, %v9983_v26  ;;  %v5204_v33 = vpop.f32.mrb[113].mxu0 }
 0x69c   :  { %v5320_v37 = vmax.f32 %v5301_v18, %v5302_v53  ;;  %v6390_v15 = vadd.f32 %v5204_v33, %v9987_v16  ;;  %v5206_v24 = vpop.f32.mrb[114].mxu0 }
 0x69d   :  { %v5271_v61 = vmax.f32 %v6389_v22, 0.0  ;;  %v6391_v59 = vadd.f32 %v5206_v24, %v9983_v26  ;;  %v5208_v49 = vpop.f32.mrb[115].mxu0 }
 0x69e   :  { %v5272_v36 = vmax.f32 %v6390_v15, 0.0  ;;  %v6392_v19 = vadd.f32 %v5208_v49, %v9987_v16  ;;  %v5329_v62 = vpack.c.bf16 %v5320_v37, %v5319_v58  ;;  %v7050_v16 = vld [vmem:[#allocation7 + $0x10] sm:$0xff]  }
 0x69f   :  { %v5303_v2 = vmax.f32 %v5263_v8, %v5271_v61  ;;  %v5273_v35 = vmax.f32 %v6391_v59, 0.0  ;;  %v6214_v59 = vld [vmem:[#allocation9] ss:$0 sm:$0xff] }
 0x6a0   :  { %v5304_v63 = vmax.f32 %v5264_v5, %v5272_v36  ;;  %v5274_v12 = vmax.f32 %v6392_v19, 0.0  ;;  %5675 = vmatprep.mubr.bf16.mxu1 %v5329_v62 }
 0x6a1   :  { %v5305_v43 = vmax.f32 %v5265_v38, %v5273_v35  ;;  %5676 = vmatmul.mubr.bf16.vlgmr.msra.gmra.mrb[84].mxu1 %v10087_v46  ;;  %v7053_v46 = vld [vmem:[#allocation7 + $0x28] sm:$0xff]  }
 0x6a2   :  { %v5321_v51 = vmax.f32 %v5303_v2, %v5304_v63  ;;  %v5306_v54 = vmax.f32 %v5266_v56, %v5274_v12  ;;  %6290 = vmatpush3.bf16.msra.mxu1 %v7048_v29 }
 0x6a3   :  { %6291 = vmatprep.subr.bf16.mxu1 %v7049_v52 }
 0x6a4   :  { %v5322_v3 = vmax.f32 %v5305_v43, %v5306_v54 }
 0x6a6   :  { %v5330_v26 = vpack.c.bf16 %v5322_v3, %v5321_v51  ;;  %6292 = vmatpush3.bf16.msra.mxu1 %v7049_v52 }
 0x6a7   :  { %6293 = vmatprep.subr.bf16.mxu1 %v7050_v16 }
 0x6a8   :  { %5683 = vmatprep.mubr.bf16.mxu1 %v5330_v26 }
 0x6a9   :  { %5684 = vmatmul.mubr.bf16.gmra.mrb[88].mxu1 %v5328_v50  ;;  %v7055_v50 = vld [vmem:[#allocation7 + $0x38] sm:$0xff]  }
 0x6aa   :  { %6294 = vmatpush3.bf16.msra.mxu1 %v7050_v16 }
 0x6ab   :  { %6295 = vmatprep.subr.bf16.mxu1 %v7051_v17 }
 0x6ae   :  { %6296 = vmatpush3.bf16.msra.mxu1 %v7051_v17 }
 0x6af   :  { %6297 = vmatprep.subr.bf16.mxu1 %v7052_v25 }
 0x6b2   :  { %6298 = vmatpush3.bf16.msra.mxu1 %v7052_v25 }
 0x6b3   :  { %6299 = vmatprep.subr.bf16.mxu1 %v7053_v46 }
 0x6b6   :  { %6300 = vmatpush3.bf16.msra.mxu1 %v7053_v46 }
 0x6b7   :  { %6301 = vmatprep.subr.bf16.mxu1 %v7054_v28 }
 0x6ba   :  { %6302 = vmatpush3.bf16.msra.mxu1 %v7054_v28 }
 0x6bb   :  { %6303 = vmatprep.subr.bf16.mxu1 %v7055_v50 }
 0x6be   :  { %6304 = vmatpush3.bf16.msra.mxu1 %v7055_v50 }
 0x734   :  { %v6239_v55 = vpop.f32.mrb[76].mxu1 }
 0x735   :  { %v6240_v30 = vpop.f32.mrb[77].mxu1 }
 0x736   :  { %v6241_v10 = vadd.f32 %v6240_v30, %v6239_v55  ;;  %v6242_v39 = vpop.f32.mrb[78].mxu1 }
 0x737   :  { %v6243_v40 = vpop.f32.mrb[79].mxu1 }
 0x738   :  { %v6244_v21 = vadd.f32 %v6243_v40, %v6242_v39  ;;  %v5629_v11 = vadd.f32 %v6241_v10, %v6181_v23 }
 0x73a   :  { %v5632_v4 = vadd.f32 %v6244_v21, %v6181_v23 }
 0x73c   :  { %v6245_v44 = vpop.f32.mrb[80].mxu1 }
 0x73d   :  { %v6246_v42 = vpop.f32.mrb[81].mxu1 }
 0x73e   :  { %v6247_v1 = vadd.f32 %v6246_v42, %v6245_v44  ;;  %v6248_v60 = vpop.f32.mrb[82].mxu1 }
 0x73f   :  { %v6249_v45 = vpop.f32.mrb[83].mxu1 }
 0x740   :  { %v6250_v34 = vadd.f32 %v6249_v45, %v6248_v60  ;;  %v5637_v58 = vadd.f32 %v6247_v1, %v6181_v23 }
 0x742   :  { %v5640_v33 = vadd.f32 %v6250_v34, %v6181_v23 }
 0x774   :  { %v6267_v32 = vpop.f32.mrb[84].mxu1 }
 0x775   :  { %v6268_v6 = vpop.f32.mrb[85].mxu1 }
 0x776   :  { %v6269_v13 = vadd.f32 %v6268_v6, %v6267_v32  ;;  %v6270_v41 = vpop.f32.mrb[86].mxu1 }
 0x777   :  { %v6271_v0 = vpop.f32.mrb[87].mxu1 }
 0x778   :  { %v5678_v14 = vadd.f32 %v6269_v13, %v5629_v11  ;;  %v6272_v7 = vadd.f32 %v6271_v0, %v6270_v41 }
 0x77a   :  { %v5681_v27 = vadd.f32 %v6272_v7, %v5632_v4  ;;  %v5692_v20 = vmax.f32 %v5678_v14, 0.0 }
 0x77c   :  { %v5693_v9 = vmax.f32 %v5681_v27, 0.0  ;;  %v6273_v18 = vpop.f32.mrb[88].mxu1 }
 0x77d   :  { %v6274_v48 = vpop.f32.mrb[89].mxu1 }
 0x77e   :  { %v6275_v53 = vadd.f32 %v6274_v48, %v6273_v18  ;;  %v6276_v47 = vpop.f32.mrb[90].mxu1  ;;  %v5696_v31 = vpack.c.bf16 %v5693_v9, %v5692_v20 }
 0x77f   :  { %v6277_v22 = vpop.f32.mrb[91].mxu1 }
 0x780   :  { %v5686_v57 = vadd.f32 %v6275_v53, %v5637_v58  ;;  %v6278_v37 = vadd.f32 %v6277_v22, %v6276_v47  ;;  %6305 = vmatprep.mubr.bf16.mxu1 %v5696_v31 }
 0x782   :  { %v5689_v15 = vadd.f32 %v6278_v37, %v5640_v33  ;;  %v5694_v24 = vmax.f32 %v5686_v57, 0.0 }
 0x784   :  { %v5695_v8 = vmax.f32 %v5689_v15, 0.0 }
 0x786   :  { %v5697_v61 = vpack.c.bf16 %v5695_v8, %v5694_v24 }
 0x788   :  { %6306 = vmatmul.mubr.bf16.vlgmr.msra.gmra.mrb[92].mxu1 %v5697_v61 }
 0x85b   :  { %v6307_v49 = vpop.f32.mrb[92].mxu1 }
 0x85c   :  { %v5812_v5 = vadd.f32 %v6307_v49, %v6214_v59  ;;  %v5803_v36 = vpop.f32.mrb[93].mxu1 }
 0x85d   :  { %v5804_v19 = vadd.f32 %v6214_v59, %v5803_v36  ;;  %v6308_v62 = vpop.f32.mrb[94].mxu1 }
 0x85e   :  { %5820 = vst [vmem:[%s10128_s9 + $0x10] sm:$0xff] %v5812_v5  ;;  %v5815_v38 = vadd.f32 %v6308_v62, %v6214_v59  ;;  %v5806_v2 = vpop.f32.mrb[95].mxu1 }
 0x85f   :  { %5818 = vst [vmem:[%s10128_s9] sm:$0xff] %v5804_v19  ;;  %v5807_v35 = vadd.f32 %v6214_v59, %v5806_v2 }
 0x860   :  { %5821 = vst [vmem:[%s10128_s9 + $0x18] sm:$0xff] %v5815_v38 }
 0x861   :  { %5819 = vst [vmem:[%s10128_s9 + $0x8] sm:$0xff] %v5807_v35 }
 0x862   :  { %5826 = vsyncpa [#allocation3], 1 }
 0x863   :  { %5827 = vsyncpa [#allocation5], 1 }
 0x864   :  { %5828 = vsyncpa [#allocation8], 1 }

</bundles_post_ra>
